<compile_context>
chip_gen: v6e
topology: v6e:2x2x1
jax: 0.10.0
libtpu: 0.0.40
codegen_flags: <defaults>
</compile_context>

<pallas_src>
import functools

import jax
import jax.numpy as jnp
from jax.experimental import pallas as pl
from jax.experimental.pallas import tpu as pltpu

BN_EPS = 1e-5
ACTS = ("tanh", "tanh", "tanh", "prelu", "prelu", "prelu")


def _autoencoder_kernel(alpha_ref, x_ref, *refs, dims, acts):
    """Fused 6-layer forward with per-layer double-buffered weight DMA.

    refs = w0..w5 (HBM), g0..g5, beta0..beta5 (VMEM), enc_out, dec_out,
           wbuf0, wbuf1 (VMEM scratch slots), sem (2 DMA semaphores).
    """
    n = len(acts)
    w_hbm = refs[0:n]
    g_refs = refs[n:2 * n]
    be_refs = refs[2 * n:3 * n]
    enc_ref = refs[3 * n]
    dec_ref = refs[3 * n + 1]
    wbufs = (refs[3 * n + 2], refs[3 * n + 3])
    sem = refs[3 * n + 4]

    def start_fetch(i, slot):
        fi, fo = dims[i]
        cp = pltpu.make_async_copy(
            w_hbm[i], wbufs[slot].at[0:fi, 0:fo], sem.at[slot])
        cp.start()
        return cp

    alpha = alpha_ref[0]                       # PReLU scalar from SMEM
    inv_b = jnp.float32(1.0 / x_ref.shape[0])  # static batch size

    # Prime the pipeline: layer 0's weights into slot 0.
    cp = start_fetch(0, 0)
    h16 = x_ref[...].astype(jnp.bfloat16)      # activations chained in bf16

    for i in range(n):
        slot = i % 2
        fi, fo = dims[i]

        # Prefetch next layer's weights into the other slot, then wait on ours.
        if i + 1 < n:
            cp_next = start_fetch(i + 1, 1 - slot)
        cp.wait()

        w = wbufs[slot][0:fi, 0:fo]
        # Linear (bias dropped: cancels exactly under training-mode BN).
        y = jnp.dot(h16, w, preferred_element_type=jnp.float32)

        # BatchNorm1d (training): one-pass batch mean / biased variance.
        s1 = jnp.sum(y, axis=0, keepdims=True)
        s2 = jnp.sum(y * y, axis=0, keepdims=True)
        mean = s1 * inv_b
        var = jnp.maximum(s2 * inv_b - mean * mean, 0.0)
        scale = g_refs[i][...] * jax.lax.rsqrt(var + BN_EPS)   # folded gamma
        shift = be_refs[i][...] - mean * scale                 # folded beta
        z = y * scale + shift

        # Activation (f32 vector math; portable to v5e).
        if acts[i] == "tanh":
            act = jnp.tanh(z)
        else:  # PReLU, single scalar parameter
            act = jnp.where(z > 0.0, z, alpha * z)

        if i == 2:                    # end of encoder
            enc_ref[...] = act
        if i == n - 1:
            dec_ref[...] = act
        else:
            h16 = act.astype(jnp.bfloat16)
            cp = cp_next


@jax.jit
def autoencoder_tanh_forward(x, weights, gammas, betas, prelu_alpha):
    """x:(B,1152) f32, weights[i]:(Fin,Fout) bf16, gammas/betas[i]:(1,Fout) f32,
    prelu_alpha:(1,) f32.  Returns (encoded, decoded)."""
    B = x.shape[0]
    n = len(weights)
    dims = tuple((w.shape[0], w.shape[1]) for w in weights)
    dim = weights[2].shape[1]
    fout_last = weights[-1].shape[1]

    # Double-buffer slots: even layers use slot 0, odd layers slot 1.
    shape0 = (max(dims[i][0] for i in range(0, n, 2)),
              max(dims[i][1] for i in range(0, n, 2)))
    shape1 = (max(dims[i][0] for i in range(1, n, 2)),
              max(dims[i][1] for i in range(1, n, 2)))

    vmem = pl.BlockSpec(memory_space=pltpu.MemorySpace.VMEM)
    smem = pl.BlockSpec(memory_space=pltpu.MemorySpace.SMEM)
    hbm = pl.BlockSpec(memory_space=pl.ANY)   # raw HBM ref; DMA'd manually

    flops = 2 * B * sum(fi * fo for fi, fo in dims)
    transcendentals = B * (512 + 256 + dim)   # tanh evaluations
    bytes_accessed = (sum(fi * fo for fi, fo in dims) * 2     # bf16 weights
                      + x.size * 4                             # input
                      + B * (dim + fout_last) * 4              # outputs
                      + sum(fo for _, fo in dims) * 2 * 4)     # gamma/beta

    kernel = functools.partial(_autoencoder_kernel, dims=dims, acts=ACTS)
    encoded, decoded = pl.pallas_call(
        kernel,
        out_shape=(jax.ShapeDtypeStruct((B, dim), jnp.float32),
                   jax.ShapeDtypeStruct((B, fout_last), jnp.float32)),
        in_specs=[smem, vmem] + [hbm] * n + [vmem] * (2 * n),
        out_specs=(vmem, vmem),
        scratch_shapes=[pltpu.VMEM(shape0, jnp.bfloat16),
                        pltpu.VMEM(shape1, jnp.bfloat16),
                        pltpu.SemaphoreType.DMA((2,))],
        cost_estimate=pl.CostEstimate(flops=flops,
                                      transcendentals=transcendentals,
                                      bytes_accessed=bytes_accessed),
    )(prelu_alpha, x, *weights, *gammas, *betas)
    return encoded, decoded


def build_params(dimension, seed=0):
    """PyTorch-default-style init (uniform +/- 1/sqrt(fin)); weights stored bf16.
    Linear bias omitted on purpose: it cancels exactly under training-mode BN."""
    dims = [(1152, 512), (512, 256), (256, dimension),       # encoder
            (dimension, 256), (256, 512), (512, 1152)]       # decoder
    keys = jax.random.split(jax.random.PRNGKey(seed), len(dims))
    weights, gammas, betas = [], [], []
    for k, (fi, fo) in zip(keys, dims):
        bound = 1.0 / jnp.sqrt(jnp.float32(fi))
        w = jax.random.uniform(k, (fi, fo), jnp.float32, -bound, bound)
        weights.append(w.astype(jnp.bfloat16))
        gammas.append(jnp.ones((1, fo), jnp.float32))    # BatchNorm weight
        betas.append(jnp.zeros((1, fo), jnp.float32))    # BatchNorm bias
    prelu_alpha = jnp.full((1,), 0.25, jnp.float32)      # nn.PReLU() default
    return weights, gammas, betas, prelu_alpha


def reference_forward(x, weights, gammas, betas, prelu_alpha):
    """Pure-JAX reference mirroring the module (training-mode BN, bf16 weights)."""
    h = x
    enc = None
    for i, (w, g, b) in enumerate(zip(weights, gammas, betas)):
        y = jnp.dot(h.astype(jnp.bfloat16).astype(jnp.float32),
                    w.astype(jnp.float32))
        mean = jnp.mean(y, axis=0, keepdims=True)
        var = jnp.mean((y - mean) ** 2, axis=0, keepdims=True)
        z = (y - mean) * (g * jax.lax.rsqrt(var + BN_EPS)) + b
        if ACTS[i] == "tanh":
            h = jnp.tanh(z)
        else:
            h = jnp.where(z > 0.0, z, prelu_alpha[0] * z)
        if i == 2:
            enc = h
    return enc, h


if __name__ == "__main__":
    B = 8           # batch (>=2 required for training-mode BatchNorm statistics)
    DIM = 128       # bottleneck "dimension" argument of the module

    weights, gammas, betas, prelu_alpha = build_params(DIM, seed=0)
    x = jax.random.normal(jax.random.PRNGKey(0), (B, 1152), jnp.float32)

    encoded, decoded = autoencoder_tanh_forward(x, weights, gammas, betas, prelu_alpha)
    jax.block_until_ready((encoded, decoded))

    assert encoded.shape == (B, DIM)
    assert decoded.shape == (B, 1152)
    assert bool(jnp.all(jnp.isfinite(encoded))) and bool(jnp.all(jnp.isfinite(decoded)))

    # Correctness vs. pure-JAX reference (loose tolerance: MXU accumulation
    # order and one-pass vs two-pass variance differ slightly in f32).
    enc_ref, dec_ref = reference_forward(x, weights, gammas, betas, prelu_alpha)
    err = max(float(jnp.max(jnp.abs(encoded - enc_ref))),
              float(jnp.max(jnp.abs(decoded - dec_ref))))
    assert err < 5e-2, f"max abs error vs reference too large: {err}"

    print("KERNEL_OK")
</pallas_src>

<mosaic_0001>
module attributes {stable_mosaic.version = 11 : i64} {
  func.func @_autoencoder_kernel(%arg0: memref<1xf32, #tpu.memory_space<smem>>, %arg1: memref<8x1152xf32, #tpu.memory_space<vmem>>, %arg2: memref<1152x512xbf16, #tpu.memory_space<any>>, %arg3: memref<512x256xbf16, #tpu.memory_space<any>>, %arg4: memref<256x128xbf16, #tpu.memory_space<any>>, %arg5: memref<128x256xbf16, #tpu.memory_space<any>>, %arg6: memref<256x512xbf16, #tpu.memory_space<any>>, %arg7: memref<512x1152xbf16, #tpu.memory_space<any>>, %arg8: memref<1x512xf32, #tpu.memory_space<vmem>>, %arg9: memref<1x256xf32, #tpu.memory_space<vmem>>, %arg10: memref<1x128xf32, #tpu.memory_space<vmem>>, %arg11: memref<1x256xf32, #tpu.memory_space<vmem>>, %arg12: memref<1x512xf32, #tpu.memory_space<vmem>>, %arg13: memref<1x1152xf32, #tpu.memory_space<vmem>>, %arg14: memref<1x512xf32, #tpu.memory_space<vmem>>, %arg15: memref<1x256xf32, #tpu.memory_space<vmem>>, %arg16: memref<1x128xf32, #tpu.memory_space<vmem>>, %arg17: memref<1x256xf32, #tpu.memory_space<vmem>>, %arg18: memref<1x512xf32, #tpu.memory_space<vmem>>, %arg19: memref<1x1152xf32, #tpu.memory_space<vmem>>, %arg20: memref<8x128xf32, #tpu.memory_space<vmem>>, %arg21: memref<8x1152xf32, #tpu.memory_space<vmem>>, %arg22: memref<1152x512xbf16, #tpu.memory_space<vmem>>, %arg23: memref<512x1152xbf16, #tpu.memory_space<vmem>>, %arg24: memref<2x!tpu.dma_semaphore, #tpu.memory_space<semaphore_mem>>) attributes {dimension_semantics = [], scalar_prefetch = 0 : i64, scratch_operands = 3 : i64, tpu.core_type = #tpu.core_type<tc>} {
    %c0 = arith.constant 0 : index
    %0 = memref.load %arg0[%c0] : memref<1xf32, #tpu.memory_space<smem>>
    %c0_i32 = arith.constant 0 : i32
    %c0_i32_0 = arith.constant 0 : i32
    %c0_i32_1 = arith.constant 0 : i32
    %1 = tpu.memref_slice %arg22[%c0_i32_0, %c0_i32_1] : memref<1152x512xbf16, #tpu.memory_space<vmem>> -> memref<1152x512xbf16, #tpu.memory_space<vmem>>
    %2 = tpu.memref_slice %arg24[%c0_i32] : memref<2x!tpu.dma_semaphore, #tpu.memory_space<semaphore_mem>> -> memref<1x!tpu.dma_semaphore, #tpu.memory_space<semaphore_mem>>
    %3 = tpu.memref_squeeze %2 : memref<1x!tpu.dma_semaphore, #tpu.memory_space<semaphore_mem>> -> memref<!tpu.dma_semaphore, #tpu.memory_space<semaphore_mem>>
    tpu.enqueue_dma source(%arg2 : memref<1152x512xbf16, #tpu.memory_space<any>>) target(%1 : memref<1152x512xbf16, #tpu.memory_space<vmem>>) target_semaphore(%3 : memref<!tpu.dma_semaphore, #tpu.memory_space<semaphore_mem>>)
    %c0_2 = arith.constant 0 : index
    %c0_3 = arith.constant 0 : index
    %4 = vector.load %arg1[%c0_2, %c0_3] : memref<8x1152xf32, #tpu.memory_space<vmem>>, vector<8x1152xf32>
    %5 = arith.truncf %4 : vector<8x1152xf32> to vector<8x1152xbf16>
    %c1_i32 = arith.constant 1 : i32
    %c0_i32_4 = arith.constant 0 : i32
    %c0_i32_5 = arith.constant 0 : i32
    %6 = tpu.memref_slice %arg23[%c0_i32_4, %c0_i32_5] : memref<512x1152xbf16, #tpu.memory_space<vmem>> -> memref<512x256xbf16, #tpu.memory_space<vmem>>
    %7 = tpu.memref_slice %arg24[%c1_i32] : memref<2x!tpu.dma_semaphore, #tpu.memory_space<semaphore_mem>> -> memref<1x!tpu.dma_semaphore, #tpu.memory_space<semaphore_mem>>
    %8 = tpu.memref_squeeze %7 : memref<1x!tpu.dma_semaphore, #tpu.memory_space<semaphore_mem>> -> memref<!tpu.dma_semaphore, #tpu.memory_space<semaphore_mem>>
    tpu.enqueue_dma source(%arg3 : memref<512x256xbf16, #tpu.memory_space<any>>) target(%6 : memref<512x256xbf16, #tpu.memory_space<vmem>>) target_semaphore(%8 : memref<!tpu.dma_semaphore, #tpu.memory_space<semaphore_mem>>)
    %c0_i32_6 = arith.constant 0 : i32
    %c0_i32_7 = arith.constant 0 : i32
    %c0_i32_8 = arith.constant 0 : i32
    %9 = tpu.memref_slice %arg22[%c0_i32_7, %c0_i32_8] : memref<1152x512xbf16, #tpu.memory_space<vmem>> -> memref<1152x512xbf16, #tpu.memory_space<vmem>>
    %10 = tpu.memref_slice %arg24[%c0_i32_6] : memref<2x!tpu.dma_semaphore, #tpu.memory_space<semaphore_mem>> -> memref<1x!tpu.dma_semaphore, #tpu.memory_space<semaphore_mem>>
    %11 = tpu.memref_squeeze %10 : memref<1x!tpu.dma_semaphore, #tpu.memory_space<semaphore_mem>> -> memref<!tpu.dma_semaphore, #tpu.memory_space<semaphore_mem>>
    tpu.wait_dma2 semaphore(%11 : memref<!tpu.dma_semaphore, #tpu.memory_space<semaphore_mem>>) src(%arg2 : memref<1152x512xbf16, #tpu.memory_space<any>>) dst(%9 : memref<1152x512xbf16, #tpu.memory_space<vmem>>)
    %c0_9 = arith.constant 0 : index
    %c0_10 = arith.constant 0 : index
    %12 = vector.load %arg22[%c0_9, %c0_10] : memref<1152x512xbf16, #tpu.memory_space<vmem>>, vector<1152x512xbf16>
    %cst = arith.constant dense<0.000000e+00> : vector<8x512xf32>
    %13 = tpu.matmul %5, %12, %cst {dimension_numbers = #tpu.dot_dimension_numbers<[1], [0], [0], [1], [0, 0, 1, 1], [], []>} : vector<8x1152xbf16>, vector<1152x512xbf16>, vector<8x512xf32> -> vector<8x512xf32>
    %cst_11 = arith.constant dense<0.000000e+00> : vector<512xf32>
    %14 = vector.multi_reduction <add>, %13, %cst_11 [0] : vector<8x512xf32> to vector<512xf32>
    %15 = vector.shape_cast %14 : vector<512xf32> to vector<1x512xf32>
    %16 = arith.mulf %13, %13 : vector<8x512xf32>
    %cst_12 = arith.constant dense<0.000000e+00> : vector<512xf32>
    %17 = vector.multi_reduction <add>, %16, %cst_12 [0] : vector<8x512xf32> to vector<512xf32>
    %18 = vector.shape_cast %17 : vector<512xf32> to vector<1x512xf32>
    %cst_13 = arith.constant 1.250000e-01 : f32
    %19 = vector.broadcast %cst_13 : f32 to vector<1x512xf32>
    %20 = arith.mulf %15, %19 : vector<1x512xf32>
    %cst_14 = arith.constant 1.250000e-01 : f32
    %21 = vector.broadcast %cst_14 : f32 to vector<1x512xf32>
    %22 = arith.mulf %18, %21 : vector<1x512xf32>
    %23 = arith.mulf %20, %20 : vector<1x512xf32>
    %24 = arith.subf %22, %23 : vector<1x512xf32>
    %cst_15 = arith.constant 0.000000e+00 : f32
    %25 = vector.broadcast %cst_15 : f32 to vector<1x512xf32>
    %26 = arith.maximumf %24, %25 : vector<1x512xf32>
    %c0_16 = arith.constant 0 : index
    %c0_17 = arith.constant 0 : index
    %27 = vector.load %arg8[%c0_16, %c0_17] : memref<1x512xf32, #tpu.memory_space<vmem>>, vector<1x512xf32>
    %cst_18 = arith.constant 9.99999974E-6 : f32
    %28 = vector.broadcast %cst_18 : f32 to vector<1x512xf32>
    %29 = arith.addf %26, %28 : vector<1x512xf32>
    %30 = math.rsqrt %29 : vector<1x512xf32>
    %31 = arith.mulf %27, %30 : vector<1x512xf32>
    %c0_19 = arith.constant 0 : index
    %c0_20 = arith.constant 0 : index
    %32 = vector.load %arg14[%c0_19, %c0_20] : memref<1x512xf32, #tpu.memory_space<vmem>>, vector<1x512xf32>
    %33 = arith.mulf %20, %31 : vector<1x512xf32>
    %34 = arith.subf %32, %33 : vector<1x512xf32>
    %35 = vector.broadcast %31 : vector<1x512xf32> to vector<8x512xf32>
    %36 = arith.mulf %13, %35 : vector<8x512xf32>
    %37 = vector.broadcast %34 : vector<1x512xf32> to vector<8x512xf32>
    %38 = arith.addf %36, %37 : vector<8x512xf32>
    %39 = math.tanh %38 : vector<8x512xf32>
    %40 = arith.truncf %39 : vector<8x512xf32> to vector<8x512xbf16>
    %c0_i32_21 = arith.constant 0 : i32
    %c0_i32_22 = arith.constant 0 : i32
    %c0_i32_23 = arith.constant 0 : i32
    %41 = tpu.memref_slice %arg22[%c0_i32_22, %c0_i32_23] : memref<1152x512xbf16, #tpu.memory_space<vmem>> -> memref<256x128xbf16, #tpu.memory_space<vmem>>
    %42 = tpu.memref_slice %arg24[%c0_i32_21] : memref<2x!tpu.dma_semaphore, #tpu.memory_space<semaphore_mem>> -> memref<1x!tpu.dma_semaphore, #tpu.memory_space<semaphore_mem>>
    %43 = tpu.memref_squeeze %42 : memref<1x!tpu.dma_semaphore, #tpu.memory_space<semaphore_mem>> -> memref<!tpu.dma_semaphore, #tpu.memory_space<semaphore_mem>>
    tpu.enqueue_dma source(%arg4 : memref<256x128xbf16, #tpu.memory_space<any>>) target(%41 : memref<256x128xbf16, #tpu.memory_space<vmem>>) target_semaphore(%43 : memref<!tpu.dma_semaphore, #tpu.memory_space<semaphore_mem>>)
    %c1_i32_24 = arith.constant 1 : i32
    %c0_i32_25 = arith.constant 0 : i32
    %c0_i32_26 = arith.constant 0 : i32
    %44 = tpu.memref_slice %arg23[%c0_i32_25, %c0_i32_26] : memref<512x1152xbf16, #tpu.memory_space<vmem>> -> memref<512x256xbf16, #tpu.memory_space<vmem>>
    %45 = tpu.memref_slice %arg24[%c1_i32_24] : memref<2x!tpu.dma_semaphore, #tpu.memory_space<semaphore_mem>> -> memref<1x!tpu.dma_semaphore, #tpu.memory_space<semaphore_mem>>
    %46 = tpu.memref_squeeze %45 : memref<1x!tpu.dma_semaphore, #tpu.memory_space<semaphore_mem>> -> memref<!tpu.dma_semaphore, #tpu.memory_space<semaphore_mem>>
    tpu.wait_dma2 semaphore(%46 : memref<!tpu.dma_semaphore, #tpu.memory_space<semaphore_mem>>) src(%arg3 : memref<512x256xbf16, #tpu.memory_space<any>>) dst(%44 : memref<512x256xbf16, #tpu.memory_space<vmem>>)
    %c0_27 = arith.constant 0 : index
    %c0_28 = arith.constant 0 : index
    %47 = vector.load %arg23[%c0_27, %c0_28] : memref<512x1152xbf16, #tpu.memory_space<vmem>>, vector<512x256xbf16>
    %cst_29 = arith.constant dense<0.000000e+00> : vector<8x256xf32>
    %48 = tpu.matmul %40, %47, %cst_29 {dimension_numbers = #tpu.dot_dimension_numbers<[1], [0], [0], [1], [0, 0, 1, 1], [], []>} : vector<8x512xbf16>, vector<512x256xbf16>, vector<8x256xf32> -> vector<8x256xf32>
    %cst_30 = arith.constant dense<0.000000e+00> : vector<256xf32>
    %49 = vector.multi_reduction <add>, %48, %cst_30 [0] : vector<8x256xf32> to vector<256xf32>
    %50 = vector.shape_cast %49 : vector<256xf32> to vector<1x256xf32>
    %51 = arith.mulf %48, %48 : vector<8x256xf32>
    %cst_31 = arith.constant dense<0.000000e+00> : vector<256xf32>
    %52 = vector.multi_reduction <add>, %51, %cst_31 [0] : vector<8x256xf32> to vector<256xf32>
    %53 = vector.shape_cast %52 : vector<256xf32> to vector<1x256xf32>
    %cst_32 = arith.constant 1.250000e-01 : f32
    %54 = vector.broadcast %cst_32 : f32 to vector<1x256xf32>
    %55 = arith.mulf %50, %54 : vector<1x256xf32>
    %cst_33 = arith.constant 1.250000e-01 : f32
    %56 = vector.broadcast %cst_33 : f32 to vector<1x256xf32>
    %57 = arith.mulf %53, %56 : vector<1x256xf32>
    %58 = arith.mulf %55, %55 : vector<1x256xf32>
    %59 = arith.subf %57, %58 : vector<1x256xf32>
    %cst_34 = arith.constant 0.000000e+00 : f32
    %60 = vector.broadcast %cst_34 : f32 to vector<1x256xf32>
    %61 = arith.maximumf %59, %60 : vector<1x256xf32>
    %c0_35 = arith.constant 0 : index
    %c0_36 = arith.constant 0 : index
    %62 = vector.load %arg9[%c0_35, %c0_36] : memref<1x256xf32, #tpu.memory_space<vmem>>, vector<1x256xf32>
    %cst_37 = arith.constant 9.99999974E-6 : f32
    %63 = vector.broadcast %cst_37 : f32 to vector<1x256xf32>
    %64 = arith.addf %61, %63 : vector<1x256xf32>
    %65 = math.rsqrt %64 : vector<1x256xf32>
    %66 = arith.mulf %62, %65 : vector<1x256xf32>
    %c0_38 = arith.constant 0 : index
    %c0_39 = arith.constant 0 : index
    %67 = vector.load %arg15[%c0_38, %c0_39] : memref<1x256xf32, #tpu.memory_space<vmem>>, vector<1x256xf32>
    %68 = arith.mulf %55, %66 : vector<1x256xf32>
    %69 = arith.subf %67, %68 : vector<1x256xf32>
    %70 = vector.broadcast %66 : vector<1x256xf32> to vector<8x256xf32>
    %71 = arith.mulf %48, %70 : vector<8x256xf32>
    %72 = vector.broadcast %69 : vector<1x256xf32> to vector<8x256xf32>
    %73 = arith.addf %71, %72 : vector<8x256xf32>
    %74 = math.tanh %73 : vector<8x256xf32>
    %75 = arith.truncf %74 : vector<8x256xf32> to vector<8x256xbf16>
    %c1_i32_40 = arith.constant 1 : i32
    %c0_i32_41 = arith.constant 0 : i32
    %c0_i32_42 = arith.constant 0 : i32
    %76 = tpu.memref_slice %arg23[%c0_i32_41, %c0_i32_42] : memref<512x1152xbf16, #tpu.memory_space<vmem>> -> memref<128x256xbf16, #tpu.memory_space<vmem>>
    %77 = tpu.memref_slice %arg24[%c1_i32_40] : memref<2x!tpu.dma_semaphore, #tpu.memory_space<semaphore_mem>> -> memref<1x!tpu.dma_semaphore, #tpu.memory_space<semaphore_mem>>
    %78 = tpu.memref_squeeze %77 : memref<1x!tpu.dma_semaphore, #tpu.memory_space<semaphore_mem>> -> memref<!tpu.dma_semaphore, #tpu.memory_space<semaphore_mem>>
    tpu.enqueue_dma source(%arg5 : memref<128x256xbf16, #tpu.memory_space<any>>) target(%76 : memref<128x256xbf16, #tpu.memory_space<vmem>>) target_semaphore(%78 : memref<!tpu.dma_semaphore, #tpu.memory_space<semaphore_mem>>)
    %c0_i32_43 = arith.constant 0 : i32
    %c0_i32_44 = arith.constant 0 : i32
    %c0_i32_45 = arith.constant 0 : i32
    %79 = tpu.memref_slice %arg22[%c0_i32_44, %c0_i32_45] : memref<1152x512xbf16, #tpu.memory_space<vmem>> -> memref<256x128xbf16, #tpu.memory_space<vmem>>
    %80 = tpu.memref_slice %arg24[%c0_i32_43] : memref<2x!tpu.dma_semaphore, #tpu.memory_space<semaphore_mem>> -> memref<1x!tpu.dma_semaphore, #tpu.memory_space<semaphore_mem>>
    %81 = tpu.memref_squeeze %80 : memref<1x!tpu.dma_semaphore, #tpu.memory_space<semaphore_mem>> -> memref<!tpu.dma_semaphore, #tpu.memory_space<semaphore_mem>>
    tpu.wait_dma2 semaphore(%81 : memref<!tpu.dma_semaphore, #tpu.memory_space<semaphore_mem>>) src(%arg4 : memref<256x128xbf16, #tpu.memory_space<any>>) dst(%79 : memref<256x128xbf16, #tpu.memory_space<vmem>>)
    %c0_46 = arith.constant 0 : index
    %c0_47 = arith.constant 0 : index
    %82 = vector.load %arg22[%c0_46, %c0_47] : memref<1152x512xbf16, #tpu.memory_space<vmem>>, vector<256x128xbf16>
    %cst_48 = arith.constant dense<0.000000e+00> : vector<8x128xf32>
    %83 = tpu.matmul %75, %82, %cst_48 {dimension_numbers = #tpu.dot_dimension_numbers<[1], [0], [0], [1], [0, 0, 1, 1], [], []>} : vector<8x256xbf16>, vector<256x128xbf16>, vector<8x128xf32> -> vector<8x128xf32>
    %cst_49 = arith.constant dense<0.000000e+00> : vector<128xf32>
    %84 = vector.multi_reduction <add>, %83, %cst_49 [0] : vector<8x128xf32> to vector<128xf32>
    %85 = vector.shape_cast %84 : vector<128xf32> to vector<1x128xf32>
    %86 = arith.mulf %83, %83 : vector<8x128xf32>
    %cst_50 = arith.constant dense<0.000000e+00> : vector<128xf32>
    %87 = vector.multi_reduction <add>, %86, %cst_50 [0] : vector<8x128xf32> to vector<128xf32>
    %88 = vector.shape_cast %87 : vector<128xf32> to vector<1x128xf32>
    %cst_51 = arith.constant 1.250000e-01 : f32
    %89 = vector.broadcast %cst_51 : f32 to vector<1x128xf32>
    %90 = arith.mulf %85, %89 : vector<1x128xf32>
    %cst_52 = arith.constant 1.250000e-01 : f32
    %91 = vector.broadcast %cst_52 : f32 to vector<1x128xf32>
    %92 = arith.mulf %88, %91 : vector<1x128xf32>
    %93 = arith.mulf %90, %90 : vector<1x128xf32>
    %94 = arith.subf %92, %93 : vector<1x128xf32>
    %cst_53 = arith.constant 0.000000e+00 : f32
    %95 = vector.broadcast %cst_53 : f32 to vector<1x128xf32>
    %96 = arith.maximumf %94, %95 : vector<1x128xf32>
    %c0_54 = arith.constant 0 : index
    %c0_55 = arith.constant 0 : index
    %97 = vector.load %arg10[%c0_54, %c0_55] : memref<1x128xf32, #tpu.memory_space<vmem>>, vector<1x128xf32>
    %cst_56 = arith.constant 9.99999974E-6 : f32
    %98 = vector.broadcast %cst_56 : f32 to vector<1x128xf32>
    %99 = arith.addf %96, %98 : vector<1x128xf32>
    %100 = math.rsqrt %99 : vector<1x128xf32>
    %101 = arith.mulf %97, %100 : vector<1x128xf32>
    %c0_57 = arith.constant 0 : index
    %c0_58 = arith.constant 0 : index
    %102 = vector.load %arg16[%c0_57, %c0_58] : memref<1x128xf32, #tpu.memory_space<vmem>>, vector<1x128xf32>
    %103 = arith.mulf %90, %101 : vector<1x128xf32>
    %104 = arith.subf %102, %103 : vector<1x128xf32>
    %105 = vector.broadcast %101 : vector<1x128xf32> to vector<8x128xf32>
    %106 = arith.mulf %83, %105 : vector<8x128xf32>
    %107 = vector.broadcast %104 : vector<1x128xf32> to vector<8x128xf32>
    %108 = arith.addf %106, %107 : vector<8x128xf32>
    %109 = math.tanh %108 : vector<8x128xf32>
    %c0_59 = arith.constant 0 : index
    %c0_60 = arith.constant 0 : index
    %110 = vector.load %arg20[%c0_59, %c0_60] : memref<8x128xf32, #tpu.memory_space<vmem>>, vector<8x128xf32>
    tpu.vector_store %arg20[%c0_59, %c0_60], %109 {strides = array<i32>} : memref<8x128xf32, #tpu.memory_space<vmem>>, vector<8x128xf32>,
    %111 = arith.truncf %109 : vector<8x128xf32> to vector<8x128xbf16>
    %c0_i32_61 = arith.constant 0 : i32
    %c0_i32_62 = arith.constant 0 : i32
    %c0_i32_63 = arith.constant 0 : i32
    %112 = tpu.memref_slice %arg22[%c0_i32_62, %c0_i32_63] : memref<1152x512xbf16, #tpu.memory_space<vmem>> -> memref<256x512xbf16, #tpu.memory_space<vmem>>
    %113 = tpu.memref_slice %arg24[%c0_i32_61] : memref<2x!tpu.dma_semaphore, #tpu.memory_space<semaphore_mem>> -> memref<1x!tpu.dma_semaphore, #tpu.memory_space<semaphore_mem>>
    %114 = tpu.memref_squeeze %113 : memref<1x!tpu.dma_semaphore, #tpu.memory_space<semaphore_mem>> -> memref<!tpu.dma_semaphore, #tpu.memory_space<semaphore_mem>>
    tpu.enqueue_dma source(%arg6 : memref<256x512xbf16, #tpu.memory_space<any>>) target(%112 : memref<256x512xbf16, #tpu.memory_space<vmem>>) target_semaphore(%114 : memref<!tpu.dma_semaphore, #tpu.memory_space<semaphore_mem>>)
    %c1_i32_64 = arith.constant 1 : i32
    %c0_i32_65 = arith.constant 0 : i32
    %c0_i32_66 = arith.constant 0 : i32
    %115 = tpu.memref_slice %arg23[%c0_i32_65, %c0_i32_66] : memref<512x1152xbf16, #tpu.memory_space<vmem>> -> memref<128x256xbf16, #tpu.memory_space<vmem>>
    %116 = tpu.memref_slice %arg24[%c1_i32_64] : memref<2x!tpu.dma_semaphore, #tpu.memory_space<semaphore_mem>> -> memref<1x!tpu.dma_semaphore, #tpu.memory_space<semaphore_mem>>
    %117 = tpu.memref_squeeze %116 : memref<1x!tpu.dma_semaphore, #tpu.memory_space<semaphore_mem>> -> memref<!tpu.dma_semaphore, #tpu.memory_space<semaphore_mem>>
    tpu.wait_dma2 semaphore(%117 : memref<!tpu.dma_semaphore, #tpu.memory_space<semaphore_mem>>) src(%arg5 : memref<128x256xbf16, #tpu.memory_space<any>>) dst(%115 : memref<128x256xbf16, #tpu.memory_space<vmem>>)
    %c0_67 = arith.constant 0 : index
    %c0_68 = arith.constant 0 : index
    %118 = vector.load %arg23[%c0_67, %c0_68] : memref<512x1152xbf16, #tpu.memory_space<vmem>>, vector<128x256xbf16>
    %cst_69 = arith.constant dense<0.000000e+00> : vector<8x256xf32>
    %119 = tpu.matmul %111, %118, %cst_69 {dimension_numbers = #tpu.dot_dimension_numbers<[1], [0], [0], [1], [0, 0, 1, 1], [], []>} : vector<8x128xbf16>, vector<128x256xbf16>, vector<8x256xf32> -> vector<8x256xf32>
    %cst_70 = arith.constant dense<0.000000e+00> : vector<256xf32>
    %120 = vector.multi_reduction <add>, %119, %cst_70 [0] : vector<8x256xf32> to vector<256xf32>
    %121 = vector.shape_cast %120 : vector<256xf32> to vector<1x256xf32>
    %122 = arith.mulf %119, %119 : vector<8x256xf32>
    %cst_71 = arith.constant dense<0.000000e+00> : vector<256xf32>
    %123 = vector.multi_reduction <add>, %122, %cst_71 [0] : vector<8x256xf32> to vector<256xf32>
    %124 = vector.shape_cast %123 : vector<256xf32> to vector<1x256xf32>
    %cst_72 = arith.constant 1.250000e-01 : f32
    %125 = vector.broadcast %cst_72 : f32 to vector<1x256xf32>
    %126 = arith.mulf %121, %125 : vector<1x256xf32>
    %cst_73 = arith.constant 1.250000e-01 : f32
    %127 = vector.broadcast %cst_73 : f32 to vector<1x256xf32>
    %128 = arith.mulf %124, %127 : vector<1x256xf32>
    %129 = arith.mulf %126, %126 : vector<1x256xf32>
    %130 = arith.subf %128, %129 : vector<1x256xf32>
    %cst_74 = arith.constant 0.000000e+00 : f32
    %131 = vector.broadcast %cst_74 : f32 to vector<1x256xf32>
    %132 = arith.maximumf %130, %131 : vector<1x256xf32>
    %c0_75 = arith.constant 0 : index
    %c0_76 = arith.constant 0 : index
    %133 = vector.load %arg11[%c0_75, %c0_76] : memref<1x256xf32, #tpu.memory_space<vmem>>, vector<1x256xf32>
    %cst_77 = arith.constant 9.99999974E-6 : f32
    %134 = vector.broadcast %cst_77 : f32 to vector<1x256xf32>
    %135 = arith.addf %132, %134 : vector<1x256xf32>
    %136 = math.rsqrt %135 : vector<1x256xf32>
    %137 = arith.mulf %133, %136 : vector<1x256xf32>
    %c0_78 = arith.constant 0 : index
    %c0_79 = arith.constant 0 : index
    %138 = vector.load %arg17[%c0_78, %c0_79] : memref<1x256xf32, #tpu.memory_space<vmem>>, vector<1x256xf32>
    %139 = arith.mulf %126, %137 : vector<1x256xf32>
    %140 = arith.subf %138, %139 : vector<1x256xf32>
    %141 = vector.broadcast %137 : vector<1x256xf32> to vector<8x256xf32>
    %142 = arith.mulf %119, %141 : vector<8x256xf32>
    %143 = vector.broadcast %140 : vector<1x256xf32> to vector<8x256xf32>
    %144 = arith.addf %142, %143 : vector<8x256xf32>
    %cst_80 = arith.constant 0.000000e+00 : f32
    %145 = vector.broadcast %cst_80 : f32 to vector<8x256xf32>
    %146 = arith.cmpf ogt, %144, %145 : vector<8x256xf32>
    %147 = vector.broadcast %0 : f32 to vector<8x256xf32>
    %148 = arith.mulf %147, %144 : vector<8x256xf32>
    %149 = arith.select %146, %144, %148 : vector<8x256xi1>, vector<8x256xf32>
    %150 = arith.truncf %149 : vector<8x256xf32> to vector<8x256xbf16>
    %c1_i32_81 = arith.constant 1 : i32
    %c0_i32_82 = arith.constant 0 : i32
    %c0_i32_83 = arith.constant 0 : i32
    %151 = tpu.memref_slice %arg23[%c0_i32_82, %c0_i32_83] : memref<512x1152xbf16, #tpu.memory_space<vmem>> -> memref<512x1152xbf16, #tpu.memory_space<vmem>>
    %152 = tpu.memref_slice %arg24[%c1_i32_81] : memref<2x!tpu.dma_semaphore, #tpu.memory_space<semaphore_mem>> -> memref<1x!tpu.dma_semaphore, #tpu.memory_space<semaphore_mem>>
    %153 = tpu.memref_squeeze %152 : memref<1x!tpu.dma_semaphore, #tpu.memory_space<semaphore_mem>> -> memref<!tpu.dma_semaphore, #tpu.memory_space<semaphore_mem>>
    tpu.enqueue_dma source(%arg7 : memref<512x1152xbf16, #tpu.memory_space<any>>) target(%151 : memref<512x1152xbf16, #tpu.memory_space<vmem>>) target_semaphore(%153 : memref<!tpu.dma_semaphore, #tpu.memory_space<semaphore_mem>>)
    %c0_i32_84 = arith.constant 0 : i32
    %c0_i32_85 = arith.constant 0 : i32
    %c0_i32_86 = arith.constant 0 : i32
    %154 = tpu.memref_slice %arg22[%c0_i32_85, %c0_i32_86] : memref<1152x512xbf16, #tpu.memory_space<vmem>> -> memref<256x512xbf16, #tpu.memory_space<vmem>>
    %155 = tpu.memref_slice %arg24[%c0_i32_84] : memref<2x!tpu.dma_semaphore, #tpu.memory_space<semaphore_mem>> -> memref<1x!tpu.dma_semaphore, #tpu.memory_space<semaphore_mem>>
    %156 = tpu.memref_squeeze %155 : memref<1x!tpu.dma_semaphore, #tpu.memory_space<semaphore_mem>> -> memref<!tpu.dma_semaphore, #tpu.memory_space<semaphore_mem>>
    tpu.wait_dma2 semaphore(%156 : memref<!tpu.dma_semaphore, #tpu.memory_space<semaphore_mem>>) src(%arg6 : memref<256x512xbf16, #tpu.memory_space<any>>) dst(%154 : memref<256x512xbf16, #tpu.memory_space<vmem>>)
    %c0_87 = arith.constant 0 : index
    %c0_88 = arith.constant 0 : index
    %157 = vector.load %arg22[%c0_87, %c0_88] : memref<1152x512xbf16, #tpu.memory_space<vmem>>, vector<256x512xbf16>
    %cst_89 = arith.constant dense<0.000000e+00> : vector<8x512xf32>
    %158 = tpu.matmul %150, %157, %cst_89 {dimension_numbers = #tpu.dot_dimension_numbers<[1], [0], [0], [1], [0, 0, 1, 1], [], []>} : vector<8x256xbf16>, vector<256x512xbf16>, vector<8x512xf32> -> vector<8x512xf32>
    %cst_90 = arith.constant dense<0.000000e+00> : vector<512xf32>
    %159 = vector.multi_reduction <add>, %158, %cst_90 [0] : vector<8x512xf32> to vector<512xf32>
    %160 = vector.shape_cast %159 : vector<512xf32> to vector<1x512xf32>
    %161 = arith.mulf %158, %158 : vector<8x512xf32>
    %cst_91 = arith.constant dense<0.000000e+00> : vector<512xf32>
    %162 = vector.multi_reduction <add>, %161, %cst_91 [0] : vector<8x512xf32> to vector<512xf32>
    %163 = vector.shape_cast %162 : vector<512xf32> to vector<1x512xf32>
    %cst_92 = arith.constant 1.250000e-01 : f32
    %164 = vector.broadcast %cst_92 : f32 to vector<1x512xf32>
    %165 = arith.mulf %160, %164 : vector<1x512xf32>
    %cst_93 = arith.constant 1.250000e-01 : f32
    %166 = vector.broadcast %cst_93 : f32 to vector<1x512xf32>
    %167 = arith.mulf %163, %166 : vector<1x512xf32>
    %168 = arith.mulf %165, %165 : vector<1x512xf32>
    %169 = arith.subf %167, %168 : vector<1x512xf32>
    %cst_94 = arith.constant 0.000000e+00 : f32
    %170 = vector.broadcast %cst_94 : f32 to vector<1x512xf32>
    %171 = arith.maximumf %169, %170 : vector<1x512xf32>
    %c0_95 = arith.constant 0 : index
    %c0_96 = arith.constant 0 : index
    %172 = vector.load %arg12[%c0_95, %c0_96] : memref<1x512xf32, #tpu.memory_space<vmem>>, vector<1x512xf32>
    %cst_97 = arith.constant 9.99999974E-6 : f32
    %173 = vector.broadcast %cst_97 : f32 to vector<1x512xf32>
    %174 = arith.addf %171, %173 : vector<1x512xf32>
    %175 = math.rsqrt %174 : vector<1x512xf32>
    %176 = arith.mulf %172, %175 : vector<1x512xf32>
    %c0_98 = arith.constant 0 : index
    %c0_99 = arith.constant 0 : index
    %177 = vector.load %arg18[%c0_98, %c0_99] : memref<1x512xf32, #tpu.memory_space<vmem>>, vector<1x512xf32>
    %178 = arith.mulf %165, %176 : vector<1x512xf32>
    %179 = arith.subf %177, %178 : vector<1x512xf32>
    %180 = vector.broadcast %176 : vector<1x512xf32> to vector<8x512xf32>
    %181 = arith.mulf %158, %180 : vector<8x512xf32>
    %182 = vector.broadcast %179 : vector<1x512xf32> to vector<8x512xf32>
    %183 = arith.addf %181, %182 : vector<8x512xf32>
    %cst_100 = arith.constant 0.000000e+00 : f32
    %184 = vector.broadcast %cst_100 : f32 to vector<8x512xf32>
    %185 = arith.cmpf ogt, %183, %184 : vector<8x512xf32>
    %186 = vector.broadcast %0 : f32 to vector<8x512xf32>
    %187 = arith.mulf %186, %183 : vector<8x512xf32>
    %188 = arith.select %185, %183, %187 : vector<8x512xi1>, vector<8x512xf32>
    %189 = arith.truncf %188 : vector<8x512xf32> to vector<8x512xbf16>
    %c1_i32_101 = arith.constant 1 : i32
    %c0_i32_102 = arith.constant 0 : i32
    %c0_i32_103 = arith.constant 0 : i32
    %190 = tpu.memref_slice %arg23[%c0_i32_102, %c0_i32_103] : memref<512x1152xbf16, #tpu.memory_space<vmem>> -> memref<512x1152xbf16, #tpu.memory_space<vmem>>
    %191 = tpu.memref_slice %arg24[%c1_i32_101] : memref<2x!tpu.dma_semaphore, #tpu.memory_space<semaphore_mem>> -> memref<1x!tpu.dma_semaphore, #tpu.memory_space<semaphore_mem>>
    %192 = tpu.memref_squeeze %191 : memref<1x!tpu.dma_semaphore, #tpu.memory_space<semaphore_mem>> -> memref<!tpu.dma_semaphore, #tpu.memory_space<semaphore_mem>>
    tpu.wait_dma2 semaphore(%192 : memref<!tpu.dma_semaphore, #tpu.memory_space<semaphore_mem>>) src(%arg7 : memref<512x1152xbf16, #tpu.memory_space<any>>) dst(%190 : memref<512x1152xbf16, #tpu.memory_space<vmem>>)
    %c0_104 = arith.constant 0 : index
    %c0_105 = arith.constant 0 : index
    %193 = vector.load %arg23[%c0_104, %c0_105] : memref<512x1152xbf16, #tpu.memory_space<vmem>>, vector<512x1152xbf16>
    %cst_106 = arith.constant dense<0.000000e+00> : vector<8x1152xf32>
    %194 = tpu.matmul %189, %193, %cst_106 {dimension_numbers = #tpu.dot_dimension_numbers<[1], [0], [0], [1], [0, 0, 1, 1], [], []>} : vector<8x512xbf16>, vector<512x1152xbf16>, vector<8x1152xf32> -> vector<8x1152xf32>
    %cst_107 = arith.constant dense<0.000000e+00> : vector<1152xf32>
    %195 = vector.multi_reduction <add>, %194, %cst_107 [0] : vector<8x1152xf32> to vector<1152xf32>
    %196 = vector.shape_cast %195 : vector<1152xf32> to vector<1x1152xf32>
    %197 = arith.mulf %194, %194 : vector<8x1152xf32>
    %cst_108 = arith.constant dense<0.000000e+00> : vector<1152xf32>
    %198 = vector.multi_reduction <add>, %197, %cst_108 [0] : vector<8x1152xf32> to vector<1152xf32>
    %199 = vector.shape_cast %198 : vector<1152xf32> to vector<1x1152xf32>
    %cst_109 = arith.constant 1.250000e-01 : f32
    %200 = vector.broadcast %cst_109 : f32 to vector<1x1152xf32>
    %201 = arith.mulf %196, %200 : vector<1x1152xf32>
    %cst_110 = arith.constant 1.250000e-01 : f32
    %202 = vector.broadcast %cst_110 : f32 to vector<1x1152xf32>
    %203 = arith.mulf %199, %202 : vector<1x1152xf32>
    %204 = arith.mulf %201, %201 : vector<1x1152xf32>
    %205 = arith.subf %203, %204 : vector<1x1152xf32>
    %cst_111 = arith.constant 0.000000e+00 : f32
    %206 = vector.broadcast %cst_111 : f32 to vector<1x1152xf32>
    %207 = arith.maximumf %205, %206 : vector<1x1152xf32>
    %c0_112 = arith.constant 0 : index
    %c0_113 = arith.constant 0 : index
    %208 = vector.load %arg13[%c0_112, %c0_113] : memref<1x1152xf32, #tpu.memory_space<vmem>>, vector<1x1152xf32>
    %cst_114 = arith.constant 9.99999974E-6 : f32
    %209 = vector.broadcast %cst_114 : f32 to vector<1x1152xf32>
    %210 = arith.addf %207, %209 : vector<1x1152xf32>
    %211 = math.rsqrt %210 : vector<1x1152xf32>
    %212 = arith.mulf %208, %211 : vector<1x1152xf32>
    %c0_115 = arith.constant 0 : index
    %c0_116 = arith.constant 0 : index
    %213 = vector.load %arg19[%c0_115, %c0_116] : memref<1x1152xf32, #tpu.memory_space<vmem>>, vector<1x1152xf32>
    %214 = arith.mulf %201, %212 : vector<1x1152xf32>
    %215 = arith.subf %213, %214 : vector<1x1152xf32>
    %216 = vector.broadcast %212 : vector<1x1152xf32> to vector<8x1152xf32>
    %217 = arith.mulf %194, %216 : vector<8x1152xf32>
    %218 = vector.broadcast %215 : vector<1x1152xf32> to vector<8x1152xf32>
    %219 = arith.addf %217, %218 : vector<8x1152xf32>
    %cst_117 = arith.constant 0.000000e+00 : f32
    %220 = vector.broadcast %cst_117 : f32 to vector<8x1152xf32>
    %221 = arith.cmpf ogt, %219, %220 : vector<8x1152xf32>
    %222 = vector.broadcast %0 : f32 to vector<8x1152xf32>
    %223 = arith.mulf %222, %219 : vector<8x1152xf32>
    %224 = arith.select %221, %219, %223 : vector<8x1152xi1>, vector<8x1152xf32>
    %c0_118 = arith.constant 0 : index
    %c0_119 = arith.constant 0 : index
    %225 = vector.load %arg21[%c0_118, %c0_119] : memref<8x1152xf32, #tpu.memory_space<vmem>>, vector<8x1152xf32>
    tpu.vector_store %arg21[%c0_118, %c0_119], %224 {strides = array<i32>} : memref<8x1152xf32, #tpu.memory_space<vmem>>, vector<8x1152xf32>,
    return
  }
}

</mosaic_0001>

<bundles_post_ra>
// kernel: autoencoder_tanh_forward.1
= control target key start
LH: loop header
LB: loop body
LE: loop exit
PB: predicated region body
PF: predicated region fallthrough
CT: control target
= control target key end

     0   :  { %s10185_s0 = inlined_call_operand.<no memory space> [shape: f32[1], index: 0, kind: input, shape index: {}]   ;;  %s10186_s1 = inlined_call_operand.hbm [shape: f32[8,1152], index: 1, kind: input, shape index: {}]   ;;  %s10187_s2 = inlined_call_operand.hbm [shape: bf16[1152,512], index: 2, kind: input, shape index: {}]   ;;  %s10188_s3 = inlined_call_operand.hbm [shape: bf16[512,256], index: 3, kind: input, shape index: {}]   ;;  %s10189_s4 = inlined_call_operand.hbm [shape: bf16[256,128], index: 4, kind: input, shape index: {}]   ;;  %s10190_s5 = inlined_call_operand.hbm [shape: bf16[128,256], index: 5, kind: input, shape index: {}]   ;;  %s10191_s6 = inlined_call_operand.hbm [shape: bf16[256,512], index: 6, kind: input, shape index: {}]   ;;  %s10192_s7 = inlined_call_operand.hbm [shape: bf16[512,1152], index: 7, kind: input, shape index: {}]   ;;  %s10193_s8 = inlined_call_operand.hbm [shape: f32[1,512], index: 8, kind: input, shape index: {}]   ;;  %s10194_s9 = inlined_call_operand.hbm [shape: f32[1,256], index: 9, kind: input, shape index: {}]   ;;  %s10195_s10 = inlined_call_operand.hbm [shape: f32[1,128], index: 10, kind: input, shape index: {}]   ;;  %s10196_s11 = inlined_call_operand.hbm [shape: f32[1,256], index: 11, kind: input, shape index: {}]   ;;  %s10197_s12 = inlined_call_operand.hbm [shape: f32[1,512], index: 12, kind: input, shape index: {}]   ;;  %s10198_s13 = inlined_call_operand.hbm [shape: f32[1,1152], index: 13, kind: input, shape index: {}]   ;;  %s10199_s14 = inlined_call_operand.hbm [shape: f32[1,512], index: 14, kind: input, shape index: {}]   ;;  %s10200_s15 = inlined_call_operand.hbm [shape: f32[1,256], index: 15, kind: input, shape index: {}]   ;;  %s10201_s16 = inlined_call_operand.hbm [shape: f32[1,128], index: 16, kind: input, shape index: {}]   ;;  %s10202_s17 = inlined_call_operand.hbm [shape: f32[1,256], index: 17, kind: input, shape index: {}]   ;;  %s10203_s18 = inlined_call_operand.hbm [shape: f32[1,512], index: 18, kind: input, shape index: {}]   ;;  %s10204_s19 = inlined_call_operand.hbm [shape: f32[1,1152], index: 19, kind: input, shape index: {}]   ;;  %s10205_s20 = inlined_call_operand.hbm [shape: f32[8,128], index: 20, kind: output, shape index: {0}]   ;;  %s10206_s21 = inlined_call_operand.hbm [shape: f32[8,1152], index: 21, kind: output, shape index: {1}]  }
   0x1   :  { %10207 = sst [smem:[#allocation56_spill]] %s10185_s0 }
   0x2   :  { %10208 = sst [smem:[#allocation57_spill]] %s10186_s1 }
   0x3   :  { %10209 = sst [smem:[#allocation58_spill]] %s10187_s2 }
   0x4   :  { %10210 = sst [smem:[#allocation59_spill]] %s10188_s3 }
   0x5   :  { %10211 = sst [smem:[#allocation60_spill]] %s10189_s4 }
   0x6   :  { %10212 = sst [smem:[#allocation61_spill]] %s10190_s5 }
   0x7   :  { %28 = vsyncpa [#allocation7], 0 }
   0x8   :  { %29 = vsyncpa [#allocation10], 0 }
   0x9   :  { %30 = vsyncpa [#allocation13], 0 }
   0xa   :  { %31 = vsyncpa [#allocation16], 0 }
   0xb   :  { %32 = vsyncpa [#allocation19], 0 }
   0xc   :  { %33 = vsyncpa [#allocation22], 0 }
   0xd   :  { %34 = vsyncpa [#allocation25], 0 }
   0xe   :  { %35 = vsyncpa [#allocation8], 0 }
   0xf   :  { %36 = vsyncpa [#allocation29], 0  ;;  %s9519_s2 = smov [#allocation9]   ;;  %s9520_s26 = smov [#allocation12]  }
  0x10   :  { %s55_s25 = sshll.u32 %s9519_s2, 4  ;;  %s75_s27 = sshll.u32 %s9520_s26, 4  ;;  %s56_s25 = int_to_ptr.vmem [resolvable:$true] %s55_s25  ;;  %s76_s27 = int_to_ptr.vmem [resolvable:$true] %s75_s27 }
  0x11   :  { %s9077_s3 = scalar_lea.vmem %s56_s25, 64  ;;  %p9082_p1 = scmp.lt.s32.totalorder %s56_s25, %s56_s25 }
  0x12   :  { %p9078_p0 = scmp.ne.s32.totalorder %s56_s25, %s9077_s3  ;;  %p9083_p2 = scmp.lt.s32.totalorder %s9077_s3, %s9077_s3 }
  0x14   :  { %p9084_p3 = por %p9083_p2, %p9082_p1 }
  0x16   :  { %p9085_p4 = pnand %p9084_p3, %p9078_p0 }
  0x18   :  { %9088 = shalt.err (!%p9085_p4)
}
  0x19   :  { %58 = dma.hbm_to_vmem [thread:$0]  %s10193_s8, 64, %s56_s25, [#allocation10]  }
  0x1a   :  { %s9097_s0 = scalar_lea.vmem %s76_s27, 16  ;;  %s9101_s4 = scalar_lea.vmem %s76_s27, 32 }
  0x1b   :  { %p9098_p5 = scmp.ne.s32.totalorder %s76_s27, %s9097_s0  ;;  %p9102_p6 = scmp.lt.s32.totalorder %s76_s27, %s76_s27 }
  0x1c   :  { %p9103_p7 = scmp.lt.s32.totalorder %s9101_s4, %s9097_s0 }
  0x1e   :  { %p9104_p8 = por %p9103_p7, %p9102_p6 }
  0x20   :  { %p9105_p9 = pnand %p9104_p8, %p9098_p5 }
  0x22   :  { %9108 = shalt.err (!%p9105_p9)
}
  0x23   :  { %78 = dma.hbm_to_vmem [thread:$0]  %s10195_s10, 16, %s76_s27, [#allocation13]  }
  0x24   :  { %s9521_s22 = smov [#allocation15]   ;;  %s9522_s1 = smov [#allocation18]  }
  0x25   :  { %s95_s23 = sshll.u32 %s9521_s22, 4  ;;  %s115_s24 = sshll.u32 %s9522_s1, 4  ;;  %s96_s23 = int_to_ptr.vmem [resolvable:$true] %s95_s23  ;;  %s116_s24 = int_to_ptr.vmem [resolvable:$true] %s115_s24 }
  0x26   :  { %s9117_s2 = scalar_lea.vmem %s96_s23, 64  ;;  %p9122_p11 = scmp.lt.s32.totalorder %s96_s23, %s96_s23 }
  0x27   :  { %p9118_p10 = scmp.ne.s32.totalorder %s96_s23, %s9117_s2  ;;  %p9123_p12 = scmp.lt.s32.totalorder %s9117_s2, %s9117_s2 }
  0x29   :  { %p9124_p13 = por %p9123_p12, %p9122_p11 }
  0x2b   :  { %p9125_p0 = pnand %p9124_p13, %p9118_p10 }
  0x2d   :  { %9128 = shalt.err (!%p9125_p0)
}
  0x2e   :  { %98 = dma.hbm_to_vmem [thread:$0]  %s10197_s12, 64, %s96_s23, [#allocation16]  }
  0x2f   :  { %s9137_s26 = scalar_lea.vmem %s116_s24, 64  ;;  %p9142_p2 = scmp.lt.s32.totalorder %s116_s24, %s116_s24 }
  0x30   :  { %p9138_p1 = scmp.ne.s32.totalorder %s116_s24, %s9137_s26  ;;  %p9143_p3 = scmp.lt.s32.totalorder %s9137_s26, %s9137_s26 }
  0x32   :  { %p9144_p4 = por %p9143_p3, %p9142_p2 }
  0x34   :  { %p9145_p5 = pnand %p9144_p4, %p9138_p1 }
  0x36   :  { %9148 = shalt.err (!%p9145_p5)
}
  0x37   :  { %118 = dma.hbm_to_vmem [thread:$0]  %s10199_s14, 64, %s116_s24, [#allocation19]  }
  0x38   :  { %s9523_s3 = smov [#allocation21]   ;;  %s9524_s29 = smov [#allocation24]  }
  0x39   :  { %s135_s28 = sshll.u32 %s9523_s3, 4  ;;  %s155_s0 = sshll.u32 %s9524_s29, 4  ;;  %s136_s28 = int_to_ptr.vmem [resolvable:$true] %s135_s28  ;;  %s156_s0 = int_to_ptr.vmem [resolvable:$true] %s155_s0 }
  0x3a   :  { %s9157_s4 = scalar_lea.vmem %s136_s28, 16  ;;  %s9161_s12 = scalar_lea.vmem %s136_s28, 32 }
  0x3b   :  { %p9158_p6 = scmp.ne.s32.totalorder %s136_s28, %s9157_s4  ;;  %p9162_p7 = scmp.lt.s32.totalorder %s136_s28, %s136_s28 }
  0x3c   :  { %p9163_p8 = scmp.lt.s32.totalorder %s9161_s12, %s9157_s4 }
  0x3e   :  { %p9164_p9 = por %p9163_p8, %p9162_p7 }
  0x40   :  { %p9165_p10 = pnand %p9164_p9, %p9158_p6 }
  0x42   :  { %9168 = shalt.err (!%p9165_p10)
}
  0x43   :  { %138 = dma.hbm_to_vmem [thread:$0]  %s10201_s16, 16, %s136_s28, [#allocation22]  }
  0x44   :  { %s9177_s22 = scalar_lea.vmem %s156_s0, 64  ;;  %p9182_p12 = scmp.lt.s32.totalorder %s156_s0, %s156_s0 }
  0x45   :  { %p9178_p11 = scmp.ne.s32.totalorder %s156_s0, %s9177_s22  ;;  %p9183_p13 = scmp.lt.s32.totalorder %s9177_s22, %s9177_s22 }
  0x47   :  { %p9184_p0 = por %p9183_p13, %p9182_p12 }
  0x49   :  { %p9185_p1 = pnand %p9184_p0, %p9178_p11 }
  0x4b   :  { %9188 = shalt.err (!%p9185_p1)
}
  0x4c   :  { %158 = dma.hbm_to_vmem [thread:$0]  %s10203_s18, 64, %s156_s0, [#allocation25]  }
  0x4d   :  { %s9525_s1 = smov [#allocation6]   ;;  %s9526_s2 = smov [#allocation11]  }
  0x4e   :  { %s45_s24 = sshll.u32 %s9525_s1, 4  ;;  %s65_s8 = sshll.u32 %s9526_s2, 4  ;;  %s46_s24 = int_to_ptr.vmem [resolvable:$true] %s45_s24  ;;  %s66_s8 = int_to_ptr.vmem [resolvable:$true] %s65_s8 }
  0x4f   :  { %s9197_s25 = scalar_lea.vmem %s46_s24, 1152  ;;  %p9202_p3 = scmp.lt.s32.totalorder %s46_s24, %s46_s24 }
  0x50   :  { %p9198_p2 = scmp.ne.s32.totalorder %s46_s24, %s9197_s25  ;;  %p9203_p4 = scmp.lt.s32.totalorder %s9197_s25, %s9197_s25 }
  0x52   :  { %p9204_p5 = por %p9203_p4, %p9202_p3 }
  0x54   :  { %p9205_p6 = pnand %p9204_p5, %p9198_p2 }
  0x56   :  { %9208 = shalt.err (!%p9205_p6)
}
  0x57   :  { %s10213_s10 = sld [smem:[#allocation57_spill]]  ;;  %s9217_s27 = scalar_lea.vmem %s66_s8, 32 }
  0x58   :  { %p9218_p7 = scmp.ne.s32.totalorder %s66_s8, %s9217_s27  ;;  %p9222_p8 = scmp.lt.s32.totalorder %s66_s8, %s66_s8 }
  0x59   :  { %p9223_p9 = scmp.lt.s32.totalorder %s9217_s27, %s9217_s27 }
  0x5b   :  { %p9224_p10 = por %p9223_p9, %p9222_p8 }
  0x5d   :  { %48 = dma.hbm_to_vmem [thread:$0]  %s10213_s10, 1152, %s46_s24, [#allocation7]  }
  0x5e   :  { %p9225_p11 = pnand %p9224_p10, %p9218_p7 }
  0x60   :  { %9228 = shalt.err (!%p9225_p11)
}
  0x61   :  { %68 = dma.hbm_to_vmem [thread:$0]  %s10194_s9, 32, %s66_s8, [#allocation10]  }
  0x62   :  { %s9527_s28 = smov [#allocation14]   ;;  %s9528_s0 = smov [#allocation17]  }
  0x63   :  { %s85_s29 = sshll.u32 %s9527_s28, 4  ;;  %s105_s4 = sshll.u32 %s9528_s0, 4  ;;  %s86_s29 = int_to_ptr.vmem [resolvable:$true] %s85_s29  ;;  %s106_s4 = int_to_ptr.vmem [resolvable:$true] %s105_s4 }
  0x64   :  { %s9237_s12 = scalar_lea.vmem %s86_s29, 32  ;;  %p9242_p13 = scmp.lt.s32.totalorder %s86_s29, %s86_s29 }
  0x65   :  { %p9238_p12 = scmp.ne.s32.totalorder %s86_s29, %s9237_s12  ;;  %p9243_p0 = scmp.lt.s32.totalorder %s9237_s12, %s9237_s12 }
  0x67   :  { %p9244_p1 = por %p9243_p0, %p9242_p13 }
  0x69   :  { %p9245_p2 = pnand %p9244_p1, %p9238_p12 }
  0x6b   :  { %9248 = shalt.err (!%p9245_p2)
}
  0x6c   :  { %88 = dma.hbm_to_vmem [thread:$0]  %s10196_s11, 32, %s86_s29, [#allocation13]  }
  0x6d   :  { %s9257_s22 = scalar_lea.vmem %s106_s4, 144  ;;  %s9261_s9 = scalar_lea.vmem %s106_s4, 160 }
  0x6e   :  { %p9258_p3 = scmp.ne.s32.totalorder %s106_s4, %s9257_s22  ;;  %p9262_p4 = scmp.lt.s32.totalorder %s106_s4, %s106_s4 }
  0x6f   :  { %p9263_p5 = scmp.lt.s32.totalorder %s9261_s9, %s9257_s22 }
  0x71   :  { %p9264_p6 = por %p9263_p5, %p9262_p4 }
  0x73   :  { %p9265_p7 = pnand %p9264_p6, %p9258_p3 }
  0x75   :  { %9268 = shalt.err (!%p9265_p7)
}
  0x76   :  { %108 = dma.hbm_to_vmem [thread:$0]  %s10198_s13, 144, %s106_s4, [#allocation16]  }
  0x77   :  { %s9529_s1 = smov [#allocation20]   ;;  %s9530_s2 = smov [#allocation23]  }
  0x78   :  { %s125_s24 = sshll.u32 %s9529_s1, 4  ;;  %s145_s8 = sshll.u32 %s9530_s2, 4  ;;  %s126_s24 = int_to_ptr.vmem [resolvable:$true] %s125_s24  ;;  %s146_s8 = int_to_ptr.vmem [resolvable:$true] %s145_s8 }
  0x79   :  { %s9277_s25 = scalar_lea.vmem %s126_s24, 32  ;;  %p9282_p9 = scmp.lt.s32.totalorder %s126_s24, %s126_s24 }
  0x7a   :  { %p9278_p8 = scmp.ne.s32.totalorder %s126_s24, %s9277_s25  ;;  %p9283_p10 = scmp.lt.s32.totalorder %s9277_s25, %s9277_s25 }
  0x7c   :  { %p9284_p11 = por %p9283_p10, %p9282_p9 }
  0x7e   :  { %p9285_p12 = pnand %p9284_p11, %p9278_p8 }
  0x80   :  { %9288 = shalt.err (!%p9285_p12)
}
  0x81   :  { %128 = dma.hbm_to_vmem [thread:$0]  %s10200_s15, 32, %s126_s24, [#allocation19]  }
  0x82   :  { %s9297_s26 = scalar_lea.vmem %s146_s8, 32  ;;  %p9302_p0 = scmp.lt.s32.totalorder %s146_s8, %s146_s8 }
  0x83   :  { %p9298_p13 = scmp.ne.s32.totalorder %s146_s8, %s9297_s26  ;;  %p9303_p1 = scmp.lt.s32.totalorder %s9297_s26, %s9297_s26 }
  0x85   :  { %p9304_p2 = por %p9303_p1, %p9302_p0 }
  0x87   :  { %p9305_p3 = pnand %p9304_p2, %p9298_p13 }
  0x89   :  { %9308 = shalt.err (!%p9305_p3)
}
  0x8a   :  { %148 = dma.hbm_to_vmem [thread:$0]  %s10202_s17, 32, %s146_s8, [#allocation22]  }
  0x8b   :  { %s9531_s27 = smov [#allocation26]  }
  0x8c   :  { %s165_s18 = sshll.u32 %s9531_s27, 4  ;;  %s166_s18 = int_to_ptr.vmem [resolvable:$true] %s165_s18 }
  0x8d   :  { %s9317_s3 = scalar_lea.vmem %s166_s18, 144  ;;  %s9321_s28 = scalar_lea.vmem %s166_s18, 160 }
  0x8e   :  { %p9318_p4 = scmp.ne.s32.totalorder %s166_s18, %s9317_s3  ;;  %p9322_p5 = scmp.lt.s32.totalorder %s166_s18, %s166_s18 }
  0x8f   :  { %p9323_p6 = scmp.lt.s32.totalorder %s9321_s28, %s9317_s3 }
  0x91   :  { %p9324_p7 = por %p9323_p6, %p9322_p5 }
  0x93   :  { %p9325_p8 = pnand %p9324_p7, %p9318_p4 }
  0x95   :  { %9328 = shalt.err (!%p9325_p8)
}
  0x96   :  { %168 = dma.hbm_to_vmem [thread:$0]  %s10204_s19, 144, %s166_s18, [#allocation25]  }
  0x97   :  { %9489 = dma.done.wait [#allocation7], 1152  }
  0x98   :  { %9490 = vsyncadd [#allocation7], 4294966144 }
  0x99   :  { %9491 = dma.done.wait [#allocation10], 96  }
  0x9a   :  { %9492 = vsyncadd [#allocation10], 4294967200 }
  0x9b   :  { %9493 = dma.done.wait [#allocation13], 48  }
  0x9c   :  { %9494 = vsyncadd [#allocation13], 4294967248 }
  0x9d   :  { %9495 = dma.done.wait [#allocation16], 208  }
  0x9e   :  { %9496 = vsyncadd [#allocation16], 4294967088 }
  0x9f   :  { %9497 = dma.done.wait [#allocation19], 96  }
  0xa0   :  { %9498 = vsyncadd [#allocation19], 4294967200 }
  0xa1   :  { %9499 = dma.done.wait [#allocation22], 48  }
  0xa2   :  { %9500 = vsyncadd [#allocation22], 4294967248 }
  0xa3   :  { %9501 = dma.done.wait [#allocation25], 208  }
  0xa4   :  { %9502 = vsyncadd [#allocation25], 4294967088  ;;  %s9532_s17 = smov [#allocation2]   ;;  %s9533_s4 = smov [#allocation3]  }
  0xa5   :  { %s217_s0 = sshll.u32 %s9532_s17, 4  ;;  %s241_s12 = sshll.u32 %s9533_s4, 4  ;;  %s9693_s0 = int_to_ptr.vmem [resolvable:$true] %s217_s0  ;;  %s9695_s12 = int_to_ptr.vmem [resolvable:$true] %s241_s12 }
  0xa6   :  { %s9698_s19 = scalar_lea.vmem %s9693_s0, 36864  ;;  %p9342_p10 = scmp.lt.s32.totalorder %s9693_s0, %s9693_s0 }
  0xa7   :  { %p9338_p9 = scmp.ne.s32.totalorder %s9693_s0, %s9698_s19  ;;  %p9343_p11 = scmp.lt.s32.totalorder %s9698_s19, %s9698_s19 }
  0xa9   :  { %p9344_p12 = por %p9343_p11, %p9342_p10 }
  0xab   :  { %p9345_p13 = pnand %p9344_p12, %p9338_p9 }
  0xad   :  { %9348 = shalt.err (!%p9345_p13)  }
  0xae   :  { %s10214_s22 = sld [smem:[#allocation58_spill]]  ;;  %s9357_s9 = scalar_lea.vmem %s9695_s12, 8192 }
  0xaf   :  { %p9358_p0 = scmp.ne.s32.totalorder %s9695_s12, %s9357_s9  ;;  %s9716_s14 = scalar_lea.vmem %s9695_s12, 36864 }
  0xb0   :  { %p9362_p1 = scmp.lt.s32.totalorder %s9695_s12, %s9695_s12  ;;  %p9363_p2 = scmp.lt.s32.totalorder %s9716_s14, %s9357_s9 }
  0xb2   :  { %p9364_p3 = por %p9363_p2, %p9362_p1 }
  0xb4   :  { %220 = dma.hbm_to_vmem [thread:$0]  %s10214_s22, 36864, %s9693_s0, [#allocation4] }
  0xb5   :  { %p9365_p4 = pnand %p9364_p3, %p9358_p0 }
  0xb7   :  { %9368 = shalt.err (!%p9365_p4)  }
  0xb8   :  { %s9534_s23 = smov 128   ;;  %s9535_s1 = smov 576   ;;  %v221_v0 = vld [vmem:[#allocation6] sm:$0xff]  ;;  %v222_v1 = vld [vmem:[#allocation6 + $0x8] sm:$0xff]  ;;  %v223_v2 = vld [vmem:[#allocation6 + $0x10] sm:$0xff] }
  0xb9   :  { %s9536_s24 = smov 8   ;;  %s10215_s25 = sld [smem:[#allocation59_spill]]  ;;  %v224_v3 = vld [vmem:[#allocation6 + $0x18] sm:$0xff]  ;;  %v225_v4 = vld [vmem:[#allocation6 + $0x20] sm:$0xff]  ;;  %v226_v5 = vld [vmem:[#allocation6 + $0x28] sm:$0xff]  ;;  %v9731_v6 = vpack.c.bf16 %v221_v0, %v221_v0  ;;  %v9733_v7 = vpack.c.bf16 %v222_v1, %v222_v1  ;;  %v9735_v8 = vpack.c.bf16 %v223_v2, %v223_v2 }
  0xba   :  { %v227_v9 = vld [vmem:[#allocation6 + $0x30] sm:$0xff]  ;;  %v228_v10 = vld [vmem:[#allocation6 + $0x38] sm:$0xff]  ;;  %v229_v11 = vld [vmem:[#allocation6 + $0x40] sm:$0xff]  ;;  %v9737_v12 = vpack.c.bf16 %v224_v3, %v224_v3  ;;  %v9739_v13 = vpack.c.bf16 %v225_v4, %v225_v4  ;;  %v9741_v14 = vpack.c.bf16 %v226_v5, %v226_v5 }
  0xbb   :  { %v9743_v15 = vpack.c.bf16 %v227_v9, %v227_v9  ;;  %v9745_v16 = vpack.c.bf16 %v228_v10, %v228_v10  ;;  %v9747_v17 = vpack.c.bf16 %v229_v11, %v229_v11 }
  0xbf   :  { %244 = dma.hbm_to_vmem [thread:$0]  %s10215_s25, 8192, %s9695_s12, [#allocation4 + $0x1], %s9534_s23, %s9535_s1, %s9536_s24 }
  0xc0   :  { %9503 = dma.done.wait [#allocation4], 36864 }
  0xc1   :  { %9504 = vsyncadd [#allocation4], 4294930432  ;;  %2009 = vmatprep.mubr.bf16.mxu0 %v9733_v7  ;;  %2050 = vmatprep.mubr.bf16.mxu1 %v9737_v12  ;;  %v7931_v18 = vld [vmem:[#allocation2 + $0xe4] ss:$16 sps:$4 sm:$0xff]   ;;  %v7935_v20 = vld [vmem:[#allocation2 + $0xe0] ss:$16 sps:$4 sm:$0xff]  }
  0xc2   :  { %v7933_v19 = vld [vmem:[#allocation2 + $0x2e4] ss:$16 sps:$4 sm:$0xff]   ;;  %1977 = vmatprep.subr.bf16.mxu0 %v7931_v18  ;;  %v7936_v21 = vld [vmem:[#allocation2 + $0x2e0] ss:$16 sps:$4 sm:$0xff]   ;;  %s9377_s11 = scalar_lea.vmem %s9693_s0, 2048 }
  0xc3   :  { %2018 = vmatprep.subr.bf16.mxu1 %v7933_v19  ;;  %v7937_v22 = vld [vmem:[#allocation2 + $0xc4] ss:$16 sps:$4 sm:$0xff]   ;;  %1978 = vmatpush1.bf16.msra.mxu0 %v7935_v20  ;;  %v7941_v24 = vld [vmem:[#allocation2 + $0xc0] ss:$16 sps:$4 sm:$0xff]   ;;  %p9378_p5 = scmp.ne.s32.totalorder %s9693_s0, %s9377_s11  ;;  %p9383_p6 = scmp.lt.s32.totalorder %s9698_s19, %s9377_s11 }
  0xc4   :  { %2019 = vmatpush1.bf16.msra.mxu1 %v7936_v21  ;;  %v7939_v23 = vld [vmem:[#allocation2 + $0x2c4] ss:$16 sps:$4 sm:$0xff]   ;;  %1979 = vmatprep.subr.bf16.mxu0 %v7937_v22  ;;  %v7942_v25 = vld [vmem:[#allocation2 + $0x2c0] ss:$16 sps:$4 sm:$0xff]  }
  0xc5   :  { %2020 = vmatprep.subr.bf16.mxu1 %v7939_v23  ;;  %v7943_v26 = vld [vmem:[#allocation2 + $0xa4] ss:$16 sps:$4 sm:$0xff]   ;;  %v7947_v28 = vld [vmem:[#allocation2 + $0xa0] ss:$16 sps:$4 sm:$0xff]   ;;  %p9384_p7 = por %p9383_p6, %p9342_p10 }
  0xc6   :  { %v7945_v27 = vld [vmem:[#allocation2 + $0x2a4] ss:$16 sps:$4 sm:$0xff]   ;;  %v7948_v29 = vld [vmem:[#allocation2 + $0x2a0] ss:$16 sps:$4 sm:$0xff]  }
  0xc7   :  { %1980 = vmatpush1.bf16.msra.mxu0 %v7941_v24  ;;  %v7949_v30 = vld [vmem:[#allocation2 + $0x84] ss:$16 sps:$4 sm:$0xff]   ;;  %v7953_v32 = vld [vmem:[#allocation2 + $0x80] ss:$16 sps:$4 sm:$0xff]   ;;  %p9385_p8 = pnand %p9384_p7, %p9378_p5 }
  0xc8   :  { %2021 = vmatpush1.bf16.msra.mxu1 %v7942_v25  ;;  %1981 = vmatprep.subr.bf16.mxu0 %v7943_v26  ;;  %v7951_v31 = vld [vmem:[#allocation2 + $0x284] ss:$16 sps:$4 sm:$0xff]   ;;  %v7954_v33 = vld [vmem:[#allocation2 + $0x280] ss:$16 sps:$4 sm:$0xff]  }
  0xc9   :  { %2022 = vmatprep.subr.bf16.mxu1 %v7945_v27  ;;  %v7955_v34 = vld [vmem:[#allocation2 + $0x64] ss:$16 sps:$4 sm:$0xff]   ;;  %v7959_v36 = vld [vmem:[#allocation2 + $0x60] ss:$16 sps:$4 sm:$0xff]  }
  0xca   :  { %v7957_v35 = vld [vmem:[#allocation2 + $0x264] ss:$16 sps:$4 sm:$0xff]   ;;  %v7960_v37 = vld [vmem:[#allocation2 + $0x260] ss:$16 sps:$4 sm:$0xff]  }
  0xcb   :  { %1982 = vmatpush1.bf16.msra.mxu0 %v7947_v28  ;;  %v7961_v38 = vld [vmem:[#allocation2 + $0x44] ss:$16 sps:$4 sm:$0xff]   ;;  %v7965_v40 = vld [vmem:[#allocation2 + $0x40] ss:$16 sps:$4 sm:$0xff]  }
  0xcc   :  { %2023 = vmatpush1.bf16.msra.mxu1 %v7948_v29  ;;  %1983 = vmatprep.subr.bf16.mxu0 %v7949_v30  ;;  %v7963_v39 = vld [vmem:[#allocation2 + $0x244] ss:$16 sps:$4 sm:$0xff]   ;;  %v7966_v41 = vld [vmem:[#allocation2 + $0x240] ss:$16 sps:$4 sm:$0xff]  }
  0xcd   :  { %2024 = vmatprep.subr.bf16.mxu1 %v7951_v31  ;;  %v7967_v42 = vld [vmem:[#allocation2 + $0x24] ss:$16 sps:$4 sm:$0xff]   ;;  %v7971_v44 = vld [vmem:[#allocation2 + $0x20] ss:$16 sps:$4 sm:$0xff]  }
  0xce   :  { %v7969_v43 = vld [vmem:[#allocation2 + $0x224] ss:$16 sps:$4 sm:$0xff]   ;;  %v7972_v45 = vld [vmem:[#allocation2 + $0x220] ss:$16 sps:$4 sm:$0xff]  }
  0xcf   :  { %1984 = vmatpush1.bf16.msra.mxu0 %v7953_v32  ;;  %v7973_v46 = vld [vmem:[#allocation2 + $0x4] ss:$16 sps:$4 sm:$0xff]   ;;  %v7977_v48 = vld [vmem:[#allocation2] ss:$16 sps:$4 sm:$0xff]  }
  0xd0   :  { %2025 = vmatpush1.bf16.msra.mxu1 %v7954_v33  ;;  %1985 = vmatprep.subr.bf16.mxu0 %v7955_v34  ;;  %v7975_v47 = vld [vmem:[#allocation2 + $0x204] ss:$16 sps:$4 sm:$0xff]   ;;  %v7978_v49 = vld [vmem:[#allocation2 + $0x200] ss:$16 sps:$4 sm:$0xff]  }
  0xd1   :  { %2026 = vmatprep.subr.bf16.mxu1 %v7957_v35  ;;  %v7979_v50 = vld [vmem:[#allocation2 + $0x1e4] ss:$16 sps:$4 sm:$0xff]   ;;  %v7983_v52 = vld [vmem:[#allocation2 + $0x1e0] ss:$16 sps:$4 sm:$0xff]  }
  0xd2   :  { %v7981_v51 = vld [vmem:[#allocation2 + $0x3e4] ss:$16 sps:$4 sm:$0xff]   ;;  %v7984_v53 = vld [vmem:[#allocation2 + $0x3e0] ss:$16 sps:$4 sm:$0xff]  }
  0xd3   :  { %1986 = vmatpush1.bf16.msra.mxu0 %v7959_v36  ;;  %v7985_v54 = vld [vmem:[#allocation2 + $0x1c4] ss:$16 sps:$4 sm:$0xff]   ;;  %v7989_v56 = vld [vmem:[#allocation2 + $0x1c0] ss:$16 sps:$4 sm:$0xff]  }
  0xd4   :  { %2027 = vmatpush1.bf16.msra.mxu1 %v7960_v37  ;;  %1987 = vmatprep.subr.bf16.mxu0 %v7961_v38  ;;  %v7987_v55 = vld [vmem:[#allocation2 + $0x3c4] ss:$16 sps:$4 sm:$0xff]   ;;  %v7990_v57 = vld [vmem:[#allocation2 + $0x3c0] ss:$16 sps:$4 sm:$0xff]  }
  0xd5   :  { %2028 = vmatprep.subr.bf16.mxu1 %v7963_v39  ;;  %v7991_v58 = vld [vmem:[#allocation2 + $0x1a4] ss:$16 sps:$4 sm:$0xff]   ;;  %v7995_v60 = vld [vmem:[#allocation2 + $0x1a0] ss:$16 sps:$4 sm:$0xff]  }
  0xd6   :  { %v7993_v59 = vld [vmem:[#allocation2 + $0x3a4] ss:$16 sps:$4 sm:$0xff]   ;;  %v7996_v61 = vld [vmem:[#allocation2 + $0x3a0] ss:$16 sps:$4 sm:$0xff]  }
  0xd7   :  { %1988 = vmatpush1.bf16.msra.mxu0 %v7965_v40  ;;  %v7997_v62 = vld [vmem:[#allocation2 + $0x184] ss:$16 sps:$4 sm:$0xff]   ;;  %v8001_v0 = vld [vmem:[#allocation2 + $0x180] ss:$16 sps:$4 sm:$0xff]  }
  0xd8   :  { %2029 = vmatpush1.bf16.msra.mxu1 %v7966_v41  ;;  %1989 = vmatprep.subr.bf16.mxu0 %v7967_v42  ;;  %v7999_v63 = vld [vmem:[#allocation2 + $0x384] ss:$16 sps:$4 sm:$0xff]   ;;  %v8002_v1 = vld [vmem:[#allocation2 + $0x380] ss:$16 sps:$4 sm:$0xff]  }
  0xd9   :  { %2030 = vmatprep.subr.bf16.mxu1 %v7969_v43  ;;  %v8003_v2 = vld [vmem:[#allocation2 + $0x164] ss:$16 sps:$4 sm:$0xff]   ;;  %v8007_v4 = vld [vmem:[#allocation2 + $0x160] ss:$16 sps:$4 sm:$0xff]  }
  0xda   :  { %v8005_v3 = vld [vmem:[#allocation2 + $0x364] ss:$16 sps:$4 sm:$0xff]   ;;  %v8008_v5 = vld [vmem:[#allocation2 + $0x360] ss:$16 sps:$4 sm:$0xff]  }
  0xdb   :  { %1990 = vmatpush1.bf16.msra.mxu0 %v7971_v44  ;;  %v8009_v9 = vld [vmem:[#allocation2 + $0x144] ss:$16 sps:$4 sm:$0xff]   ;;  %v8013_v11 = vld [vmem:[#allocation2 + $0x140] ss:$16 sps:$4 sm:$0xff]  }
  0xdc   :  { %2031 = vmatpush1.bf16.msra.mxu1 %v7972_v45  ;;  %1991 = vmatprep.subr.bf16.mxu0 %v7973_v46  ;;  %v8011_v10 = vld [vmem:[#allocation2 + $0x344] ss:$16 sps:$4 sm:$0xff]   ;;  %v8014_v18 = vld [vmem:[#allocation2 + $0x340] ss:$16 sps:$4 sm:$0xff]  }
  0xdd   :  { %2032 = vmatprep.subr.bf16.mxu1 %v7975_v47  ;;  %v8015_v19 = vld [vmem:[#allocation2 + $0x124] ss:$16 sps:$4 sm:$0xff]   ;;  %v8019_v21 = vld [vmem:[#allocation2 + $0x120] ss:$16 sps:$4 sm:$0xff]  }
  0xde   :  { %v8017_v20 = vld [vmem:[#allocation2 + $0x324] ss:$16 sps:$4 sm:$0xff]   ;;  %v8020_v22 = vld [vmem:[#allocation2 + $0x320] ss:$16 sps:$4 sm:$0xff]  }
  0xdf   :  { %1992 = vmatpush1.bf16.msra.mxu0 %v7977_v48  ;;  %v8021_v23 = vld [vmem:[#allocation2 + $0x104] ss:$16 sps:$4 sm:$0xff]   ;;  %v8025_v25 = vld [vmem:[#allocation2 + $0x100] ss:$16 sps:$4 sm:$0xff]  }
  0xe0   :  { %2033 = vmatpush1.bf16.msra.mxu1 %v7978_v49  ;;  %1993 = vmatprep.subr.bf16.mxu0 %v7979_v50  ;;  %v8023_v24 = vld [vmem:[#allocation2 + $0x304] ss:$16 sps:$4 sm:$0xff]   ;;  %v8026_v26 = vld [vmem:[#allocation2 + $0x300] ss:$16 sps:$4 sm:$0xff]  }
  0xe1   :  { %2034 = vmatprep.subr.bf16.mxu1 %v7981_v51  ;;  %v8027_v27 = vld [vmem:[#allocation2 + $0x4e4] ss:$16 sps:$4 sm:$0xff]   ;;  %v8031_v29 = vld [vmem:[#allocation2 + $0x4e0] ss:$16 sps:$4 sm:$0xff]  }
  0xe2   :  { %v8029_v28 = vld [vmem:[#allocation2 + $0x6e4] ss:$16 sps:$4 sm:$0xff]   ;;  %v8032_v30 = vld [vmem:[#allocation2 + $0x6e0] ss:$16 sps:$4 sm:$0xff]  }
  0xe3   :  { %1994 = vmatpush2.bf16.msra.mxu0 %v7983_v52  ;;  %v8033_v31 = vld [vmem:[#allocation2 + $0x4c4] ss:$16 sps:$4 sm:$0xff]   ;;  %v8037_v33 = vld [vmem:[#allocation2 + $0x4c0] ss:$16 sps:$4 sm:$0xff]  }
  0xe4   :  { %2035 = vmatpush2.bf16.msra.mxu1 %v7984_v53  ;;  %1995 = vmatprep.subr.bf16.mxu0 %v7985_v54  ;;  %v8035_v32 = vld [vmem:[#allocation2 + $0x6c4] ss:$16 sps:$4 sm:$0xff]   ;;  %v8038_v34 = vld [vmem:[#allocation2 + $0x6c0] ss:$16 sps:$4 sm:$0xff]  }
  0xe5   :  { %2036 = vmatprep.subr.bf16.mxu1 %v7987_v55  ;;  %v8039_v35 = vld [vmem:[#allocation2 + $0x4a4] ss:$16 sps:$4 sm:$0xff]   ;;  %v8043_v37 = vld [vmem:[#allocation2 + $0x4a0] ss:$16 sps:$4 sm:$0xff]  }
  0xe6   :  { %v8041_v36 = vld [vmem:[#allocation2 + $0x6a4] ss:$16 sps:$4 sm:$0xff]   ;;  %v8044_v38 = vld [vmem:[#allocation2 + $0x6a0] ss:$16 sps:$4 sm:$0xff]  }
  0xe7   :  { %1996 = vmatpush2.bf16.msra.mxu0 %v7989_v56  ;;  %v8045_v39 = vld [vmem:[#allocation2 + $0x484] ss:$16 sps:$4 sm:$0xff]   ;;  %v8049_v41 = vld [vmem:[#allocation2 + $0x480] ss:$16 sps:$4 sm:$0xff]  }
  0xe8   :  { %2037 = vmatpush2.bf16.msra.mxu1 %v7990_v57  ;;  %1997 = vmatprep.subr.bf16.mxu0 %v7991_v58  ;;  %v8047_v40 = vld [vmem:[#allocation2 + $0x684] ss:$16 sps:$4 sm:$0xff]   ;;  %v8050_v42 = vld [vmem:[#allocation2 + $0x680] ss:$16 sps:$4 sm:$0xff]  }
  0xe9   :  { %2038 = vmatprep.subr.bf16.mxu1 %v7993_v59  ;;  %v8051_v43 = vld [vmem:[#allocation2 + $0x464] ss:$16 sps:$4 sm:$0xff]   ;;  %v8055_v45 = vld [vmem:[#allocation2 + $0x460] ss:$16 sps:$4 sm:$0xff]  }
  0xea   :  { %v8053_v44 = vld [vmem:[#allocation2 + $0x664] ss:$16 sps:$4 sm:$0xff]   ;;  %v8056_v46 = vld [vmem:[#allocation2 + $0x660] ss:$16 sps:$4 sm:$0xff]  }
  0xeb   :  { %1998 = vmatpush2.bf16.msra.mxu0 %v7995_v60  ;;  %v8057_v47 = vld [vmem:[#allocation2 + $0x444] ss:$16 sps:$4 sm:$0xff]   ;;  %v8061_v49 = vld [vmem:[#allocation2 + $0x440] ss:$16 sps:$4 sm:$0xff]  }
  0xec   :  { %2039 = vmatpush2.bf16.msra.mxu1 %v7996_v61  ;;  %1999 = vmatprep.subr.bf16.mxu0 %v7997_v62  ;;  %v8059_v48 = vld [vmem:[#allocation2 + $0x644] ss:$16 sps:$4 sm:$0xff]   ;;  %v8062_v50 = vld [vmem:[#allocation2 + $0x640] ss:$16 sps:$4 sm:$0xff]  }
  0xed   :  { %2040 = vmatprep.subr.bf16.mxu1 %v7999_v63  ;;  %v8063_v51 = vld [vmem:[#allocation2 + $0x424] ss:$16 sps:$4 sm:$0xff]   ;;  %v8067_v53 = vld [vmem:[#allocation2 + $0x420] ss:$16 sps:$4 sm:$0xff]  }
  0xee   :  { %v8065_v52 = vld [vmem:[#allocation2 + $0x624] ss:$16 sps:$4 sm:$0xff]   ;;  %v8068_v54 = vld [vmem:[#allocation2 + $0x620] ss:$16 sps:$4 sm:$0xff]  }
  0xef   :  { %2000 = vmatpush2.bf16.msra.mxu0 %v8001_v0  ;;  %v8069_v55 = vld [vmem:[#allocation2 + $0x404] ss:$16 sps:$4 sm:$0xff]   ;;  %v8073_v57 = vld [vmem:[#allocation2 + $0x400] ss:$16 sps:$4 sm:$0xff]  }
  0xf0   :  { %2041 = vmatpush2.bf16.msra.mxu1 %v8002_v1  ;;  %2001 = vmatprep.subr.bf16.mxu0 %v8003_v2  ;;  %v8071_v56 = vld [vmem:[#allocation2 + $0x604] ss:$16 sps:$4 sm:$0xff]   ;;  %v8074_v58 = vld [vmem:[#allocation2 + $0x600] ss:$16 sps:$4 sm:$0xff]  }
  0xf1   :  { %2042 = vmatprep.subr.bf16.mxu1 %v8005_v3  ;;  %v8075_v59 = vld [vmem:[#allocation2 + $0x5e4] ss:$16 sps:$4 sm:$0xff]   ;;  %v8079_v61 = vld [vmem:[#allocation2 + $0x5e0] ss:$16 sps:$4 sm:$0xff]  }
  0xf2   :  { %v8077_v60 = vld [vmem:[#allocation2 + $0x7e4] ss:$16 sps:$4 sm:$0xff]   ;;  %v8080_v62 = vld [vmem:[#allocation2 + $0x7e0] ss:$16 sps:$4 sm:$0xff]  }
  0xf3   :  { %2002 = vmatpush2.bf16.msra.mxu0 %v8007_v4  ;;  %v8081_v63 = vld [vmem:[#allocation2 + $0x5c4] ss:$16 sps:$4 sm:$0xff]   ;;  %v8085_v1 = vld [vmem:[#allocation2 + $0x5c0] ss:$16 sps:$4 sm:$0xff]  }
  0xf4   :  { %2043 = vmatpush2.bf16.msra.mxu1 %v8008_v5  ;;  %2003 = vmatprep.subr.bf16.mxu0 %v8009_v9  ;;  %v8083_v0 = vld [vmem:[#allocation2 + $0x7c4] ss:$16 sps:$4 sm:$0xff]   ;;  %v8086_v2 = vld [vmem:[#allocation2 + $0x7c0] ss:$16 sps:$4 sm:$0xff]  }
  0xf5   :  { %2044 = vmatprep.subr.bf16.mxu1 %v8011_v10  ;;  %v8087_v3 = vld [vmem:[#allocation2 + $0x5a4] ss:$16 sps:$4 sm:$0xff]   ;;  %v8091_v5 = vld [vmem:[#allocation2 + $0x5a0] ss:$16 sps:$4 sm:$0xff]  }
  0xf6   :  { %v8089_v4 = vld [vmem:[#allocation2 + $0x7a4] ss:$16 sps:$4 sm:$0xff]   ;;  %v8092_v9 = vld [vmem:[#allocation2 + $0x7a0] ss:$16 sps:$4 sm:$0xff]  }
  0xf7   :  { %2004 = vmatpush2.bf16.msra.mxu0 %v8013_v11  ;;  %v8093_v10 = vld [vmem:[#allocation2 + $0x584] ss:$16 sps:$4 sm:$0xff]  }
  0xf8   :  { %2045 = vmatpush2.bf16.msra.mxu1 %v8014_v18  ;;  %2005 = vmatprep.subr.bf16.mxu0 %v8015_v19  ;;  %v8095_v11 = vld [vmem:[#allocation2 + $0x784] ss:$16 sps:$4 sm:$0xff]   ;;  %v8097_v18 = vld [vmem:[#allocation2 + $0x580] ss:$16 sps:$4 sm:$0xff]  }
  0xf9   :  { %2046 = vmatprep.subr.bf16.mxu1 %v8017_v20  ;;  %v8098_v19 = vld [vmem:[#allocation2 + $0x780] ss:$16 sps:$4 sm:$0xff]   ;;  %v8099_v20 = vld [vmem:[#allocation2 + $0x564] ss:$16 sps:$4 sm:$0xff]  }
  0xfb   :  { %2006 = vmatpush2.bf16.msra.mxu0 %v8019_v21  ;;  %v8101_v21 = vld [vmem:[#allocation2 + $0x764] ss:$16 sps:$4 sm:$0xff]  }
  0xfc   :  { %2047 = vmatpush2.bf16.msra.mxu1 %v8020_v22  ;;  %2007 = vmatprep.subr.bf16.mxu0 %v8021_v23  ;;  %v8103_v22 = vld [vmem:[#allocation2 + $0x560] ss:$16 sps:$4 sm:$0xff]  }
  0xfd   :  { %2048 = vmatprep.subr.bf16.mxu1 %v8023_v24  ;;  %v8104_v23 = vld [vmem:[#allocation2 + $0x760] ss:$16 sps:$4 sm:$0xff]   ;;  %v8105_v24 = vld [vmem:[#allocation2 + $0x544] ss:$16 sps:$4 sm:$0xff]  }
  0xff   :  { %2008 = vmatpush2.bf16.msra.mxu0 %v8025_v25  ;;  %v8107_v25 = vld [vmem:[#allocation2 + $0x744] ss:$16 sps:$4 sm:$0xff]  }
 0x100   :  { %2049 = vmatpush2.bf16.msra.mxu1 %v8026_v26  ;;  %2059 = vmatprep.subr.bf16.mxu0 %v8027_v27  ;;  %v8109_v26 = vld [vmem:[#allocation2 + $0x540] ss:$16 sps:$4 sm:$0xff]  }
 0x101   :  { %2100 = vmatprep.subr.bf16.mxu1 %v8029_v28  ;;  %v8110_v27 = vld [vmem:[#allocation2 + $0x740] ss:$16 sps:$4 sm:$0xff]   ;;  %v8111_v28 = vld [vmem:[#allocation2 + $0x524] ss:$16 sps:$4 sm:$0xff]  }
 0x102   :  { %2010 = vmatmul.mubr.bf16.vlgmr.msra.gmra.mxu0 %v9731_v6 }
 0x103   :  { %2051 = vmatmul.mubr.bf16.vlgmr.msra.gmra.mxu1 %v9735_v8  ;;  %2060 = vmatpush1.bf16.msra.mxu0 %v8031_v29  ;;  %v8113_v29 = vld [vmem:[#allocation2 + $0x724] ss:$16 sps:$4 sm:$0xff]  }
 0x104   :  { %2101 = vmatpush1.bf16.msra.mxu1 %v8032_v30  ;;  %2061 = vmatprep.subr.bf16.mxu0 %v8033_v31  ;;  %v8115_v30 = vld [vmem:[#allocation2 + $0x520] ss:$16 sps:$4 sm:$0xff]  }
 0x105   :  { %2102 = vmatprep.subr.bf16.mxu1 %v8035_v32  ;;  %2091 = vmatprep.mubr.bf16.mxu0 %v9741_v14  ;;  %v8116_v31 = vld [vmem:[#allocation2 + $0x720] ss:$16 sps:$4 sm:$0xff]   ;;  %v8117_v32 = vld [vmem:[#allocation2 + $0x504] ss:$16 sps:$4 sm:$0xff]  }
 0x106   :  { %2132 = vmatprep.mubr.bf16.mxu1 %v9745_v16 }
 0x107   :  { %2062 = vmatpush1.bf16.msra.mxu0 %v8037_v33  ;;  %v8119_v33 = vld [vmem:[#allocation2 + $0x704] ss:$16 sps:$4 sm:$0xff]  }
 0x108   :  { %2103 = vmatpush1.bf16.msra.mxu1 %v8038_v34  ;;  %2063 = vmatprep.subr.bf16.mxu0 %v8039_v35  ;;  %v8121_v34 = vld [vmem:[#allocation2 + $0x500] ss:$16 sps:$4 sm:$0xff]  }
 0x109   :  { %2104 = vmatprep.subr.bf16.mxu1 %v8041_v36  ;;  %v8122_v35 = vld [vmem:[#allocation2 + $0x700] ss:$16 sps:$4 sm:$0xff]   ;;  %v8123_v36 = vld [vmem:[#allocation2 + $0x8e4] ss:$16 sps:$4 sm:$0xff]  }
 0x10b   :  { %2064 = vmatpush1.bf16.msra.mxu0 %v8043_v37  ;;  %v8125_v37 = vld [vmem:[#allocation2 + $0xec] ss:$16 sps:$4 sm:$0xff]  }
 0x10c   :  { %2105 = vmatpush1.bf16.msra.mxu1 %v8044_v38  ;;  %2065 = vmatprep.subr.bf16.mxu0 %v8045_v39  ;;  %v8127_v38 = vld [vmem:[#allocation2 + $0x8e0] ss:$16 sps:$4 sm:$0xff]   ;;  %v8128_v39 = vld [vmem:[#allocation2 + $0xe8] ss:$16 sps:$4 sm:$0xff]  }
 0x10d   :  { %2106 = vmatprep.subr.bf16.mxu1 %v8047_v40  ;;  %v8129_v40 = vld [vmem:[#allocation2 + $0x8c4] ss:$16 sps:$4 sm:$0xff]  }
 0x10f   :  { %2066 = vmatpush1.bf16.msra.mxu0 %v8049_v41  ;;  %v8131_v41 = vld [vmem:[#allocation2 + $0xcc] ss:$16 sps:$4 sm:$0xff]  }
 0x110   :  { %2107 = vmatpush1.bf16.msra.mxu1 %v8050_v42  ;;  %2067 = vmatprep.subr.bf16.mxu0 %v8051_v43  ;;  %v8133_v42 = vld [vmem:[#allocation2 + $0x8c0] ss:$16 sps:$4 sm:$0xff]   ;;  %v8134_v43 = vld [vmem:[#allocation2 + $0xc8] ss:$16 sps:$4 sm:$0xff]  }
 0x111   :  { %2108 = vmatprep.subr.bf16.mxu1 %v8053_v44  ;;  %v8135_v44 = vld [vmem:[#allocation2 + $0x8a4] ss:$16 sps:$4 sm:$0xff]  }
 0x113   :  { %2068 = vmatpush1.bf16.msra.mxu0 %v8055_v45  ;;  %v8137_v45 = vld [vmem:[#allocation2 + $0xac] ss:$16 sps:$4 sm:$0xff]  }
 0x114   :  { %2109 = vmatpush1.bf16.msra.mxu1 %v8056_v46  ;;  %2069 = vmatprep.subr.bf16.mxu0 %v8057_v47  ;;  %v9537_v46 = vmov 0   ;;  %v8139_v47 = vld [vmem:[#allocation2 + $0x8a0] ss:$16 sps:$4 sm:$0xff]  }
 0x115   :  { %2110 = vmatprep.subr.bf16.mxu1 %v8059_v48  ;;  %v8140_v48 = vld [vmem:[#allocation2 + $0xa8] ss:$16 sps:$4 sm:$0xff]  }
 0x117   :  { %2070 = vmatpush1.bf16.msra.mxu0 %v8061_v49  ;;  %v8141_v49 = vld [vmem:[#allocation2 + $0x884] ss:$16 sps:$4 sm:$0xff]  }
 0x118   :  { %2111 = vmatpush1.bf16.msra.mxu1 %v8062_v50  ;;  %2071 = vmatprep.subr.bf16.mxu0 %v8063_v51  ;;  %v8143_v50 = vld [vmem:[#allocation2 + $0x8c] ss:$16 sps:$4 sm:$0xff]   ;;  %v8145_v51 = vld [vmem:[#allocation2 + $0x880] ss:$16 sps:$4 sm:$0xff]  }
 0x119   :  { %2112 = vmatprep.subr.bf16.mxu1 %v8065_v52  ;;  %v8146_v52 = vld [vmem:[#allocation2 + $0x88] ss:$16 sps:$4 sm:$0xff]  }
 0x11b   :  { %2072 = vmatpush1.bf16.msra.mxu0 %v8067_v53  ;;  %v8147_v53 = vld [vmem:[#allocation2 + $0x864] ss:$16 sps:$4 sm:$0xff]  }
 0x11c   :  { %2113 = vmatpush1.bf16.msra.mxu1 %v8068_v54  ;;  %2073 = vmatprep.subr.bf16.mxu0 %v8069_v55  ;;  %v8149_v54 = vld [vmem:[#allocation2 + $0x6c] ss:$16 sps:$4 sm:$0xff]   ;;  %v8151_v55 = vld [vmem:[#allocation2 + $0x860] ss:$16 sps:$4 sm:$0xff]  }
 0x11d   :  { %2114 = vmatprep.subr.bf16.mxu1 %v8071_v56  ;;  %v8152_v56 = vld [vmem:[#allocation2 + $0x68] ss:$16 sps:$4 sm:$0xff]  }
 0x11f   :  { %2074 = vmatpush1.bf16.msra.mxu0 %v8073_v57  ;;  %v8155_v57 = vld [vmem:[#allocation2 + $0x4c] ss:$16 sps:$4 sm:$0xff]  }
 0x120   :  { %2115 = vmatpush1.bf16.msra.mxu1 %v8074_v58  ;;  %2075 = vmatprep.subr.bf16.mxu0 %v8075_v59  ;;  %v8157_v58 = vld [vmem:[#allocation2 + $0x840] ss:$16 sps:$4 sm:$0xff]   ;;  %v8158_v59 = vld [vmem:[#allocation2 + $0x48] ss:$16 sps:$4 sm:$0xff]  }
 0x121   :  { %2116 = vmatprep.subr.bf16.mxu1 %v8077_v60  ;;  %v8159_v60 = vld [vmem:[#allocation2 + $0x824] ss:$16 sps:$4 sm:$0xff]  }
 0x123   :  { %2076 = vmatpush2.bf16.msra.mxu0 %v8079_v61  ;;  %v8161_v61 = vld [vmem:[#allocation2 + $0x2c] ss:$16 sps:$4 sm:$0xff]  }
 0x124   :  { %2117 = vmatpush2.bf16.msra.mxu1 %v8080_v62  ;;  %2077 = vmatprep.subr.bf16.mxu0 %v8081_v63  ;;  %v8163_v62 = vld [vmem:[#allocation2 + $0x820] ss:$16 sps:$4 sm:$0xff]   ;;  %v8164_v63 = vld [vmem:[#allocation2 + $0x28] ss:$16 sps:$4 sm:$0xff]  }
 0x125   :  { %2118 = vmatprep.subr.bf16.mxu1 %v8083_v0  ;;  %v8165_v0 = vld [vmem:[#allocation2 + $0x804] ss:$16 sps:$4 sm:$0xff]  }
 0x127   :  { %2078 = vmatpush2.bf16.msra.mxu0 %v8085_v1  ;;  %v8167_v1 = vld [vmem:[#allocation2 + $0xc] ss:$16 sps:$4 sm:$0xff]  }
 0x128   :  { %2119 = vmatpush2.bf16.msra.mxu1 %v8086_v2  ;;  %2079 = vmatprep.subr.bf16.mxu0 %v8087_v3  ;;  %v8169_v2 = vld [vmem:[#allocation2 + $0x800] ss:$16 sps:$4 sm:$0xff]   ;;  %v8170_v3 = vld [vmem:[#allocation2 + $0x8] ss:$16 sps:$4 sm:$0xff]  }
 0x129   :  { %2120 = vmatprep.subr.bf16.mxu1 %v8089_v4  ;;  %v8171_v4 = vld [vmem:[#allocation2 + $0x1ec] ss:$16 sps:$4 sm:$0xff]  }
 0x12b   :  { %2080 = vmatpush2.bf16.msra.mxu0 %v8091_v5  ;;  %v8173_v5 = vld [vmem:[#allocation2 + $0x2ec] ss:$16 sps:$4 sm:$0xff]  }
 0x12c   :  { %2121 = vmatpush2.bf16.msra.mxu1 %v8092_v9  ;;  %2081 = vmatprep.subr.bf16.mxu0 %v8093_v10  ;;  %v8175_v9 = vld [vmem:[#allocation2 + $0x1e8] ss:$16 sps:$4 sm:$0xff]  }
 0x12d   :  { %2122 = vmatprep.subr.bf16.mxu1 %v8095_v11  ;;  %v8176_v10 = vld [vmem:[#allocation2 + $0x2e8] ss:$16 sps:$4 sm:$0xff]   ;;  %v8177_v11 = vld [vmem:[#allocation2 + $0x1cc] ss:$16 sps:$4 sm:$0xff]  }
 0x12f   :  { %2082 = vmatpush2.bf16.msra.mxu0 %v8097_v18  ;;  %v8179_v18 = vld [vmem:[#allocation2 + $0x2cc] ss:$16 sps:$4 sm:$0xff]  }
 0x130   :  { %2123 = vmatpush2.bf16.msra.mxu1 %v8098_v19  ;;  %2083 = vmatprep.subr.bf16.mxu0 %v8099_v20  ;;  %v8181_v19 = vld [vmem:[#allocation2 + $0x1c8] ss:$16 sps:$4 sm:$0xff]  }
 0x131   :  { %2124 = vmatprep.subr.bf16.mxu1 %v8101_v21  ;;  %v8182_v20 = vld [vmem:[#allocation2 + $0x2c8] ss:$16 sps:$4 sm:$0xff]   ;;  %v8183_v21 = vld [vmem:[#allocation2 + $0x1ac] ss:$16 sps:$4 sm:$0xff]  }
 0x133   :  { %2084 = vmatpush2.bf16.msra.mxu0 %v8103_v22  ;;  %v8185_v22 = vld [vmem:[#allocation2 + $0x2ac] ss:$16 sps:$4 sm:$0xff]  }
 0x134   :  { %2125 = vmatpush2.bf16.msra.mxu1 %v8104_v23  ;;  %2085 = vmatprep.subr.bf16.mxu0 %v8105_v24  ;;  %v8187_v23 = vld [vmem:[#allocation2 + $0x1a8] ss:$16 sps:$4 sm:$0xff]  }
 0x135   :  { %2126 = vmatprep.subr.bf16.mxu1 %v8107_v25  ;;  %v8188_v24 = vld [vmem:[#allocation2 + $0x2a8] ss:$16 sps:$4 sm:$0xff]   ;;  %v8189_v25 = vld [vmem:[#allocation2 + $0x18c] ss:$16 sps:$4 sm:$0xff]  }
 0x137   :  { %2086 = vmatpush2.bf16.msra.mxu0 %v8109_v26  ;;  %v8191_v26 = vld [vmem:[#allocation2 + $0x28c] ss:$16 sps:$4 sm:$0xff]  }
 0x138   :  { %2127 = vmatpush2.bf16.msra.mxu1 %v8110_v27  ;;  %2087 = vmatprep.subr.bf16.mxu0 %v8111_v28  ;;  %v8193_v27 = vld [vmem:[#allocation2 + $0x188] ss:$16 sps:$4 sm:$0xff]  }
 0x139   :  { %2128 = vmatprep.subr.bf16.mxu1 %v8113_v29  ;;  %v8194_v28 = vld [vmem:[#allocation2 + $0x288] ss:$16 sps:$4 sm:$0xff]   ;;  %v8195_v29 = vld [vmem:[#allocation2 + $0x16c] ss:$16 sps:$4 sm:$0xff]  }
 0x13b   :  { %2088 = vmatpush2.bf16.msra.mxu0 %v8115_v30  ;;  %v8197_v30 = vld [vmem:[#allocation2 + $0x26c] ss:$16 sps:$4 sm:$0xff]  }
 0x13c   :  { %2129 = vmatpush2.bf16.msra.mxu1 %v8116_v31  ;;  %2089 = vmatprep.subr.bf16.mxu0 %v8117_v32  ;;  %v8199_v31 = vld [vmem:[#allocation2 + $0x168] ss:$16 sps:$4 sm:$0xff]  }
 0x13d   :  { %2130 = vmatprep.subr.bf16.mxu1 %v8119_v33  ;;  %v8200_v32 = vld [vmem:[#allocation2 + $0x268] ss:$16 sps:$4 sm:$0xff]   ;;  %v8203_v33 = vld [vmem:[#allocation2 + $0x24c] ss:$16 sps:$4 sm:$0xff]  }
 0x13f   :  { %2090 = vmatpush2.bf16.msra.mxu0 %v8121_v34  ;;  %v8205_v34 = vld [vmem:[#allocation2 + $0x148] ss:$16 sps:$4 sm:$0xff]  }
 0x140   :  { %2131 = vmatpush2.bf16.msra.mxu1 %v8122_v35  ;;  %2141 = vmatprep.subr.bf16.mxu0 %v8123_v36  ;;  %v8206_v35 = vld [vmem:[#allocation2 + $0x248] ss:$16 sps:$4 sm:$0xff]   ;;  %v8207_v36 = vld [vmem:[#allocation2 + $0x12c] ss:$16 sps:$4 sm:$0xff]  }
 0x141   :  { %2182 = vmatprep.subr.bf16.mxu1 %v8125_v37  ;;  %v8209_v37 = vld [vmem:[#allocation2 + $0x22c] ss:$16 sps:$4 sm:$0xff]  }
 0x142   :  { %2092 = vmatmul.mubr.bf16.vlgmr.msra.gmra.mxu0 %v9739_v13 }
 0x143   :  { %2133 = vmatmul.mubr.bf16.vlgmr.msra.gmra.mxu1 %v9743_v15  ;;  %2142 = vmatpush1.bf16.msra.mxu0 %v8127_v38  ;;  %v8211_v38 = vld [vmem:[#allocation2 + $0x128] ss:$16 sps:$4 sm:$0xff]  }
 0x144   :  { %2183 = vmatpush1.bf16.msra.mxu1 %v8128_v39  ;;  %2143 = vmatprep.subr.bf16.mxu0 %v8129_v40  ;;  %v8212_v39 = vld [vmem:[#allocation2 + $0x228] ss:$16 sps:$4 sm:$0xff]   ;;  %v8213_v40 = vld [vmem:[#allocation2 + $0x10c] ss:$16 sps:$4 sm:$0xff]  }
 0x145   :  { %2184 = vmatprep.subr.bf16.mxu1 %v8131_v41  ;;  %2173 = vmatprep.mubr.bf16.mxu0 %v9537_v46  ;;  %v8215_v41 = vld [vmem:[#allocation2 + $0x20c] ss:$16 sps:$4 sm:$0xff]  }
 0x146   :  { %2214 = vmatprep.mubr.bf16.mxu1 %v9733_v7  ;;  %v8153_v7 = vld [vmem:[#allocation2 + $0x844] ss:$16 sps:$4 sm:$0xff]  }
 0x147   :  { %2144 = vmatpush1.bf16.msra.mxu0 %v8133_v42  ;;  %v8217_v42 = vld [vmem:[#allocation2 + $0x108] ss:$16 sps:$4 sm:$0xff]  }
 0x148   :  { %2185 = vmatpush1.bf16.msra.mxu1 %v8134_v43  ;;  %2145 = vmatprep.subr.bf16.mxu0 %v8135_v44  ;;  %v8218_v43 = vld [vmem:[#allocation2 + $0x208] ss:$16 sps:$4 sm:$0xff]   ;;  %v8219_v44 = vld [vmem:[#allocation2 + $0x3ec] ss:$16 sps:$4 sm:$0xff]  }
 0x149   :  { %2186 = vmatprep.subr.bf16.mxu1 %v8137_v45  ;;  %v8221_v45 = vld [vmem:[#allocation2 + $0x4ec] ss:$16 sps:$4 sm:$0xff]  }
 0x14b   :  { %2146 = vmatpush1.bf16.msra.mxu0 %v8139_v47  ;;  %v8223_v47 = vld [vmem:[#allocation2 + $0x3e8] ss:$16 sps:$4 sm:$0xff]  }
 0x14c   :  { %2187 = vmatpush1.bf16.msra.mxu1 %v8140_v48  ;;  %2147 = vmatprep.subr.bf16.mxu0 %v8141_v49  ;;  %v8224_v48 = vld [vmem:[#allocation2 + $0x4e8] ss:$16 sps:$4 sm:$0xff]   ;;  %v8225_v49 = vld [vmem:[#allocation2 + $0x3cc] ss:$16 sps:$4 sm:$0xff]  }
 0x14d   :  { %2188 = vmatprep.subr.bf16.mxu1 %v8143_v50  ;;  %v8227_v50 = vld [vmem:[#allocation2 + $0x4cc] ss:$16 sps:$4 sm:$0xff]  }
 0x14f   :  { %2148 = vmatpush1.bf16.msra.mxu0 %v8145_v51  ;;  %v8229_v51 = vld [vmem:[#allocation2 + $0x3c8] ss:$16 sps:$4 sm:$0xff]  }
 0x150   :  { %2189 = vmatpush1.bf16.msra.mxu1 %v8146_v52  ;;  %2149 = vmatprep.subr.bf16.mxu0 %v8147_v53  ;;  %v8230_v52 = vld [vmem:[#allocation2 + $0x4c8] ss:$16 sps:$4 sm:$0xff]   ;;  %v8231_v53 = vld [vmem:[#allocation2 + $0x3ac] ss:$16 sps:$4 sm:$0xff]  }
 0x151   :  { %2190 = vmatprep.subr.bf16.mxu1 %v8149_v54  ;;  %v8233_v54 = vld [vmem:[#allocation2 + $0x4ac] ss:$16 sps:$4 sm:$0xff]  }
 0x153   :  { %2150 = vmatpush1.bf16.msra.mxu0 %v8151_v55  ;;  %v8235_v55 = vld [vmem:[#allocation2 + $0x3a8] ss:$16 sps:$4 sm:$0xff]  }
 0x154   :  { %2191 = vmatpush1.bf16.msra.mxu1 %v8152_v56  ;;  %2151 = vmatprep.subr.bf16.mxu0 %v8153_v7  ;;  %v8236_v56 = vld [vmem:[#allocation2 + $0x4a8] ss:$16 sps:$4 sm:$0xff]   ;;  %v8237_v7 = vld [vmem:[#allocation2 + $0x38c] ss:$16 sps:$4 sm:$0xff]  }
 0x155   :  { %2192 = vmatprep.subr.bf16.mxu1 %v8155_v57  ;;  %v8239_v57 = vld [vmem:[#allocation2 + $0x48c] ss:$16 sps:$4 sm:$0xff]  }
 0x157   :  { %2152 = vmatpush1.bf16.msra.mxu0 %v8157_v58  ;;  %v8242_v58 = vld [vmem:[#allocation2 + $0x488] ss:$16 sps:$4 sm:$0xff]  }
 0x158   :  { %2193 = vmatpush1.bf16.msra.mxu1 %v8158_v59  ;;  %2153 = vmatprep.subr.bf16.mxu0 %v8159_v60  ;;  %v8243_v59 = vld [vmem:[#allocation2 + $0x36c] ss:$16 sps:$4 sm:$0xff]  }
 0x159   :  { %2194 = vmatprep.subr.bf16.mxu1 %v8161_v61  ;;  %v8245_v60 = vld [vmem:[#allocation2 + $0x46c] ss:$16 sps:$4 sm:$0xff]   ;;  %v8247_v61 = vld [vmem:[#allocation2 + $0x368] ss:$16 sps:$4 sm:$0xff]  }
 0x15b   :  { %2154 = vmatpush1.bf16.msra.mxu0 %v8163_v62  ;;  %v8249_v62 = vld [vmem:[#allocation2 + $0x34c] ss:$16 sps:$4 sm:$0xff]  }
 0x15c   :  { %2195 = vmatpush1.bf16.msra.mxu1 %v8164_v63  ;;  %2155 = vmatprep.subr.bf16.mxu0 %v8165_v0  ;;  %v8251_v63 = vld [vmem:[#allocation2 + $0x44c] ss:$16 sps:$4 sm:$0xff]   ;;  %v8253_v0 = vld [vmem:[#allocation2 + $0x348] ss:$16 sps:$4 sm:$0xff]  }
 0x15d   :  { %2196 = vmatprep.subr.bf16.mxu1 %v8167_v1  ;;  %v8254_v1 = vld [vmem:[#allocation2 + $0x448] ss:$16 sps:$4 sm:$0xff]  }
 0x15f   :  { %2156 = vmatpush1.bf16.msra.mxu0 %v8169_v2  ;;  %v8255_v2 = vld [vmem:[#allocation2 + $0x32c] ss:$16 sps:$4 sm:$0xff]  }
 0x160   :  { %2197 = vmatpush1.bf16.msra.mxu1 %v8170_v3  ;;  %2223 = vmatprep.subr.bf16.mxu0 %v8173_v5  ;;  %v8257_v3 = vld [vmem:[#allocation2 + $0x42c] ss:$16 sps:$4 sm:$0xff]   ;;  %v8260_v5 = vld [vmem:[#allocation2 + $0x428] ss:$16 sps:$4 sm:$0xff]  }
 0x161   :  { %2198 = vmatprep.subr.bf16.mxu1 %v8171_v4  ;;  %v8259_v4 = vld [vmem:[#allocation2 + $0x328] ss:$16 sps:$4 sm:$0xff]  }
 0x162   :  { %2174 = vmatmul.mubr.bf16.vlgmr.msra.gmra.mxu0 %v9747_v17 }
 0x163   :  { %2224 = vmatpush1.bf16.msra.mxu0 %v8176_v10  ;;  %2255 = vmatprep.mubr.bf16.mxu0 %v9737_v12  ;;  %v8201_v12 = vld [vmem:[#allocation2 + $0x14c] ss:$16 sps:$4 sm:$0xff]  }
 0x164   :  { %2199 = vmatpush2.bf16.msra.mxu1 %v8175_v9  ;;  %2225 = vmatprep.subr.bf16.mxu0 %v8179_v18  ;;  %v8261_v9 = vld [vmem:[#allocation2 + $0x30c] ss:$16 sps:$4 sm:$0xff]   ;;  %v8266_v18 = vld [vmem:[#allocation2 + $0x408] ss:$16 sps:$4 sm:$0xff]  }
 0x165   :  { %2200 = vmatprep.subr.bf16.mxu1 %v8177_v11  ;;  %v8263_v10 = vld [vmem:[#allocation2 + $0x40c] ss:$16 sps:$4 sm:$0xff]   ;;  %v8265_v11 = vld [vmem:[#allocation2 + $0x308] ss:$16 sps:$4 sm:$0xff]  }
 0x167   :  { %2226 = vmatpush1.bf16.msra.mxu0 %v8182_v20  ;;  %v8269_v20 = vld [vmem:[#allocation2 + $0x6ec] ss:$16 sps:$4 sm:$0xff]  }
 0x168   :  { %2201 = vmatpush2.bf16.msra.mxu1 %v8181_v19  ;;  %2227 = vmatprep.subr.bf16.mxu0 %v8185_v22  ;;  %v8267_v19 = vld [vmem:[#allocation2 + $0x5ec] ss:$16 sps:$4 sm:$0xff]   ;;  %v8272_v22 = vld [vmem:[#allocation2 + $0x6e8] ss:$16 sps:$4 sm:$0xff]  }
 0x169   :  { %2202 = vmatprep.subr.bf16.mxu1 %v8183_v21  ;;  %v8271_v21 = vld [vmem:[#allocation2 + $0x5e8] ss:$16 sps:$4 sm:$0xff]  }
 0x16b   :  { %2228 = vmatpush1.bf16.msra.mxu0 %v8188_v24  ;;  %v8275_v24 = vld [vmem:[#allocation2 + $0x6cc] ss:$16 sps:$4 sm:$0xff]  }
 0x16c   :  { %2203 = vmatpush2.bf16.msra.mxu1 %v8187_v23  ;;  %2229 = vmatprep.subr.bf16.mxu0 %v8191_v26  ;;  %v8273_v23 = vld [vmem:[#allocation2 + $0x5cc] ss:$16 sps:$4 sm:$0xff]   ;;  %v8278_v26 = vld [vmem:[#allocation2 + $0x6c8] ss:$16 sps:$4 sm:$0xff]  }
 0x16d   :  { %2204 = vmatprep.subr.bf16.mxu1 %v8189_v25  ;;  %v8277_v25 = vld [vmem:[#allocation2 + $0x5c8] ss:$16 sps:$4 sm:$0xff]  }
 0x16f   :  { %2230 = vmatpush1.bf16.msra.mxu0 %v8194_v28  ;;  %v8281_v28 = vld [vmem:[#allocation2 + $0x6ac] ss:$16 sps:$4 sm:$0xff]  }
 0x170   :  { %2205 = vmatpush2.bf16.msra.mxu1 %v8193_v27  ;;  %2231 = vmatprep.subr.bf16.mxu0 %v8197_v30  ;;  %v8279_v27 = vld [vmem:[#allocation2 + $0x5ac] ss:$16 sps:$4 sm:$0xff]   ;;  %v8284_v30 = vld [vmem:[#allocation2 + $0x6a8] ss:$16 sps:$4 sm:$0xff]  }
 0x171   :  { %2206 = vmatprep.subr.bf16.mxu1 %v8195_v29  ;;  %v8283_v29 = vld [vmem:[#allocation2 + $0x5a8] ss:$16 sps:$4 sm:$0xff]  }
 0x173   :  { %2232 = vmatpush1.bf16.msra.mxu0 %v8200_v32  ;;  %v8287_v32 = vld [vmem:[#allocation2 + $0x68c] ss:$16 sps:$4 sm:$0xff]  }
 0x174   :  { %2207 = vmatpush2.bf16.msra.mxu1 %v8199_v31  ;;  %2233 = vmatprep.subr.bf16.mxu0 %v8203_v33  ;;  %v8285_v31 = vld [vmem:[#allocation2 + $0x58c] ss:$16 sps:$4 sm:$0xff]  }
 0x175   :  { %2208 = vmatprep.subr.bf16.mxu1 %v8201_v12  ;;  %v8290_v12 = vld [vmem:[#allocation2 + $0x688] ss:$16 sps:$4 sm:$0xff]   ;;  %v8291_v33 = vld [vmem:[#allocation2 + $0x56c] ss:$16 sps:$4 sm:$0xff]  }
 0x177   :  { %2234 = vmatpush1.bf16.msra.mxu0 %v8206_v35  ;;  %v8295_v35 = vld [vmem:[#allocation2 + $0x568] ss:$16 sps:$4 sm:$0xff]  }
 0x178   :  { %2209 = vmatpush2.bf16.msra.mxu1 %v8205_v34  ;;  %2235 = vmatprep.subr.bf16.mxu0 %v8209_v37  ;;  %v8293_v34 = vld [vmem:[#allocation2 + $0x66c] ss:$16 sps:$4 sm:$0xff]  }
 0x179   :  { %2210 = vmatprep.subr.bf16.mxu1 %v8207_v36  ;;  %v8297_v36 = vld [vmem:[#allocation2 + $0x54c] ss:$16 sps:$4 sm:$0xff]  }
 0x17a   :  { %v8299_v37 = vld [vmem:[#allocation2 + $0x64c] ss:$16 sps:$4 sm:$0xff]  }
 0x17b   :  { %2236 = vmatpush1.bf16.msra.mxu0 %v8212_v39  ;;  %v8302_v39 = vld [vmem:[#allocation2 + $0x648] ss:$16 sps:$4 sm:$0xff]  }
 0x17c   :  { %2211 = vmatpush2.bf16.msra.mxu1 %v8211_v38  ;;  %2237 = vmatprep.subr.bf16.mxu0 %v8215_v41  ;;  %v8301_v38 = vld [vmem:[#allocation2 + $0x548] ss:$16 sps:$4 sm:$0xff]   ;;  %v8305_v41 = vld [vmem:[#allocation2 + $0x62c] ss:$16 sps:$4 sm:$0xff]  }
 0x17d   :  { %2212 = vmatprep.subr.bf16.mxu1 %v8213_v40  ;;  %v8303_v40 = vld [vmem:[#allocation2 + $0x52c] ss:$16 sps:$4 sm:$0xff]  }
 0x17f   :  { %2238 = vmatpush1.bf16.msra.mxu0 %v8218_v43  ;;  %v8308_v43 = vld [vmem:[#allocation2 + $0x628] ss:$16 sps:$4 sm:$0xff]  }
 0x180   :  { %2213 = vmatpush2.bf16.msra.mxu1 %v8217_v42  ;;  %2239 = vmatprep.subr.bf16.mxu0 %v8219_v44  ;;  %v8307_v42 = vld [vmem:[#allocation2 + $0x528] ss:$16 sps:$4 sm:$0xff]   ;;  %v8309_v44 = vld [vmem:[#allocation2 + $0x50c] ss:$16 sps:$4 sm:$0xff]  }
 0x181   :  { %2264 = vmatprep.subr.bf16.mxu1 %v8221_v45  ;;  %v8311_v45 = vld [vmem:[#allocation2 + $0x60c] ss:$16 sps:$4 sm:$0xff]  }
 0x183   :  { %2215 = vmatmul.mubr.bf16.vlgmr.msra.gmra.mxu1 %v9731_v6  ;;  %2240 = vmatpush2.bf16.msra.mxu0 %v8223_v47  ;;  %v8241_v6 = vld [vmem:[#allocation2 + $0x388] ss:$16 sps:$4 sm:$0xff]  }
 0x184   :  { %2265 = vmatpush1.bf16.msra.mxu1 %v8224_v48  ;;  %2241 = vmatprep.subr.bf16.mxu0 %v8225_v49  ;;  %v8313_v47 = vld [vmem:[#allocation2 + $0x508] ss:$16 sps:$4 sm:$0xff]   ;;  %v8315_v49 = vld [vmem:[#allocation2 + $0x7ec] ss:$16 sps:$4 sm:$0xff]  }
 0x185   :  { %2266 = vmatprep.subr.bf16.mxu1 %v8227_v50  ;;  %2296 = vmatprep.mubr.bf16.mxu1 %v9741_v14  ;;  %v8248_v14 = vld [vmem:[#allocation2 + $0x468] ss:$16 sps:$4 sm:$0xff]   ;;  %v8317_v50 = vld [vmem:[#allocation2 + $0x8ec] ss:$16 sps:$4 sm:$0xff]  }
 0x186   :  { %v8314_v48 = vld [vmem:[#allocation2 + $0x608] ss:$16 sps:$4 sm:$0xff]  }
 0x187   :  { %2242 = vmatpush2.bf16.msra.mxu0 %v8229_v51  ;;  %v8319_v51 = vld [vmem:[#allocation2 + $0x7e8] ss:$16 sps:$4 sm:$0xff]  }
 0x188   :  { %2267 = vmatpush1.bf16.msra.mxu1 %v8230_v52  ;;  %2243 = vmatprep.subr.bf16.mxu0 %v8231_v53  ;;  %v8320_v52 = vld [vmem:[#allocation2 + $0x8e8] ss:$16 sps:$4 sm:$0xff]   ;;  %v8321_v53 = vld [vmem:[#allocation2 + $0x7cc] ss:$16 sps:$4 sm:$0xff]  }
 0x189   :  { %2268 = vmatprep.subr.bf16.mxu1 %v8233_v54  ;;  %v8323_v54 = vld [vmem:[#allocation2 + $0x8cc] ss:$16 sps:$4 sm:$0xff]  }
 0x18b   :  { %2244 = vmatpush2.bf16.msra.mxu0 %v8235_v55 }
 0x18c   :  { %2269 = vmatpush1.bf16.msra.mxu1 %v8236_v56  ;;  %2245 = vmatprep.subr.bf16.mxu0 %v8237_v7 }
 0x18d   :  { %2270 = vmatprep.subr.bf16.mxu1 %v8239_v57  ;;  %v8325_v57 = vld [vmem:[#allocation2 + $0x7c8] ss:$16 sps:$4 sm:$0xff]  }
 0x18f   :  { %2246 = vmatpush2.bf16.msra.mxu0 %v8241_v6  ;;  %v8326_v6 = vld [vmem:[#allocation2 + $0x8c8] ss:$16 sps:$4 sm:$0xff]  }
 0x190   :  { %2271 = vmatpush1.bf16.msra.mxu1 %v8242_v58  ;;  %2247 = vmatprep.subr.bf16.mxu0 %v8243_v59 }
 0x191   :  { %2272 = vmatprep.subr.bf16.mxu1 %v8245_v60  ;;  %v8327_v60 = vld [vmem:[#allocation2 + $0x7ac] ss:$16 sps:$4 sm:$0xff]  }
 0x193   :  { %2248 = vmatpush2.bf16.msra.mxu0 %v8247_v61  ;;  %v8329_v61 = vld [vmem:[#allocation2 + $0x8ac] ss:$16 sps:$4 sm:$0xff]  }
 0x194   :  { %2273 = vmatpush1.bf16.msra.mxu1 %v8248_v14  ;;  %2249 = vmatprep.subr.bf16.mxu0 %v8249_v62 }
 0x195   :  { %2274 = vmatprep.subr.bf16.mxu1 %v8251_v63 }
 0x197   :  { %2250 = vmatpush2.bf16.msra.mxu0 %v8253_v0  ;;  %v8332_v0 = vld [vmem:[#allocation2 + $0x8a8] ss:$16 sps:$4 sm:$0xff]  }
 0x198   :  { %2275 = vmatpush1.bf16.msra.mxu1 %v8254_v1  ;;  %2251 = vmatprep.subr.bf16.mxu0 %v8255_v2 }
 0x199   :  { %2276 = vmatprep.subr.bf16.mxu1 %v8257_v3  ;;  %v8333_v3 = vld [vmem:[#allocation2 + $0x78c] ss:$16 sps:$4 sm:$0xff]  }
 0x19b   :  { %2252 = vmatpush2.bf16.msra.mxu0 %v8259_v4  ;;  %v8335_v4 = vld [vmem:[#allocation2 + $0x88c] ss:$16 sps:$4 sm:$0xff]  }
 0x19c   :  { %2277 = vmatpush1.bf16.msra.mxu1 %v8260_v5  ;;  %2253 = vmatprep.subr.bf16.mxu0 %v8261_v9  ;;  %v8337_v5 = vld [vmem:[#allocation2 + $0x788] ss:$16 sps:$4 sm:$0xff]  }
 0x19d   :  { %2278 = vmatprep.subr.bf16.mxu1 %v8263_v10  ;;  %v8338_v9 = vld [vmem:[#allocation2 + $0x888] ss:$16 sps:$4 sm:$0xff]   ;;  %v8339_v10 = vld [vmem:[#allocation2 + $0x76c] ss:$16 sps:$4 sm:$0xff]  }
 0x19f   :  { %2254 = vmatpush2.bf16.msra.mxu0 %v8265_v11  ;;  %v8341_v11 = vld [vmem:[#allocation2 + $0x86c] ss:$16 sps:$4 sm:$0xff]  }
 0x1a0   :  { %2279 = vmatpush1.bf16.msra.mxu1 %v8266_v18  ;;  %2305 = vmatprep.subr.bf16.mxu0 %v8269_v20  ;;  %v8343_v18 = vld [vmem:[#allocation2 + $0x768] ss:$16 sps:$4 sm:$0xff]   ;;  %v8345_v20 = vld [vmem:[#allocation2 + $0x74c] ss:$16 sps:$4 sm:$0xff]  }
 0x1a1   :  { %2280 = vmatprep.subr.bf16.mxu1 %v8267_v19  ;;  %v8344_v19 = vld [vmem:[#allocation2 + $0x868] ss:$16 sps:$4 sm:$0xff]  }
 0x1a2   :  { %2256 = vmatmul.mubr.bf16.vlgmr.msra.gmra.mxu0 %v9735_v8  ;;  %v8289_v8 = vld [vmem:[#allocation2 + $0x588] ss:$16 sps:$4 sm:$0xff]  }
 0x1a3   :  { %2306 = vmatpush1.bf16.msra.mxu0 %v8272_v22  ;;  %2337 = vmatprep.mubr.bf16.mxu0 %v9745_v16  ;;  %v8296_v16 = vld [vmem:[#allocation2 + $0x668] ss:$16 sps:$4 sm:$0xff]  }
 0x1a4   :  { %2281 = vmatpush2.bf16.msra.mxu1 %v8271_v21  ;;  %2307 = vmatprep.subr.bf16.mxu0 %v8275_v24  ;;  %v8347_v21 = vld [vmem:[#allocation2 + $0x84c] ss:$16 sps:$4 sm:$0xff]   ;;  %v8349_v22 = vld [vmem:[#allocation2 + $0x748] ss:$16 sps:$4 sm:$0xff]  }
 0x1a5   :  { %2282 = vmatprep.subr.bf16.mxu1 %v8273_v23  ;;  %v8350_v23 = vld [vmem:[#allocation2 + $0x848] ss:$16 sps:$4 sm:$0xff]   ;;  %v8351_v24 = vld [vmem:[#allocation2 + $0x72c] ss:$16 sps:$4 sm:$0xff]  }
 0x1a7   :  { %2308 = vmatpush1.bf16.msra.mxu0 %v8278_v26  ;;  %v8355_v26 = vld [vmem:[#allocation2 + $0x728] ss:$16 sps:$4 sm:$0xff]  }
 0x1a8   :  { %2283 = vmatpush2.bf16.msra.mxu1 %v8277_v25  ;;  %2309 = vmatprep.subr.bf16.mxu0 %v8281_v28  ;;  %v8353_v25 = vld [vmem:[#allocation2 + $0x82c] ss:$16 sps:$4 sm:$0xff]  }
 0x1a9   :  { %2284 = vmatprep.subr.bf16.mxu1 %v8279_v27  ;;  %v8356_v27 = vld [vmem:[#allocation2 + $0x828] ss:$16 sps:$4 sm:$0xff]   ;;  %v8357_v28 = vld [vmem:[#allocation2 + $0x70c] ss:$16 sps:$4 sm:$0xff]  }
 0x1ab   :  { %2310 = vmatpush1.bf16.msra.mxu0 %v8284_v30  ;;  %v8361_v30 = vld [vmem:[#allocation2 + $0x708] ss:$16 sps:$4 sm:$0xff]  }
 0x1ac   :  { %2285 = vmatpush2.bf16.msra.mxu1 %v8283_v29  ;;  %2311 = vmatprep.subr.bf16.mxu0 %v8287_v32  ;;  %v8359_v29 = vld [vmem:[#allocation2 + $0x80c] ss:$16 sps:$4 sm:$0xff]  }
 0x1ad   :  { %2286 = vmatprep.subr.bf16.mxu1 %v8285_v31  ;;  %v8362_v31 = vld [vmem:[#allocation2 + $0x808] ss:$16 sps:$4 sm:$0xff]  }
 0x1af   :  { %2312 = vmatpush1.bf16.msra.mxu0 %v8290_v12 }
 0x1b0   :  { %2287 = vmatpush2.bf16.msra.mxu1 %v8289_v8  ;;  %2313 = vmatprep.subr.bf16.mxu0 %v8293_v34 }
 0x1b1   :  { %2288 = vmatprep.subr.bf16.mxu1 %v8291_v33 }
 0x1b3   :  { %2314 = vmatpush1.bf16.msra.mxu0 %v8296_v16 }
 0x1b4   :  { %2289 = vmatpush2.bf16.msra.mxu1 %v8295_v35  ;;  %2315 = vmatprep.subr.bf16.mxu0 %v8299_v37 }
 0x1b5   :  { %2290 = vmatprep.subr.bf16.mxu1 %v8297_v36 }
 0x1b7   :  { %2316 = vmatpush1.bf16.msra.mxu0 %v8302_v39 }
 0x1b8   :  { %2291 = vmatpush2.bf16.msra.mxu1 %v8301_v38  ;;  %2317 = vmatprep.subr.bf16.mxu0 %v8305_v41 }
 0x1b9   :  { %2292 = vmatprep.subr.bf16.mxu1 %v8303_v40 }
 0x1bb   :  { %2318 = vmatpush1.bf16.msra.mxu0 %v8308_v43 }
 0x1bc   :  { %2293 = vmatpush2.bf16.msra.mxu1 %v8307_v42  ;;  %2319 = vmatprep.subr.bf16.mxu0 %v8311_v45 }
 0x1bd   :  { %2294 = vmatprep.subr.bf16.mxu1 %v8309_v44 }
 0x1bf   :  { %2320 = vmatpush1.bf16.msra.mxu0 %v8314_v48 }
 0x1c0   :  { %2295 = vmatpush2.bf16.msra.mxu1 %v8313_v47  ;;  %2321 = vmatprep.subr.bf16.mxu0 %v8315_v49 }
 0x1c1   :  { %2346 = vmatprep.subr.bf16.mxu1 %v8317_v50 }
 0x1c2   :  { %v2011_v55 = vpop.f32.mrf.mxu0 }
 0x1c3   :  { %v2052_v56 = vpop.f32.mrf.mxu1  ;;  %2297 = vmatmul.mubr.bf16.vlgmr.msra.gmra.mxu1 %v9739_v13  ;;  %2322 = vmatpush2.bf16.msra.mxu0 %v8319_v51  ;;  %v8331_v13 = vld [vmem:[#allocation2 + $0x7a8] ss:$16 sps:$4 sm:$0xff]  }
 0x1c4   :  { %v9766_v7 = vadd.f32 %v2052_v56, %v2011_v55  ;;  %2347 = vmatpush1.bf16.msra.mxu1 %v8320_v52  ;;  %v2013_v58 = vpop.f32.mrf.mxu0  ;;  %2323 = vmatprep.subr.bf16.mxu0 %v8321_v53 }
 0x1c5   :  { %v2054_v59 = vpop.f32.mrf.mxu1  ;;  %2348 = vmatprep.subr.bf16.mxu1 %v8323_v54  ;;  %2378 = vmatprep.mubr.bf16.mxu1 %v9537_v46 }
 0x1c6   :  { %v2055_v14 = vadd.f32 %v2054_v59, %v2013_v58  ;;  %v2015_v62 = vpop.f32.mrf.mxu0 }
 0x1c7   :  { %v2056_v63 = vpop.f32.mrf.mxu1  ;;  %2324 = vmatpush2.bf16.msra.mxu0 %v8325_v57 }
 0x1c8   :  { %2349 = vmatpush1.bf16.msra.mxu1 %v8326_v6  ;;  %v2016_v1 = vpop.f32.mrf.mxu0  ;;  %2325 = vmatprep.subr.bf16.mxu0 %v8327_v60 }
 0x1c9   :  { %v2057_v2 = vpop.f32.mrf.mxu1  ;;  %2350 = vmatprep.subr.bf16.mxu1 %v8329_v61 }
 0x1cb   :  { %2326 = vmatpush2.bf16.msra.mxu0 %v8331_v13 }
 0x1cc   :  { %2351 = vmatpush1.bf16.msra.mxu1 %v8332_v0  ;;  %2327 = vmatprep.subr.bf16.mxu0 %v8333_v3 }
 0x1cd   :  { %2352 = vmatprep.subr.bf16.mxu1 %v8335_v4 }
 0x1cf   :  { %2328 = vmatpush2.bf16.msra.mxu0 %v8337_v5 }
 0x1d0   :  { %2353 = vmatpush1.bf16.msra.mxu1 %v8338_v9  ;;  %2329 = vmatprep.subr.bf16.mxu0 %v8339_v10 }
 0x1d1   :  { %2354 = vmatprep.subr.bf16.mxu1 %v8341_v11 }
 0x1d3   :  { %2330 = vmatpush2.bf16.msra.mxu0 %v8343_v18 }
 0x1d4   :  { %2355 = vmatpush1.bf16.msra.mxu1 %v8344_v19  ;;  %2331 = vmatprep.subr.bf16.mxu0 %v8345_v20 }
 0x1d5   :  { %2356 = vmatprep.subr.bf16.mxu1 %v8347_v21 }
 0x1d7   :  { %2332 = vmatpush2.bf16.msra.mxu0 %v8349_v22 }
 0x1d8   :  { %2357 = vmatpush1.bf16.msra.mxu1 %v8350_v23  ;;  %2333 = vmatprep.subr.bf16.mxu0 %v8351_v24 }
 0x1d9   :  { %2358 = vmatprep.subr.bf16.mxu1 %v8353_v25 }
 0x1db   :  { %2334 = vmatpush2.bf16.msra.mxu0 %v8355_v26 }
 0x1dc   :  { %2359 = vmatpush1.bf16.msra.mxu1 %v8356_v27  ;;  %2335 = vmatprep.subr.bf16.mxu0 %v8357_v28 }
 0x1dd   :  { %2360 = vmatprep.subr.bf16.mxu1 %v8359_v29 }
 0x1df   :  { %2336 = vmatpush2.bf16.msra.mxu0 %v8361_v30 }
 0x1e0   :  { %2361 = vmatpush1.bf16.msra.mxu1 %v8362_v31 }
 0x1e2   :  { %2338 = vmatmul.mubr.bf16.vlgmr.msra.gmra.mxu0 %v9743_v15 }
 0x1e3   :  { %2379 = vmatmul.mubr.bf16.vlgmr.msra.gmra.mxu1 %v9747_v17 }
 0x202   :  { %v2093_v32 = vpop.f32.mrf.mxu0 }
 0x203   :  { %v2134_v8 = vpop.f32.mrf.mxu1  ;;  %v2094_v12 = vadd.f32 %v2093_v32, %v9766_v7 }
 0x204   :  { %v2095_v33 = vpop.f32.mrf.mxu0 }
 0x205   :  { %v2136_v34 = vpop.f32.mrf.mxu1  ;;  %v2135_v35 = vadd.f32 %v2134_v8, %v2094_v12  ;;  %v2096_v16 = vadd.f32 %v2095_v33, %v2055_v14 }
 0x206   :  { %v2097_v36 = vpop.f32.mrf.mxu0 }
 0x207   :  { %v2138_v37 = vpop.f32.mrf.mxu1  ;;  %v2137_v38 = vadd.f32 %v2136_v34, %v2096_v16 }
 0x208   :  { %v2098_v39 = vpop.f32.mrf.mxu0 }
 0x209   :  { %v2139_v40 = vpop.f32.mrf.mxu1 }
 0x222   :  { %v2175_v41 = vpop.f32.mrf.mxu0 }
 0x223   :  { %v9772_v42 = vadd.f32 %v2175_v41, %v2135_v35 }
 0x224   :  { %v2177_v43 = vpop.f32.mrf.mxu0 }
 0x225   :  { %v2387_v15 = vrot.slane %v9772_v42, 4  ;;  %v2411_v17 = vmul.f32 %v9772_v42, %v9772_v42  ;;  %v9777_v44 = vadd.f32 %v2177_v43, %v2137_v38 }
 0x226   :  { %v2179_v45 = vpop.f32.mrf.mxu0 }
 0x227   :  { %v2388_v47 = vadd.f32 %v2387_v15, %v9772_v42  ;;  %v2415_v48 = vrot.slane %v2411_v17, 4  ;;  %v2393_v49 = vrot.slane %v9777_v44, 4  ;;  %v2412_v50 = vmul.f32 %v9777_v44, %v9777_v44 }
 0x228   :  { %v2180_v51 = vpop.f32.mrf.mxu0 }
 0x229   :  { %v2389_v52 = vrot.slane %v2388_v47, 2  ;;  %v2416_v53 = vadd.f32 %v2415_v48, %v2411_v17  ;;  %v2394_v54 = vadd.f32 %v2393_v49, %v9777_v44  ;;  %v2421_v55 = vrot.slane %v2412_v50, 4 }
 0x22b   :  { %v2390_v56 = vadd.f32 %v2389_v52, %v2388_v47  ;;  %v2417_v7 = vrot.slane %v2416_v53, 2  ;;  %v2395_v57 = vrot.slane %v2394_v54, 2  ;;  %v2422_v6 = vadd.f32 %v2421_v55, %v2412_v50 }
 0x22d   :  { %v2391_v58 = vrot.slane %v2390_v56, 1  ;;  %v2418_v59 = vadd.f32 %v2417_v7, %v2416_v53  ;;  %v2396_v60 = vadd.f32 %v2395_v57, %v2394_v54  ;;  %v2423_v61 = vrot.slane %v2422_v6, 2 }
 0x22f   :  { %v2392_v14 = vadd.f32 %v2391_v58, %v2390_v56  ;;  %v2419_v62 = vrot.slane %v2418_v59, 1  ;;  %v2397_v63 = vrot.slane %v2396_v60, 1  ;;  %v2424_v13 = vadd.f32 %v2423_v61, %v2422_v6 }
 0x231   :  { %v2420_v0 = vadd.f32 %v2419_v62, %v2418_v59  ;;  %v9784_v1 = vmul.f32 0.125, %v2392_v14  ;;  %v2398_v2 = vadd.f32 %v2397_v63, %v2396_v60  ;;  %v2425_v3 = vrot.slane %v2424_v13, 1 }
 0x233   :  { %v2443_v4 = vmul.f32 0.125, %v2420_v0  ;;  %v2447_v5 = vmul.f32 %v9784_v1, %v9784_v1  ;;  %v2426_v9 = vadd.f32 %v2425_v3, %v2424_v13  ;;  %v9788_v10 = vmul.f32 0.125, %v2398_v2 }
 0x235   :  { %v2451_v11 = vsub.f32 %v2443_v4, %v2447_v5  ;;  %v2444_v18 = vmul.f32 0.125, %v2426_v9  ;;  %v2448_v19 = vmul.f32 %v9788_v10, %v9788_v10 }
 0x237   :  { %v2455_v20 = vmax.f32 %v2451_v11, 0.0  ;;  %v2452_v21 = vsub.f32 %v2444_v18, %v2448_v19 }
 0x239   :  { %v2460_v22 = vadd.f32 1e-05, %v2455_v20  ;;  %v2456_v23 = vmax.f32 %v2452_v21, 0.0 }
 0x23b   :  { %v2461_v24 = vadd.f32 1e-05, %v2456_v23  ;;  %8363 = vrsqrt.f32 %v2460_v22 }
 0x23d   :  { %8365 = vrsqrt.f32 %v2461_v24 }
 0x243   :  { %v2216_v25 = vpop.f32.mrf.mxu1 }
 0x245   :  { %v2218_v26 = vpop.f32.mrf.mxu1 }
 0x247   :  { %v2220_v27 = vpop.f32.mrf.mxu1 }
 0x248   :  { %v9792_v29 = vpop.eup %8363 }
 0x249   :  { %v2221_v28 = vpop.f32.mrf.mxu1 }
 0x24a   :  { %v9794_v30 = vpop.eup %8365 }
 0x24b   :  { %v2472_v31 = vcombine.low %v9792_v29, %v9794_v30 }
 0x262   :  { %v2257_v32 = vpop.f32.mrf.mxu0 }
 0x263   :  { %v2258_v8 = vadd.f32 %v2257_v32, %v2216_v25 }
 0x264   :  { %v2259_v12 = vpop.f32.mrf.mxu0 }
 0x266   :  { %v2261_v33 = vpop.f32.mrf.mxu0 }
 0x268   :  { %v2262_v34 = vpop.f32.mrf.mxu0 }
 0x269   :  { %9388 = shalt.err (!%p9385_p8)  }
 0x26a   :  { %s9538_s16 = smov 64   ;;  %s9539_s26 = smov 256   ;;  %v2260_v38 = vadd.f32 %v2259_v12, %v2218_v26 }
 0x26b   :  { %s9540_s13 = smov 4   ;;  %s10216_s18 = sld [smem:[#allocation60_spill]] }
 0x271   :  { %2595 = dma.hbm_to_vmem [thread:$0]  %s10216_s18, 2048, %s9693_s0, [#allocation4], %s9538_s16, %s9539_s26, %s9540_s13 }
 0x283   :  { %v2298_v35 = vpop.f32.mrf.mxu1 }
 0x284   :  { %v2299_v39 = vadd.f32 %v2298_v35, %v2258_v8 }
 0x285   :  { %v2300_v16 = vpop.f32.mrf.mxu1 }
 0x286   :  { %v2301_v43 = vadd.f32 %v2300_v16, %v2260_v38  ;;  %v9541_v16 = vmov 1966171168  }
 0x287   :  { %v2302_v36 = vpop.f32.mrf.mxu1 }
 0x288   :  { %v2475_v36 = vunpack.c.l.s4 %v9541_v16 }
 0x289   :  { %v2303_v37 = vpop.f32.mrf.mxu1 }
 0x28a   :  { %v2477_v37 = vlaneseq  ;;  %v2476_v38 = vunpack.c.0.s8 %v2475_v36 }
 0x2a2   :  { %v2339_v40 = vpop.f32.mrf.mxu0 }
 0x2a3   :  { %v2380_v41 = vpop.f32.mrf.mxu1  ;;  %v2340_v15 = vadd.f32 %v2339_v40, %v2299_v39  ;;  %v9820_v39 = vshrl.u32 %v2477_v37, 7 }
 0x2a4   :  { %v2341_v17 = vpop.f32.mrf.mxu0 }
 0x2a5   :  { %v2382_v45 = vpop.f32.mrf.mxu1  ;;  %v9808_v47 = vadd.f32 %v2380_v41, %v2340_v15  ;;  %v2342_v48 = vadd.f32 %v2341_v17, %v2301_v43  ;;  %v9823_v41 = vsub.s32 %v2476_v38, %v9820_v39 }
 0x2a6   :  { %v2343_v49 = vpop.f32.mrf.mxu0 }
 0x2a7   :  { %v2384_v50 = vpop.f32.mrf.mxu1  ;;  %v2399_v51 = vrot.slane %v9808_v47, 4  ;;  %v2413_v52 = vmul.f32 %v9808_v47, %v9808_v47  ;;  %v9813_v53 = vadd.f32 %v2382_v45, %v2342_v48  ;;  %v2480_v17 = vrot.slane %v2472_v31, %v9823_v41  ;;  %v2459_v49 = vld [vmem:[#allocation9] sm:$0xf] }
 0x2a8   :  { %v2344_v54 = vpop.f32.mrf.mxu0  ;;  %v9831_v50 = vsub.s32 0, %v9820_v39 }
 0x2a9   :  { %v2385_v55 = vpop.f32.mrf.mxu1  ;;  %v2400_v56 = vadd.f32 %v2399_v51, %v9808_v47  ;;  %v2427_v7 = vrot.slane %v2413_v52, 4  ;;  %v2405_v57 = vrot.slane %v9813_v53, 4  ;;  %v2414_v6 = vmul.f32 %v9813_v53, %v9813_v53 }
 0x2aa   :  { %v9838_v54 = vsub.s32 2, %v9820_v39  ;;  %v9841_v55 = vsub.s32 3, %v9820_v39 }
 0x2ab   :  { %v2401_v58 = vrot.slane %v2400_v56, 2  ;;  %v2428_v59 = vadd.f32 %v2427_v7, %v2413_v52  ;;  %v2406_v60 = vadd.f32 %v2405_v57, %v9813_v53  ;;  %v2433_v61 = vrot.slane %v2414_v6, 4 }
 0x2ac   :  { %v9835_v52 = vsub.s32 1, %v9820_v39 }
 0x2ad   :  { %v2402_v14 = vadd.f32 %v2401_v58, %v2400_v56  ;;  %v2429_v62 = vrot.slane %v2428_v59, 2  ;;  %v2407_v63 = vrot.slane %v2406_v60, 2  ;;  %v2434_v13 = vadd.f32 %v2433_v61, %v2414_v6 }
 0x2af   :  { %v2403_v0 = vrot.slane %v2402_v14, 1  ;;  %v2430_v2 = vadd.f32 %v2429_v62, %v2428_v59  ;;  %v2408_v3 = vadd.f32 %v2407_v63, %v2406_v60  ;;  %v2435_v4 = vrot.slane %v2434_v13, 2 }
 0x2b1   :  { %v2404_v5 = vadd.f32 %v2403_v0, %v2402_v14  ;;  %v2431_v9 = vrot.slane %v2430_v2, 1  ;;  %v2409_v11 = vrot.slane %v2408_v3, 1  ;;  %v2436_v18 = vadd.f32 %v2435_v4, %v2434_v13 }
 0x2b3   :  { %v2432_v19 = vadd.f32 %v2431_v9, %v2430_v2  ;;  %v2441_v20 = vmul.f32 0.125, %v2404_v5  ;;  %v2410_v21 = vadd.f32 %v2409_v11, %v2408_v3  ;;  %v2437_v22 = vrot.slane %v2436_v18, 1 }
 0x2b5   :  { %v2445_v23 = vmul.f32 0.125, %v2432_v19  ;;  %v2449_v24 = vmul.f32 %v2441_v20, %v2441_v20  ;;  %v2438_v25 = vadd.f32 %v2437_v22, %v2436_v18  ;;  %v2442_v26 = vmul.f32 0.125, %v2410_v21 }
 0x2b7   :  { %v2453_v27 = vsub.f32 %v2445_v23, %v2449_v24  ;;  %v2446_v28 = vmul.f32 0.125, %v2438_v25  ;;  %v2450_v32 = vmul.f32 %v2442_v26, %v2442_v26 }
 0x2b9   :  { %v2457_v8 = vmax.f32 %v2453_v27, 0.0  ;;  %v2454_v12 = vsub.f32 %v2446_v28, %v2450_v32 }
 0x2bb   :  { %v2462_v33 = vadd.f32 1e-05, %v2457_v8  ;;  %v2458_v34 = vmax.f32 %v2454_v12, 0.0 }
 0x2bd   :  { %v2463_v35 = vadd.f32 1e-05, %v2458_v34  ;;  %8367 = vrsqrt.f32 %v2462_v33 }
 0x2bf   :  { %8369 = vrsqrt.f32 %v2463_v35 }
 0x2ca   :  { %v8368_v40 = vpop.eup %8367 }
 0x2cc   :  { %v8370_v43 = vpop.eup %8369 }
 0x2cd   :  { %v2473_v15 = vcombine.low %v8368_v40, %v8370_v43 }
 0x2cf   :  { %v2487_v45 = vrot.slane %v2473_v15, %v9823_v41 }
 0x2d1   :  { %v2488_v48 = vcombine.low %v2480_v17, %v2487_v45 }
 0x2d3   :  { %v2495_v51 = vrot.slane %v2488_v48, %v9823_v41 }
 0x2d5   :  { %v2497_v29 = vmul.f32 %v2495_v51, %v2459_v49 }
 0x2d7   :  { %v2503_v30 = vrot.slane %v2497_v29, %v9831_v50  ;;  %v2507_v31 = vrot.slane %v2497_v29, %v9835_v52  ;;  %v2511_v56 = vrot.slane %v2497_v29, %v9838_v54  ;;  %v2515_v7 = vrot.slane %v2497_v29, %v9841_v55 }
 0x2d9   :  { %v2520_v57 = vmul.f32 %v2503_v30, %v9784_v1  ;;  %v2521_v6 = vmul.f32 %v2507_v31, %v9788_v10  ;;  %v2522_v58 = vmul.f32 %v2511_v56, %v2441_v20  ;;  %v2523_v59 = vmul.f32 %v2515_v7, %v2442_v26  ;;  %v2498_v1 = vld [vmem:[#allocation18] sm:$0xf] }
 0x2da   :  { %v2554_v60 = vmul.f32 %v2503_v30, %v9772_v42  ;;  %v2555_v61 = vmul.f32 %v2507_v31, %v9777_v44  ;;  %v2556_v14 = vmul.f32 %v2511_v56, %v9808_v47  ;;  %v2557_v62 = vmul.f32 %v2515_v7, %v9813_v53 }
 0x2db   :  { %v2528_v63 = vcombine.low %v2520_v57, %v2521_v6  ;;  %v2529_v13 = vcombine.low %v2522_v58, %v2523_v59 }
 0x2dd   :  { %v2536_v0 = vrot.slane %v2528_v63, %v9823_v41  ;;  %v2543_v2 = vrot.slane %v2529_v13, %v9823_v41 }
 0x2df   :  { %v2544_v3 = vcombine.low %v2536_v0, %v2543_v2 }
 0x2e1   :  { %v2551_v10 = vrot.slane %v2544_v3, %v9823_v41 }
 0x2e3   :  { %v2553_v4 = vsub.f32 %v2498_v1, %v2551_v10 }
 0x2e5   :  { %v2562_v5 = vrot.slane %v2553_v4, %v9831_v50  ;;  %v2566_v42 = vrot.slane %v2553_v4, %v9835_v52  ;;  %v2570_v44 = vrot.slane %v2553_v4, %v9838_v54  ;;  %v2574_v47 = vrot.slane %v2553_v4, %v9841_v55 }
 0x2e7   :  { %v2579_v53 = vadd.f32 %v2562_v5, %v2554_v60  ;;  %v2580_v9 = vadd.f32 %v2566_v42, %v2555_v61  ;;  %v2581_v11 = vadd.f32 %v2570_v44, %v2556_v14  ;;  %v2582_v18 = vadd.f32 %v2574_v47, %v2557_v62 }
 0x2e9   :  { %8371 = vtanh.f32 %v2579_v53 }
 0x2ea   :  { %8373 = vtanh.f32 %v2580_v9 }
 0x2eb   :  { %8375 = vtanh.f32 %v2581_v11 }
 0x2ec   :  { %8377 = vtanh.f32 %v2582_v18 }
 0x2f6   :  { %v9860_v19 = vpop.eup %8371 }
 0x2f7   :  { %v8374_v20 = vpop.eup %8373  ;;  %v2587_v21 = vpack.c.bf16 %v9860_v19, %v9860_v19 }
 0x2f8   :  { %v9864_v22 = vpop.eup %8375  ;;  %v2588_v23 = vpack.c.bf16 %v8374_v20, %v8374_v20 }
 0x2f9   :  { %v8378_v24 = vpop.eup %8377  ;;  %v2589_v25 = vpack.c.bf16 %v9864_v22, %v9864_v22 }
 0x2fa   :  { %v2590_v26 = vpack.c.bf16 %v8378_v24, %v8378_v24 }
 0x2fb   :  { %9505 = dma.done.wait [#allocation4 + $0x1], 8192 }
 0x2fc   :  { %9506 = vsyncadd [#allocation4 + $0x1], 4294959104  ;;  %3016 = vmatprep.mubr.bf16.mxu0 %v2588_v23  ;;  %3057 = vmatprep.mubr.bf16.mxu1 %v2590_v26  ;;  %v8379_v27 = vld [vmem:[#allocation3 + $0x1fc] ss:$36 sps:$4 sm:$0xff]   ;;  %v8385_v12 = vld [vmem:[#allocation3 + $0x1b4] ss:$36 sps:$4 sm:$0xff]  }
 0x2fd   :  { %v8381_v28 = vld [vmem:[#allocation3 + $0x67c] ss:$36 sps:$4 sm:$0xff]   ;;  %2984 = vmatprep.subr.bf16.mxu0 %v8379_v27  ;;  %v8387_v33 = vld [vmem:[#allocation3 + $0x634] ss:$36 sps:$4 sm:$0xff]   ;;  %v8391_v16 = vld [vmem:[#allocation3 + $0x16c] ss:$36 sps:$4 sm:$0xff]  }
 0x2fe   :  { %v8383_v32 = vld [vmem:[#allocation3 + $0x1f8] ss:$36 sps:$4 sm:$0xff]   ;;  %3025 = vmatprep.subr.bf16.mxu1 %v8381_v28  ;;  %v8389_v34 = vld [vmem:[#allocation3 + $0x1b0] ss:$36 sps:$4 sm:$0xff]   ;;  %v8395_v37 = vld [vmem:[#allocation3 + $0x168] ss:$36 sps:$4 sm:$0xff]  }
 0x2ff   :  { %v8384_v8 = vld [vmem:[#allocation3 + $0x678] ss:$36 sps:$4 sm:$0xff]   ;;  %2985 = vmatpush1.bf16.msra.mxu0 %v8383_v32  ;;  %v8390_v35 = vld [vmem:[#allocation3 + $0x630] ss:$36 sps:$4 sm:$0xff]   ;;  %v8396_v38 = vld [vmem:[#allocation3 + $0x5e8] ss:$36 sps:$4 sm:$0xff]  }
 0x300   :  { %3026 = vmatpush1.bf16.msra.mxu1 %v8384_v8  ;;  %2986 = vmatprep.subr.bf16.mxu0 %v8385_v12  ;;  %v8393_v36 = vld [vmem:[#allocation3 + $0x5ec] ss:$36 sps:$4 sm:$0xff]   ;;  %v8397_v40 = vld [vmem:[#allocation3 + $0x124] ss:$36 sps:$4 sm:$0xff]   ;;  %v8403_v45 = vld [vmem:[#allocation3 + $0xdc] ss:$36 sps:$4 sm:$0xff]  }
 0x301   :  { %3027 = vmatprep.subr.bf16.mxu1 %v8387_v33  ;;  %v8399_v43 = vld [vmem:[#allocation3 + $0x5a4] ss:$36 sps:$4 sm:$0xff]   ;;  %v8405_v48 = vld [vmem:[#allocation3 + $0x55c] ss:$36 sps:$4 sm:$0xff]   ;;  %v8409_v29 = vld [vmem:[#allocation3 + $0x94] ss:$36 sps:$4 sm:$0xff]  }
 0x302   :  { %v8401_v15 = vld [vmem:[#allocation3 + $0x120] ss:$36 sps:$4 sm:$0xff]   ;;  %v8407_v49 = vld [vmem:[#allocation3 + $0xd8] ss:$36 sps:$4 sm:$0xff]   ;;  %v8413_v31 = vld [vmem:[#allocation3 + $0x90] ss:$36 sps:$4 sm:$0xff]  }
 0x303   :  { %2987 = vmatpush1.bf16.msra.mxu0 %v8389_v34  ;;  %v8402_v17 = vld [vmem:[#allocation3 + $0x5a0] ss:$36 sps:$4 sm:$0xff]   ;;  %v8408_v51 = vld [vmem:[#allocation3 + $0x558] ss:$36 sps:$4 sm:$0xff]   ;;  %v8414_v56 = vld [vmem:[#allocation3 + $0x510] ss:$36 sps:$4 sm:$0xff]  }
 0x304   :  { %3028 = vmatpush1.bf16.msra.mxu1 %v8390_v35  ;;  %2988 = vmatprep.subr.bf16.mxu0 %v8391_v16  ;;  %v8411_v30 = vld [vmem:[#allocation3 + $0x514] ss:$36 sps:$4 sm:$0xff]   ;;  %v8415_v7 = vld [vmem:[#allocation3 + $0x4c] ss:$36 sps:$4 sm:$0xff]   ;;  %v8421_v59 = vld [vmem:[#allocation3 + $0x4] ss:$36 sps:$4 sm:$0xff]  }
 0x305   :  { %3029 = vmatprep.subr.bf16.mxu1 %v8393_v36  ;;  %v8417_v57 = vld [vmem:[#allocation3 + $0x4cc] ss:$36 sps:$4 sm:$0xff]   ;;  %v8423_v60 = vld [vmem:[#allocation3 + $0x484] ss:$36 sps:$4 sm:$0xff]   ;;  %v8427_v62 = vld [vmem:[#allocation3 + $0x43c] ss:$36 sps:$4 sm:$0xff]  }
 0x306   :  { %v8419_v6 = vld [vmem:[#allocation3 + $0x48] ss:$36 sps:$4 sm:$0xff]   ;;  %v8425_v61 = vld [vmem:[#allocation3] ss:$36 sps:$4 sm:$0xff]   ;;  %v8431_v13 = vld [vmem:[#allocation3 + $0x438] ss:$36 sps:$4 sm:$0xff]  }
 0x307   :  { %2989 = vmatpush1.bf16.msra.mxu0 %v8395_v37  ;;  %v8420_v58 = vld [vmem:[#allocation3 + $0x4c8] ss:$36 sps:$4 sm:$0xff]   ;;  %v8426_v14 = vld [vmem:[#allocation3 + $0x480] ss:$36 sps:$4 sm:$0xff]   ;;  %v8432_v0 = vld [vmem:[#allocation3 + $0x8b8] ss:$36 sps:$4 sm:$0xff]  }
 0x308   :  { %3030 = vmatpush1.bf16.msra.mxu1 %v8396_v38  ;;  %2990 = vmatprep.subr.bf16.mxu0 %v8397_v40  ;;  %v8429_v63 = vld [vmem:[#allocation3 + $0x8bc] ss:$36 sps:$4 sm:$0xff]   ;;  %v8433_v2 = vld [vmem:[#allocation3 + $0x3f4] ss:$36 sps:$4 sm:$0xff]   ;;  %v8439_v4 = vld [vmem:[#allocation3 + $0x3ac] ss:$36 sps:$4 sm:$0xff]  }
 0x309   :  { %3031 = vmatprep.subr.bf16.mxu1 %v8399_v43  ;;  %v8435_v3 = vld [vmem:[#allocation3 + $0x874] ss:$36 sps:$4 sm:$0xff]   ;;  %v8441_v5 = vld [vmem:[#allocation3 + $0x82c] ss:$36 sps:$4 sm:$0xff]   ;;  %v8445_v47 = vld [vmem:[#allocation3 + $0x364] ss:$36 sps:$4 sm:$0xff]  }
 0x30a   :  { %v8437_v1 = vld [vmem:[#allocation3 + $0x3f0] ss:$36 sps:$4 sm:$0xff]   ;;  %v8443_v42 = vld [vmem:[#allocation3 + $0x3a8] ss:$36 sps:$4 sm:$0xff]   ;;  %v8451_v9 = vld [vmem:[#allocation3 + $0x31c] ss:$36 sps:$4 sm:$0xff]  }
 0x30b   :  { %2991 = vmatpush1.bf16.msra.mxu0 %v8401_v15  ;;  %v8438_v10 = vld [vmem:[#allocation3 + $0x870] ss:$36 sps:$4 sm:$0xff]   ;;  %v8444_v44 = vld [vmem:[#allocation3 + $0x828] ss:$36 sps:$4 sm:$0xff]   ;;  %v8453_v11 = vld [vmem:[#allocation3 + $0x79c] ss:$36 sps:$4 sm:$0xff]  }
 0x30c   :  { %3032 = vmatpush1.bf16.msra.mxu1 %v8402_v17  ;;  %2992 = vmatprep.subr.bf16.mxu0 %v8403_v45  ;;  %v8447_v53 = vld [vmem:[#allocation3 + $0x7e4] ss:$36 sps:$4 sm:$0xff]   ;;  %v8457_v18 = vld [vmem:[#allocation3 + $0x2d4] ss:$36 sps:$4 sm:$0xff]   ;;  %v8463_v23 = vld [vmem:[#allocation3 + $0x28c] ss:$36 sps:$4 sm:$0xff]  }
 0x30d   :  { %3033 = vmatprep.subr.bf16.mxu1 %v8405_v48  ;;  %v8459_v20 = vld [vmem:[#allocation3 + $0x754] ss:$36 sps:$4 sm:$0xff]   ;;  %v8465_v24 = vld [vmem:[#allocation3 + $0x70c] ss:$36 sps:$4 sm:$0xff]   ;;  %v8469_v26 = vld [vmem:[#allocation3 + $0x244] ss:$36 sps:$4 sm:$0xff]  }
 0x30e   :  { %v8471_v27 = vld [vmem:[#allocation3 + $0x6c4] ss:$36 sps:$4 sm:$0xff]   ;;  %s9397_s3 = scalar_lea.vmem %s9695_s12, 2048 }
 0x30f   :  { %2993 = vmatpush1.bf16.msra.mxu0 %v8407_v49  ;;  %p9398_p9 = scmp.ne.s32.totalorder %s9695_s12, %s9397_s3  ;;  %p9403_p11 = scmp.lt.s32.totalorder %s9716_s14, %s9397_s3 }
 0x310   :  { %3034 = vmatpush1.bf16.msra.mxu1 %v8408_v51  ;;  %2994 = vmatprep.subr.bf16.mxu0 %v8409_v29 }
 0x311   :  { %3035 = vmatprep.subr.bf16.mxu1 %v8411_v30  ;;  %p9404_p12 = por %p9403_p11, %p9362_p1 }
 0x313   :  { %2995 = vmatpush1.bf16.msra.mxu0 %v8413_v31  ;;  %p9405_p13 = pnand %p9404_p12, %p9398_p9 }
 0x314   :  { %3036 = vmatpush1.bf16.msra.mxu1 %v8414_v56  ;;  %2996 = vmatprep.subr.bf16.mxu0 %v8415_v7 }
 0x315   :  { %3037 = vmatprep.subr.bf16.mxu1 %v8417_v57 }
 0x317   :  { %2997 = vmatpush1.bf16.msra.mxu0 %v8419_v6 }
 0x318   :  { %3038 = vmatpush1.bf16.msra.mxu1 %v8420_v58  ;;  %2998 = vmatprep.subr.bf16.mxu0 %v8421_v59 }
 0x319   :  { %3039 = vmatprep.subr.bf16.mxu1 %v8423_v60 }
 0x31b   :  { %2999 = vmatpush1.bf16.msra.mxu0 %v8425_v61 }
 0x31c   :  { %3040 = vmatpush1.bf16.msra.mxu1 %v8426_v14  ;;  %3000 = vmatprep.subr.bf16.mxu0 %v8427_v62 }
 0x31d   :  { %3041 = vmatprep.subr.bf16.mxu1 %v8429_v63 }
 0x31f   :  { %3001 = vmatpush2.bf16.msra.mxu0 %v8431_v13 }
 0x320   :  { %3042 = vmatpush2.bf16.msra.mxu1 %v8432_v0  ;;  %3002 = vmatprep.subr.bf16.mxu0 %v8433_v2 }
 0x321   :  { %3043 = vmatprep.subr.bf16.mxu1 %v8435_v3 }
 0x323   :  { %3003 = vmatpush2.bf16.msra.mxu0 %v8437_v1 }
 0x324   :  { %3044 = vmatpush2.bf16.msra.mxu1 %v8438_v10  ;;  %3004 = vmatprep.subr.bf16.mxu0 %v8439_v4 }
 0x325   :  { %3045 = vmatprep.subr.bf16.mxu1 %v8441_v5 }
 0x326   :  { %9408 = shalt.err (!%p9405_p13)  }
 0x327   :  { %s10217_s29 = sld [smem:[#allocation61_spill]]  ;;  %3005 = vmatpush2.bf16.msra.mxu0 %v8443_v42 }
 0x328   :  { %3046 = vmatpush2.bf16.msra.mxu1 %v8444_v44  ;;  %3006 = vmatprep.subr.bf16.mxu0 %v8445_v47 }
 0x329   :  { %3047 = vmatprep.subr.bf16.mxu1 %v8447_v53 }
 0x32d   :  { %3182 = dma.hbm_to_vmem [thread:$0]  %s10217_s29, 2048, %s9695_s12, [#allocation4 + $0x1], %s9534_s23, %s9535_s1, %s9536_s24 }
 0x32e   :  { %v8449_v28 = vld [vmem:[#allocation3 + $0x360] ss:$36 sps:$4 sm:$0xff]   ;;  %v8455_v8 = vld [vmem:[#allocation3 + $0x318] ss:$36 sps:$4 sm:$0xff]   ;;  %v8461_v33 = vld [vmem:[#allocation3 + $0x2d0] ss:$36 sps:$4 sm:$0xff]  }
 0x32f   :  { %v8450_v32 = vld [vmem:[#allocation3 + $0x7e0] ss:$36 sps:$4 sm:$0xff]   ;;  %3007 = vmatpush2.bf16.msra.mxu0 %v8449_v28  ;;  %v8456_v12 = vld [vmem:[#allocation3 + $0x798] ss:$36 sps:$4 sm:$0xff]   ;;  %v8462_v34 = vld [vmem:[#allocation3 + $0x750] ss:$36 sps:$4 sm:$0xff]  }
 0x330   :  { %3048 = vmatpush2.bf16.msra.mxu1 %v8450_v32  ;;  %3008 = vmatprep.subr.bf16.mxu0 %v8451_v9  ;;  %v8467_v35 = vld [vmem:[#allocation3 + $0x288] ss:$36 sps:$4 sm:$0xff]   ;;  %v8473_v36 = vld [vmem:[#allocation3 + $0x240] ss:$36 sps:$4 sm:$0xff]  }
 0x331   :  { %3049 = vmatprep.subr.bf16.mxu1 %v8453_v11  ;;  %v8468_v16 = vld [vmem:[#allocation3 + $0x708] ss:$36 sps:$4 sm:$0xff]   ;;  %v8474_v37 = vld [vmem:[#allocation3 + $0x6c0] ss:$36 sps:$4 sm:$0xff]  }
 0x333   :  { %3009 = vmatpush2.bf16.msra.mxu0 %v8455_v8 }
 0x334   :  { %3050 = vmatpush2.bf16.msra.mxu1 %v8456_v12  ;;  %3010 = vmatprep.subr.bf16.mxu0 %v8457_v18 }
 0x335   :  { %3051 = vmatprep.subr.bf16.mxu1 %v8459_v20 }
 0x337   :  { %3011 = vmatpush2.bf16.msra.mxu0 %v8461_v33 }
 0x338   :  { %3052 = vmatpush2.bf16.msra.mxu1 %v8462_v34  ;;  %3012 = vmatprep.subr.bf16.mxu0 %v8463_v23  ;;  %v3102_v34 = vld [vmem:[#allocation11] sm:$0x3] }
 0x339   :  { %3053 = vmatprep.subr.bf16.mxu1 %v8465_v24 }
 0x33b   :  { %3013 = vmatpush2.bf16.msra.mxu0 %v8467_v35 }
 0x33c   :  { %3054 = vmatpush2.bf16.msra.mxu1 %v8468_v16  ;;  %3014 = vmatprep.subr.bf16.mxu0 %v8469_v26 }
 0x33d   :  { %3055 = vmatprep.subr.bf16.mxu1 %v8471_v27 }
 0x33f   :  { %3015 = vmatpush2.bf16.msra.mxu0 %v8473_v36 }
 0x340   :  { %3056 = vmatpush2.bf16.msra.mxu1 %v8474_v37 }
 0x342   :  { %3017 = vmatmul.mubr.bf16.vlgmr.msra.gmra.mxu0 %v2587_v21 }
 0x343   :  { %3058 = vmatmul.mubr.bf16.vlgmr.msra.gmra.mxu1 %v2589_v25 }
 0x402   :  { %v3018_v38 = vpop.f32.mrf.mxu0 }
 0x403   :  { %v3059_v40 = vpop.f32.mrf.mxu1 }
 0x404   :  { %v9887_v43 = vadd.f32 %v3059_v40, %v3018_v38  ;;  %v3020_v15 = vpop.f32.mrf.mxu0 }
 0x405   :  { %v3061_v17 = vpop.f32.mrf.mxu1 }
 0x406   :  { %v3066_v45 = vrot.slane %v9887_v43, 4  ;;  %v3078_v48 = vmul.f32 %v9887_v43, %v9887_v43  ;;  %v3062_v49 = vadd.f32 %v3061_v17, %v3020_v15  ;;  %v3022_v51 = vpop.f32.mrf.mxu0 }
 0x407   :  { %v3063_v29 = vpop.f32.mrf.mxu1 }
 0x408   :  { %v3067_v19 = vadd.f32 %v3066_v45, %v9887_v43  ;;  %v3080_v21 = vrot.slane %v3078_v48, 4  ;;  %v3072_v30 = vrot.slane %v3062_v49, 4  ;;  %v3079_v22 = vmul.f32 %v3062_v49, %v3062_v49  ;;  %v3023_v25 = vpop.f32.mrf.mxu0  ;;  %v3126_v45 = vld [vmem:[#allocation20] sm:$0x3] }
 0x409   :  { %v3064_v31 = vpop.f32.mrf.mxu1 }
 0x40a   :  { %v3068_v56 = vrot.slane %v3067_v19, 2  ;;  %v3081_v7 = vadd.f32 %v3080_v21, %v3078_v48  ;;  %v3073_v57 = vadd.f32 %v3072_v30, %v3062_v49  ;;  %v3086_v6 = vrot.slane %v3079_v22, 4 }
 0x40c   :  { %v3069_v58 = vadd.f32 %v3068_v56, %v3067_v19  ;;  %v3082_v59 = vrot.slane %v3081_v7, 2  ;;  %v3074_v60 = vrot.slane %v3073_v57, 2  ;;  %v3087_v61 = vadd.f32 %v3086_v6, %v3079_v22 }
 0x40e   :  { %v3070_v14 = vrot.slane %v3069_v58, 1  ;;  %v3083_v62 = vadd.f32 %v3082_v59, %v3081_v7  ;;  %v3075_v63 = vadd.f32 %v3074_v60, %v3073_v57  ;;  %v3088_v13 = vrot.slane %v3087_v61, 2 }
 0x410   :  { %v3071_v0 = vadd.f32 %v3070_v14, %v3069_v58  ;;  %v3084_v2 = vrot.slane %v3083_v62, 1  ;;  %v3076_v3 = vrot.slane %v3075_v63, 1  ;;  %v3089_v1 = vadd.f32 %v3088_v13, %v3087_v61 }
 0x412   :  { %v3085_v10 = vadd.f32 %v3084_v2, %v3083_v62  ;;  %v3092_v4 = vmul.f32 0.125, %v3071_v0  ;;  %v3077_v5 = vadd.f32 %v3076_v3, %v3075_v63  ;;  %v3090_v42 = vrot.slane %v3089_v1, 1 }
 0x414   :  { %v3094_v44 = vmul.f32 0.125, %v3085_v10  ;;  %v3096_v47 = vmul.f32 %v3092_v4, %v3092_v4  ;;  %v3091_v53 = vadd.f32 %v3090_v42, %v3089_v1  ;;  %v3093_v9 = vmul.f32 0.125, %v3077_v5 }
 0x416   :  { %v3098_v11 = vsub.f32 %v3094_v44, %v3096_v47  ;;  %v3095_v18 = vmul.f32 0.125, %v3091_v53  ;;  %v3097_v20 = vmul.f32 %v3093_v9, %v3093_v9 }
 0x418   :  { %v3100_v23 = vmax.f32 %v3098_v11, 0.0  ;;  %v3099_v24 = vsub.f32 %v3095_v18, %v3097_v20 }
 0x41a   :  { %v3103_v26 = vadd.f32 1e-05, %v3100_v23  ;;  %v3101_v27 = vmax.f32 %v3099_v24, 0.0 }
 0x41c   :  { %v3104_v28 = vadd.f32 1e-05, %v3101_v27  ;;  %8475 = vrsqrt.f32 %v3103_v26 }
 0x41e   :  { %8477 = vrsqrt.f32 %v3104_v28 }
 0x429   :  { %v8476_v32 = vpop.eup %8475 }
 0x42b   :  { %v8478_v8 = vpop.eup %8477 }
 0x42c   :  { %v3109_v12 = vcombine.low %v8476_v32, %v8478_v8 }
 0x42e   :  { %v3116_v33 = vrot.slane %v3109_v12, %v9823_v41 }
 0x430   :  { %v3123_v35 = vrot.slane %v3116_v33, %v9823_v41 }
 0x432   :  { %v3125_v16 = vmul.f32 %v3123_v35, %v3102_v34 }
 0x434   :  { %v3131_v36 = vrot.slane %v3125_v16, %v9831_v50  ;;  %v3135_v37 = vrot.slane %v3125_v16, %v9835_v52 }
 0x436   :  { %v3138_v38 = vmul.f32 %v3131_v36, %v3092_v4  ;;  %v3139_v40 = vmul.f32 %v3135_v37, %v3093_v9  ;;  %v3159_v29 = vmul.f32 %v3131_v36, %v9887_v43  ;;  %v3160_v19 = vmul.f32 %v3135_v37, %v3062_v49 }
 0x438   :  { %v3142_v15 = vcombine.low %v3138_v38, %v3139_v40 }
 0x43a   :  { %v3149_v17 = vrot.slane %v3142_v15, %v9823_v41 }
 0x43c   :  { %v3156_v48 = vrot.slane %v3149_v17, %v9823_v41 }
 0x43e   :  { %v3158_v51 = vsub.f32 %v3126_v45, %v3156_v48 }
 0x440   :  { %v3165_v21 = vrot.slane %v3158_v51, %v9831_v50  ;;  %v3169_v30 = vrot.slane %v3158_v51, %v9835_v52 }
 0x442   :  { %v3172_v22 = vadd.f32 %v3165_v21, %v3159_v29  ;;  %v3173_v25 = vadd.f32 %v3169_v30, %v3160_v19 }
 0x444   :  { %8479 = vtanh.f32 %v3172_v22 }
 0x445   :  { %8481 = vtanh.f32 %v3173_v25 }
 0x451   :  { %v8480_v31 = vpop.eup %8479 }
 0x452   :  { %v8482_v56 = vpop.eup %8481  ;;  %v3176_v7 = vpack.c.bf16 %v8480_v31, %v8480_v31 }
 0x453   :  { %v3177_v57 = vpack.c.bf16 %v8482_v56, %v8482_v56 }
 0x454   :  { %9507 = dma.done.wait [#allocation4], 2048 }
 0x455   :  { %9508 = vsyncadd [#allocation4], 4294965248  ;;  %3347 = vmatprep.mubr.bf16.mxu0 %v3177_v57  ;;  %v8483_v6 = vld [vmem:[#allocation2 + $0x1e0] ss:$16 sps:$4 sm:$0xff]   ;;  %s9417_s17 = scalar_lea.vmem %s9693_s0, 8192 }
 0x456   :  { %v8484_v58 = vld [vmem:[#allocation2 + $0xe0] ss:$16 sps:$4 sm:$0xff]   ;;  %7840 = vmatprep.subr.bf16.mxu0 %v8483_v6  ;;  %p9418_p0 = scmp.ne.s32.totalorder %s9693_s0, %s9417_s17  ;;  %p9423_p2 = scmp.lt.s32.totalorder %s9698_s19, %s9417_s17 }
 0x457   :  { %v8485_v43 = vld [vmem:[#allocation2 + $0x1c0] ss:$16 sps:$4 sm:$0xff]   ;;  %7841 = vmatpush3.bf16.msra.mxu0 %v8484_v58 }
 0x458   :  { %v8486_v49 = vld [vmem:[#allocation2 + $0xc0] ss:$16 sps:$4 sm:$0xff]   ;;  %7842 = vmatprep.subr.bf16.mxu0 %v8485_v43  ;;  %p9424_p3 = por %p9423_p2, %p9342_p10 }
 0x459   :  { %v8487_v59 = vld [vmem:[#allocation2 + $0x1a0] ss:$16 sps:$4 sm:$0xff]  }
 0x45a   :  { %v8488_v60 = vld [vmem:[#allocation2 + $0xa0] ss:$16 sps:$4 sm:$0xff]   ;;  %p9425_p4 = pnand %p9424_p3, %p9418_p0 }
 0x45b   :  { %7843 = vmatpush3.bf16.msra.mxu0 %v8486_v49  ;;  %v8489_v61 = vld [vmem:[#allocation2 + $0x180] ss:$16 sps:$4 sm:$0xff]  }
 0x45c   :  { %7844 = vmatprep.subr.bf16.mxu0 %v8487_v59  ;;  %v8490_v14 = vld [vmem:[#allocation2 + $0x80] ss:$16 sps:$4 sm:$0xff]  }
 0x45d   :  { %v8491_v62 = vld [vmem:[#allocation2 + $0x160] ss:$16 sps:$4 sm:$0xff]  }
 0x45e   :  { %v8492_v63 = vld [vmem:[#allocation2 + $0x60] ss:$16 sps:$4 sm:$0xff]  }
 0x45f   :  { %7845 = vmatpush3.bf16.msra.mxu0 %v8488_v60  ;;  %v8493_v13 = vld [vmem:[#allocation2 + $0x140] ss:$16 sps:$4 sm:$0xff]  }
 0x460   :  { %7846 = vmatprep.subr.bf16.mxu0 %v8489_v61  ;;  %v8494_v0 = vld [vmem:[#allocation2 + $0x40] ss:$16 sps:$4 sm:$0xff]  }
 0x461   :  { %v8495_v2 = vld [vmem:[#allocation2 + $0x120] ss:$16 sps:$4 sm:$0xff]  }
 0x462   :  { %v8496_v3 = vld [vmem:[#allocation2 + $0x20] ss:$16 sps:$4 sm:$0xff]  }
 0x463   :  { %v8497_v1 = vld [vmem:[#allocation2 + $0x100] ss:$16 sps:$4 sm:$0xff]   ;;  %7847 = vmatpush3.bf16.msra.mxu0 %v8490_v14 }
 0x464   :  { %v8498_v10 = vld [vmem:[#allocation2] ss:$16 sps:$4 sm:$0xff]   ;;  %7848 = vmatprep.subr.bf16.mxu0 %v8491_v62 }
 0x465   :  { %9428 = shalt.err (!%p9425_p4)  }
 0x466   :  { %3407 = dma.hbm_to_vmem [thread:$0]  %s10191_s6, 8192, %s9693_s0, [#allocation4]  ;;  %v3373_v38 = vld [vmem:[#allocation12] sm:$0x1]  ;;  %v3377_v17 = vld [vmem:[#allocation21] sm:$0x1] }
 0x467   :  { %7849 = vmatpush3.bf16.msra.mxu0 %v8492_v63 }
 0x468   :  { %7850 = vmatprep.subr.bf16.mxu0 %v8493_v13 }
 0x46b   :  { %7851 = vmatpush3.bf16.msra.mxu0 %v8494_v0 }
 0x46c   :  { %7852 = vmatprep.subr.bf16.mxu0 %v8495_v2 }
 0x46f   :  { %7853 = vmatpush3.bf16.msra.mxu0 %v8496_v3 }
 0x470   :  { %7854 = vmatprep.subr.bf16.mxu0 %v8497_v1 }
 0x473   :  { %7855 = vmatpush3.bf16.msra.mxu0 %v8498_v10 }
 0x476   :  { %3348 = vmatmul.mubr.bf16.vlgmr.msra.gmra.mxu0 %v3176_v7 }
 0x536   :  { %v7856_v4 = vpop.f32.mrf.mxu0 }
 0x538   :  { %v7857_v5 = vpop.f32.mrf.mxu0 }
 0x539   :  { %v7858_v42 = vadd.f32 %v7857_v5, %v7856_v4 }
 0x53a   :  { %v7859_v44 = vpop.f32.mrf.mxu0 }
 0x53b   :  { %v3355_v47 = vrot.slane %v7858_v42, 4  ;;  %v3361_v53 = vmul.f32 %v7858_v42, %v7858_v42 }
 0x53c   :  { %v7860_v9 = vpop.f32.mrf.mxu0 }
 0x53d   :  { %v3356_v11 = vadd.f32 %v7858_v42, %v3355_v47  ;;  %v3362_v18 = vrot.slane %v3361_v53, 4 }
 0x53f   :  { %v3357_v20 = vrot.slane %v3356_v11, 2  ;;  %v3363_v23 = vadd.f32 %v3362_v18, %v3361_v53 }
 0x541   :  { %v3358_v24 = vadd.f32 %v3357_v20, %v3356_v11  ;;  %v3364_v26 = vrot.slane %v3363_v23, 2 }
 0x543   :  { %v3359_v27 = vrot.slane %v3358_v24, 1  ;;  %v3365_v28 = vadd.f32 %v3364_v26, %v3363_v23 }
 0x545   :  { %v3360_v32 = vadd.f32 %v3359_v27, %v3358_v24  ;;  %v3366_v8 = vrot.slane %v3365_v28, 1 }
 0x547   :  { %v3367_v12 = vadd.f32 %v3366_v8, %v3365_v28  ;;  %v3368_v33 = vmul.f32 0.125, %v3360_v32 }
 0x549   :  { %v3369_v34 = vmul.f32 0.125, %v3367_v12  ;;  %v3370_v35 = vmul.f32 %v3368_v33, %v3368_v33 }
 0x54b   :  { %v3371_v16 = vsub.f32 %v3369_v34, %v3370_v35 }
 0x54d   :  { %v3372_v36 = vmax.f32 %v3371_v16, 0.0 }
 0x54f   :  { %v3374_v37 = vadd.f32 1e-05, %v3372_v36 }
 0x551   :  { %8499 = vrsqrt.f32 %v3374_v37 }
 0x55e   :  { %v8500_v40 = vpop.eup %8499 }
 0x55f   :  { %v3376_v15 = vmul.f32 %v8500_v40, %v3373_v38 }
 0x561   :  { %v3378_v45 = vmul.f32 %v3376_v15, %v3368_v33  ;;  %v3384_v48 = vrot.slane %v3376_v15, %v9831_v50 }
 0x563   :  { %v3379_v51 = vsub.f32 %v3377_v17, %v3378_v45  ;;  %v3386_v29 = vmul.f32 %v7858_v42, %v3384_v48 }
 0x565   :  { %v3391_v19 = vrot.slane %v3379_v51, %v9831_v50 }
 0x567   :  { %v3393_v21 = vadd.f32 %v3391_v19, %v3386_v29 }
 0x569   :  { %8501 = vtanh.f32 %v3393_v21 }
 0x576   :  { %v8502_v30 = vpop.eup %8501 }
 0x577   :  { %3395 = vst [vmem:[#allocation27] sm:$0xff] %v8502_v30  ;;  %v3396_v22 = vpack.c.bf16 %v8502_v30, %v8502_v30 }
 0x578   :  { %9509 = dma.done.wait [#allocation4 + $0x1], 2048 }
 0x579   :  { %9510 = vsyncadd [#allocation4 + $0x1], 4294965248  ;;  %3540 = vmatprep.mubr.bf16.mxu1 %v9537_v46  ;;  %v8503_v25 = vld [vmem:[#allocation3 + $0x1fc] ss:$36 sps:$4 sm:$0xff]   ;;  %v8506_v56 = vld [vmem:[#allocation3 + $0x1b4] ss:$36 sps:$4 sm:$0xff]   ;;  %p9438_p10 = scmp.ne.s32.totalorder %s9695_s12, %s9716_s14  ;;  %p9443_p5 = scmp.lt.s32.totalorder %s9716_s14, %s9716_s14 }
 0x57a   :  { %v8505_v31 = vld [vmem:[#allocation3 + $0x1f8] ss:$36 sps:$4 sm:$0xff]   ;;  %3508 = vmatprep.subr.bf16.mxu1 %v8503_v25  ;;  %v8508_v7 = vld [vmem:[#allocation3 + $0x1b0] ss:$36 sps:$4 sm:$0xff]   ;;  %v8511_v6 = vld [vmem:[#allocation3 + $0x168] ss:$36 sps:$4 sm:$0xff]  }
 0x57b   :  { %3509 = vmatpush1.bf16.msra.mxu1 %v8505_v31  ;;  %v8509_v57 = vld [vmem:[#allocation3 + $0x16c] ss:$36 sps:$4 sm:$0xff]   ;;  %v8512_v58 = vld [vmem:[#allocation3 + $0x124] ss:$36 sps:$4 sm:$0xff]   ;;  %v8515_v43 = vld [vmem:[#allocation3 + $0xdc] ss:$36 sps:$4 sm:$0xff]   ;;  %p9444_p6 = por %p9443_p5, %p9362_p1 }
 0x57c   :  { %3510 = vmatprep.subr.bf16.mxu1 %v8506_v56  ;;  %v8518_v49 = vld [vmem:[#allocation3 + $0x94] ss:$36 sps:$4 sm:$0xff]   ;;  %v8521_v46 = vld [vmem:[#allocation3 + $0x4c] ss:$36 sps:$4 sm:$0xff]   ;;  %v8524_v59 = vld [vmem:[#allocation3 + $0x4] ss:$36 sps:$4 sm:$0xff]  }
 0x57d   :  { %v8514_v60 = vld [vmem:[#allocation3 + $0x120] ss:$36 sps:$4 sm:$0xff]   ;;  %p9445_p7 = pnand %p9444_p6, %p9438_p10 }
 0x57f   :  { %3511 = vmatpush1.bf16.msra.mxu1 %v8508_v7 }
 0x580   :  { %3512 = vmatprep.subr.bf16.mxu1 %v8509_v57 }
 0x583   :  { %3513 = vmatpush1.bf16.msra.mxu1 %v8511_v6 }
 0x584   :  { %9448 = shalt.err (!%p9445_p7)  }
 0x585   :  { %3676 = dma.hbm_to_vmem [thread:$0]  %s10192_s7, 36864, %s9695_s12, [#allocation4 + $0x1]  ;;  %3514 = vmatprep.subr.bf16.mxu1 %v8512_v58  ;;  %v3585_v57 = vld [vmem:[#allocation14] sm:$0x3] }
 0x586   :  { %v8517_v61 = vld [vmem:[#allocation3 + $0xd8] ss:$36 sps:$4 sm:$0xff]   ;;  %v8520_v14 = vld [vmem:[#allocation3 + $0x90] ss:$36 sps:$4 sm:$0xff]   ;;  %v8523_v62 = vld [vmem:[#allocation3 + $0x48] ss:$36 sps:$4 sm:$0xff]  }
 0x587   :  { %3515 = vmatpush1.bf16.msra.mxu1 %v8514_v60  ;;  %v8526_v63 = vld [vmem:[#allocation3] ss:$36 sps:$4 sm:$0xff]   ;;  %s10218_s19 = sld [smem:[#allocation56_spill]] }
 0x588   :  { %3516 = vmatprep.subr.bf16.mxu1 %v8515_v43 }
 0x58b   :  { %3517 = vmatpush1.bf16.msra.mxu1 %v8517_v61 }
 0x58c   :  { %3518 = vmatprep.subr.bf16.mxu1 %v8518_v49 }
 0x58f   :  { %3519 = vmatpush1.bf16.msra.mxu1 %v8520_v14  ;;  %v3609_v14 = vld [vmem:[#allocation23] sm:$0x3] }
 0x590   :  { %3520 = vmatprep.subr.bf16.mxu1 %v8521_v46 }
 0x593   :  { %3521 = vmatpush1.bf16.msra.mxu1 %v8523_v62 }
 0x594   :  { %3522 = vmatprep.subr.bf16.mxu1 %v8524_v59 }
 0x597   :  { %3523 = vmatpush1.bf16.msra.mxu1 %v8526_v63 }
 0x59a   :  { %3541 = vmatmul.mubr.bf16.vlgmr.msra.gmra.mxu1 %v3396_v22 }
 0x65a   :  { %v3542_v13 = vpop.f32.mrf.mxu1 }
 0x65b   :  { %v3549_v0 = vrot.slane %v3542_v13, 4  ;;  %v3561_v2 = vmul.f32 %v3542_v13, %v3542_v13 }
 0x65c   :  { %v3544_v3 = vpop.f32.mrf.mxu1 }
 0x65d   :  { %v3550_v1 = vadd.f32 %v3549_v0, %v3542_v13  ;;  %v3563_v10 = vrot.slane %v3561_v2, 4  ;;  %v3555_v4 = vrot.slane %v3544_v3, 4  ;;  %v3562_v5 = vmul.f32 %v3544_v3, %v3544_v3 }
 0x65e   :  { %v3546_v42 = vpop.f32.mrf.mxu1 }
 0x65f   :  { %v3551_v44 = vrot.slane %v3550_v1, 2  ;;  %v3564_v47 = vadd.f32 %v3563_v10, %v3561_v2  ;;  %v3556_v53 = vadd.f32 %v3555_v4, %v3544_v3  ;;  %v3569_v9 = vrot.slane %v3562_v5, 4 }
 0x660   :  { %v3547_v11 = vpop.f32.mrf.mxu1  ;;  %v9937_v4 = vstv %s10218_s19 }
 0x661   :  { %v3552_v18 = vadd.f32 %v3551_v44, %v3550_v1  ;;  %v3565_v20 = vrot.slane %v3564_v47, 2  ;;  %v3557_v23 = vrot.slane %v3556_v53, 2  ;;  %v3570_v24 = vadd.f32 %v3569_v9, %v3562_v5 }
 0x663   :  { %v3553_v26 = vrot.slane %v3552_v18, 1  ;;  %v3566_v27 = vadd.f32 %v3565_v20, %v3564_v47  ;;  %v3558_v28 = vadd.f32 %v3557_v23, %v3556_v53  ;;  %v3571_v32 = vrot.slane %v3570_v24, 2 }
 0x665   :  { %v3554_v8 = vadd.f32 %v3553_v26, %v3552_v18  ;;  %v3567_v12 = vrot.slane %v3566_v27, 1  ;;  %v3559_v33 = vrot.slane %v3558_v28, 1  ;;  %v3572_v34 = vadd.f32 %v3571_v32, %v3570_v24 }
 0x667   :  { %v3568_v35 = vadd.f32 %v3567_v12, %v3566_v27  ;;  %v3575_v16 = vmul.f32 0.125, %v3554_v8  ;;  %v3560_v36 = vadd.f32 %v3559_v33, %v3558_v28  ;;  %v3573_v37 = vrot.slane %v3572_v34, 1 }
 0x669   :  { %v3577_v38 = vmul.f32 0.125, %v3568_v35  ;;  %v3579_v40 = vmul.f32 %v3575_v16, %v3575_v16  ;;  %v3574_v15 = vadd.f32 %v3573_v37, %v3572_v34  ;;  %v3576_v17 = vmul.f32 0.125, %v3560_v36 }
 0x66b   :  { %v3581_v45 = vsub.f32 %v3577_v38, %v3579_v40  ;;  %v3578_v48 = vmul.f32 0.125, %v3574_v15  ;;  %v3580_v51 = vmul.f32 %v3576_v17, %v3576_v17 }
 0x66d   :  { %v3583_v29 = vmax.f32 %v3581_v45, 0.0  ;;  %v3582_v19 = vsub.f32 %v3578_v48, %v3580_v51 }
 0x66f   :  { %v3586_v21 = vadd.f32 1e-05, %v3583_v29  ;;  %v3584_v30 = vmax.f32 %v3582_v19, 0.0 }
 0x671   :  { %v3587_v22 = vadd.f32 1e-05, %v3584_v30  ;;  %8527 = vrsqrt.f32 %v3586_v21 }
 0x673   :  { %8529 = vrsqrt.f32 %v3587_v22 }
 0x67e   :  { %v8528_v25 = vpop.eup %8527 }
 0x680   :  { %v8530_v31 = vpop.eup %8529 }
 0x681   :  { %v3592_v56 = vcombine.low %v8528_v25, %v8530_v31 }
 0x683   :  { %v3599_v7 = vrot.slane %v3592_v56, %v9823_v41 }
 0x685   :  { %v3606_v6 = vrot.slane %v3599_v7, %v9823_v41 }
 0x687   :  { %v3608_v58 = vmul.f32 %v3606_v6, %v3585_v57 }
 0x689   :  { %v3614_v43 = vrot.slane %v3608_v58, %v9831_v50  ;;  %v3618_v49 = vrot.slane %v3608_v58, %v9835_v52 }
 0x68b   :  { %v3621_v46 = vmul.f32 %v3614_v43, %v3575_v16  ;;  %v3622_v59 = vmul.f32 %v3618_v49, %v3576_v17  ;;  %v3642_v0 = vmul.f32 %v3614_v43, %v3542_v13  ;;  %v3643_v2 = vmul.f32 %v3618_v49, %v3544_v3 }
 0x68d   :  { %v3625_v60 = vcombine.low %v3621_v46, %v3622_v59 }
 0x68f   :  { %v3632_v61 = vrot.slane %v3625_v60, %v9823_v41 }
 0x691   :  { %v3639_v62 = vrot.slane %v3632_v61, %v9823_v41 }
 0x693   :  { %v3641_v63 = vsub.f32 %v3609_v14, %v3639_v62 }
 0x695   :  { %v3648_v1 = vrot.slane %v3641_v63, %v9831_v50  ;;  %v3652_v10 = vrot.slane %v3641_v63, %v9835_v52 }
 0x697   :  { %v3655_v5 = vadd.f32 %v3648_v1, %v3642_v0  ;;  %v3656_v42 = vadd.f32 %v3652_v10, %v3643_v2 }
 0x699   :  { %vm3657_vm0 = vcmp.gt.f32.partialorder %v3655_v5, 0.0  ;;  %vm3658_vm1 = vcmp.gt.f32.partialorder %v3656_v42, 0.0  ;;  %v3660_v44 = vmul.f32 %v9937_v4, %v3655_v5  ;;  %v3661_v47 = vmul.f32 %v9937_v4, %v3656_v42 }
 0x69b   :  { %v3662_v53 = vsel %vm3657_vm0, %v3655_v5, %v3660_v44  ;;  %v3663_v13 = vsel %vm3658_vm1, %v3656_v42, %v3661_v47 }
 0x69c   :  { %v9941_v3 = vpack.c.bf16 %v3662_v53, %v3662_v53  ;;  %v3665_v9 = vpack.c.bf16 %v3663_v13, %v3663_v13 }
 0x69d   :  { %9511 = dma.done.wait [#allocation4], 8192 }
 0x69e   :  { %9512 = vsyncadd [#allocation4], 4294959104  ;;  %4096 = vmatprep.mubr.bf16.mxu0 %v3665_v9  ;;  %4137 = vmatprep.mubr.bf16.mxu1 %v3665_v9  ;;  %v8531_v11 = vld [vmem:[#allocation2 + $0xe4] ss:$16 sps:$4 sm:$0xff]   ;;  %v8533_v18 = vld [vmem:[#allocation2 + $0xec] ss:$16 sps:$4 sm:$0xff]  }
 0x69f   :  { %4064 = vmatprep.subr.bf16.mxu0 %v8531_v11  ;;  %v8535_v20 = vld [vmem:[#allocation2 + $0xe0] ss:$16 sps:$4 sm:$0xff]   ;;  %v8536_v23 = vld [vmem:[#allocation2 + $0xe8] ss:$16 sps:$4 sm:$0xff]   ;;  %4105 = vmatprep.subr.bf16.mxu1 %v8533_v18  ;;  %v8537_v24 = vld [vmem:[#allocation2 + $0xc4] ss:$16 sps:$4 sm:$0xff]  }
 0x6a0   :  { %4065 = vmatpush1.bf16.msra.mxu0 %v8535_v20  ;;  %4106 = vmatpush1.bf16.msra.mxu1 %v8536_v23  ;;  %v8539_v26 = vld [vmem:[#allocation2 + $0xcc] ss:$16 sps:$4 sm:$0xff]   ;;  %v8541_v27 = vld [vmem:[#allocation2 + $0xc0] ss:$16 sps:$4 sm:$0xff]   ;;  %v8542_v28 = vld [vmem:[#allocation2 + $0xc8] ss:$16 sps:$4 sm:$0xff]  }
 0x6a1   :  { %4066 = vmatprep.subr.bf16.mxu0 %v8537_v24  ;;  %4107 = vmatprep.subr.bf16.mxu1 %v8539_v26  ;;  %v8543_v32 = vld [vmem:[#allocation2 + $0xa4] ss:$16 sps:$4 sm:$0xff]   ;;  %v8545_v8 = vld [vmem:[#allocation2 + $0xac] ss:$16 sps:$4 sm:$0xff]   ;;  %v8547_v12 = vld [vmem:[#allocation2 + $0xa0] ss:$16 sps:$4 sm:$0xff]  }
 0x6a2   :  { %v8548_v33 = vld [vmem:[#allocation2 + $0xa8] ss:$16 sps:$4 sm:$0xff]   ;;  %v8549_v34 = vld [vmem:[#allocation2 + $0x84] ss:$16 sps:$4 sm:$0xff]   ;;  %v8551_v35 = vld [vmem:[#allocation2 + $0x8c] ss:$16 sps:$4 sm:$0xff]  }
 0x6a3   :  { %v8553_v16 = vld [vmem:[#allocation2 + $0x80] ss:$16 sps:$4 sm:$0xff]   ;;  %v8554_v36 = vld [vmem:[#allocation2 + $0x88] ss:$16 sps:$4 sm:$0xff]   ;;  %v8555_v37 = vld [vmem:[#allocation2 + $0x64] ss:$16 sps:$4 sm:$0xff]  }
 0x6a4   :  { %4067 = vmatpush1.bf16.msra.mxu0 %v8541_v27  ;;  %4108 = vmatpush1.bf16.msra.mxu1 %v8542_v28  ;;  %v8557_v38 = vld [vmem:[#allocation2 + $0x6c] ss:$16 sps:$4 sm:$0xff]   ;;  %v8559_v40 = vld [vmem:[#allocation2 + $0x60] ss:$16 sps:$4 sm:$0xff]   ;;  %v8560_v15 = vld [vmem:[#allocation2 + $0x68] ss:$16 sps:$4 sm:$0xff]  }
 0x6a5   :  { %4068 = vmatprep.subr.bf16.mxu0 %v8543_v32  ;;  %4109 = vmatprep.subr.bf16.mxu1 %v8545_v8  ;;  %v8561_v17 = vld [vmem:[#allocation2 + $0x44] ss:$16 sps:$4 sm:$0xff]   ;;  %v8563_v45 = vld [vmem:[#allocation2 + $0x4c] ss:$16 sps:$4 sm:$0xff]   ;;  %v8565_v48 = vld [vmem:[#allocation2 + $0x40] ss:$16 sps:$4 sm:$0xff]  }
 0x6a6   :  { %v8566_v51 = vld [vmem:[#allocation2 + $0x48] ss:$16 sps:$4 sm:$0xff]   ;;  %v8567_v29 = vld [vmem:[#allocation2 + $0x24] ss:$16 sps:$4 sm:$0xff]   ;;  %v8569_v19 = vld [vmem:[#allocation2 + $0x2c] ss:$16 sps:$4 sm:$0xff]  }
 0x6a7   :  { %v8571_v21 = vld [vmem:[#allocation2 + $0x20] ss:$16 sps:$4 sm:$0xff]   ;;  %v8572_v30 = vld [vmem:[#allocation2 + $0x28] ss:$16 sps:$4 sm:$0xff]   ;;  %v8573_v22 = vld [vmem:[#allocation2 + $0x4] ss:$16 sps:$4 sm:$0xff]  }
 0x6a8   :  { %4069 = vmatpush1.bf16.msra.mxu0 %v8547_v12  ;;  %4110 = vmatpush1.bf16.msra.mxu1 %v8548_v33  ;;  %v8575_v25 = vld [vmem:[#allocation2 + $0xc] ss:$16 sps:$4 sm:$0xff]   ;;  %v8577_v31 = vld [vmem:[#allocation2] ss:$16 sps:$4 sm:$0xff]   ;;  %v8578_v56 = vld [vmem:[#allocation2 + $0x8] ss:$16 sps:$4 sm:$0xff]  }
 0x6a9   :  { %4070 = vmatprep.subr.bf16.mxu0 %v8549_v34  ;;  %4111 = vmatprep.subr.bf16.mxu1 %v8551_v35  ;;  %v8579_v7 = vld [vmem:[#allocation2 + $0x1e4] ss:$16 sps:$4 sm:$0xff]   ;;  %v8581_v57 = vld [vmem:[#allocation2 + $0x1ec] ss:$16 sps:$4 sm:$0xff]   ;;  %v8583_v6 = vld [vmem:[#allocation2 + $0x1e0] ss:$16 sps:$4 sm:$0xff]  }
 0x6aa   :  { %v8584_v58 = vld [vmem:[#allocation2 + $0x1e8] ss:$16 sps:$4 sm:$0xff]   ;;  %v8585_v43 = vld [vmem:[#allocation2 + $0x1c4] ss:$16 sps:$4 sm:$0xff]   ;;  %v8587_v49 = vld [vmem:[#allocation2 + $0x1cc] ss:$16 sps:$4 sm:$0xff]  }
 0x6ab   :  { %v8589_v46 = vld [vmem:[#allocation2 + $0x1c0] ss:$16 sps:$4 sm:$0xff]   ;;  %v8590_v59 = vld [vmem:[#allocation2 + $0x1c8] ss:$16 sps:$4 sm:$0xff]   ;;  %v8591_v60 = vld [vmem:[#allocation2 + $0x1a4] ss:$16 sps:$4 sm:$0xff]  }
 0x6ac   :  { %4071 = vmatpush1.bf16.msra.mxu0 %v8553_v16  ;;  %4112 = vmatpush1.bf16.msra.mxu1 %v8554_v36  ;;  %v8593_v61 = vld [vmem:[#allocation2 + $0x1ac] ss:$16 sps:$4 sm:$0xff]   ;;  %v8595_v14 = vld [vmem:[#allocation2 + $0x1a0] ss:$16 sps:$4 sm:$0xff]   ;;  %v8596_v62 = vld [vmem:[#allocation2 + $0x1a8] ss:$16 sps:$4 sm:$0xff]  }
 0x6ad   :  { %4072 = vmatprep.subr.bf16.mxu0 %v8555_v37  ;;  %4113 = vmatprep.subr.bf16.mxu1 %v8557_v38  ;;  %v8597_v63 = vld [vmem:[#allocation2 + $0x184] ss:$16 sps:$4 sm:$0xff]   ;;  %v8599_v0 = vld [vmem:[#allocation2 + $0x18c] ss:$16 sps:$4 sm:$0xff]   ;;  %v8601_v2 = vld [vmem:[#allocation2 + $0x180] ss:$16 sps:$4 sm:$0xff]  }
 0x6ae   :  { %v8602_v1 = vld [vmem:[#allocation2 + $0x188] ss:$16 sps:$4 sm:$0xff]   ;;  %v8603_v10 = vld [vmem:[#allocation2 + $0x164] ss:$16 sps:$4 sm:$0xff]   ;;  %v8605_v5 = vld [vmem:[#allocation2 + $0x16c] ss:$16 sps:$4 sm:$0xff]  }
 0x6af   :  { %v8607_v42 = vld [vmem:[#allocation2 + $0x160] ss:$16 sps:$4 sm:$0xff]   ;;  %v8608_v44 = vld [vmem:[#allocation2 + $0x168] ss:$16 sps:$4 sm:$0xff]   ;;  %v8609_v47 = vld [vmem:[#allocation2 + $0x144] ss:$16 sps:$4 sm:$0xff]  }
 0x6b0   :  { %4073 = vmatpush1.bf16.msra.mxu0 %v8559_v40  ;;  %4114 = vmatpush1.bf16.msra.mxu1 %v8560_v15  ;;  %v8611_v53 = vld [vmem:[#allocation2 + $0x14c] ss:$16 sps:$4 sm:$0xff]   ;;  %v8613_v13 = vld [vmem:[#allocation2 + $0x140] ss:$16 sps:$4 sm:$0xff]   ;;  %v8614_v9 = vld [vmem:[#allocation2 + $0x148] ss:$16 sps:$4 sm:$0xff]  }
 0x6b1   :  { %4074 = vmatprep.subr.bf16.mxu0 %v8561_v17  ;;  %4115 = vmatprep.subr.bf16.mxu1 %v8563_v45  ;;  %v8615_v11 = vld [vmem:[#allocation2 + $0x124] ss:$16 sps:$4 sm:$0xff]   ;;  %v8617_v18 = vld [vmem:[#allocation2 + $0x12c] ss:$16 sps:$4 sm:$0xff]   ;;  %v8619_v20 = vld [vmem:[#allocation2 + $0x120] ss:$16 sps:$4 sm:$0xff]  }
 0x6b2   :  { %v8620_v23 = vld [vmem:[#allocation2 + $0x128] ss:$16 sps:$4 sm:$0xff]   ;;  %v8621_v24 = vld [vmem:[#allocation2 + $0x104] ss:$16 sps:$4 sm:$0xff]   ;;  %v8623_v26 = vld [vmem:[#allocation2 + $0x10c] ss:$16 sps:$4 sm:$0xff]  }
 0x6b3   :  { %v8625_v27 = vld [vmem:[#allocation2 + $0x100] ss:$16 sps:$4 sm:$0xff]   ;;  %v8626_v28 = vld [vmem:[#allocation2 + $0x108] ss:$16 sps:$4 sm:$0xff]  }
 0x6b4   :  { %4075 = vmatpush1.bf16.msra.mxu0 %v8565_v48  ;;  %4116 = vmatpush1.bf16.msra.mxu1 %v8566_v51 }
 0x6b5   :  { %4076 = vmatprep.subr.bf16.mxu0 %v8567_v29  ;;  %4117 = vmatprep.subr.bf16.mxu1 %v8569_v19 }
 0x6b8   :  { %4077 = vmatpush1.bf16.msra.mxu0 %v8571_v21  ;;  %4118 = vmatpush1.bf16.msra.mxu1 %v8572_v30 }
 0x6b9   :  { %4078 = vmatprep.subr.bf16.mxu0 %v8573_v22  ;;  %4119 = vmatprep.subr.bf16.mxu1 %v8575_v25 }
 0x6bc   :  { %4079 = vmatpush1.bf16.msra.mxu0 %v8577_v31  ;;  %4120 = vmatpush1.bf16.msra.mxu1 %v8578_v56 }
 0x6bd   :  { %4080 = vmatprep.subr.bf16.mxu0 %v8579_v7  ;;  %4121 = vmatprep.subr.bf16.mxu1 %v8581_v57 }
 0x6c0   :  { %4081 = vmatpush2.bf16.msra.mxu0 %v8583_v6  ;;  %4122 = vmatpush2.bf16.msra.mxu1 %v8584_v58 }
 0x6c1   :  { %4082 = vmatprep.subr.bf16.mxu0 %v8585_v43  ;;  %4123 = vmatprep.subr.bf16.mxu1 %v8587_v49 }
 0x6c4   :  { %4083 = vmatpush2.bf16.msra.mxu0 %v8589_v46  ;;  %4124 = vmatpush2.bf16.msra.mxu1 %v8590_v59 }
 0x6c5   :  { %4084 = vmatprep.subr.bf16.mxu0 %v8591_v60  ;;  %4125 = vmatprep.subr.bf16.mxu1 %v8593_v61 }
 0x6c8   :  { %4085 = vmatpush2.bf16.msra.mxu0 %v8595_v14  ;;  %4126 = vmatpush2.bf16.msra.mxu1 %v8596_v62 }
 0x6c9   :  { %4086 = vmatprep.subr.bf16.mxu0 %v8597_v63  ;;  %4127 = vmatprep.subr.bf16.mxu1 %v8599_v0 }
 0x6cc   :  { %4087 = vmatpush2.bf16.msra.mxu0 %v8601_v2  ;;  %4128 = vmatpush2.bf16.msra.mxu1 %v8602_v1 }
 0x6cd   :  { %4088 = vmatprep.subr.bf16.mxu0 %v8603_v10  ;;  %4129 = vmatprep.subr.bf16.mxu1 %v8605_v5 }
 0x6d0   :  { %4089 = vmatpush2.bf16.msra.mxu0 %v8607_v42  ;;  %4130 = vmatpush2.bf16.msra.mxu1 %v8608_v44 }
 0x6d1   :  { %4090 = vmatprep.subr.bf16.mxu0 %v8609_v47  ;;  %4131 = vmatprep.subr.bf16.mxu1 %v8611_v53 }
 0x6d4   :  { %4091 = vmatpush2.bf16.msra.mxu0 %v8613_v13  ;;  %4132 = vmatpush2.bf16.msra.mxu1 %v8614_v9 }
 0x6d5   :  { %4092 = vmatprep.subr.bf16.mxu0 %v8615_v11  ;;  %4133 = vmatprep.subr.bf16.mxu1 %v8617_v18 }
 0x6d8   :  { %4093 = vmatpush2.bf16.msra.mxu0 %v8619_v20  ;;  %4134 = vmatpush2.bf16.msra.mxu1 %v8620_v23 }
 0x6d9   :  { %4094 = vmatprep.subr.bf16.mxu0 %v8621_v24  ;;  %4135 = vmatprep.subr.bf16.mxu1 %v8623_v26 }
 0x6dc   :  { %4095 = vmatpush2.bf16.msra.mxu0 %v8625_v27  ;;  %4136 = vmatpush2.bf16.msra.mxu1 %v8626_v28 }
 0x6df   :  { %4097 = vmatmul.mubr.bf16.vlgmr.msra.gmra.mxu0 %v9941_v3  ;;  %4138 = vmatmul.mubr.bf16.vlgmr.msra.gmra.mxu1 %v9941_v3 }
 0x79f   :  { %v9945_v32 = vpop.f32.mrf.mxu0  ;;  %v9947_v8 = vpop.f32.mrf.mxu1 }
 0x7a0   :  { %v4146_v12 = vrot.slane %v9945_v32, 4  ;;  %v4170_v33 = vmul.f32 %v9945_v32, %v9945_v32  ;;  %v4158_v34 = vrot.slane %v9947_v8, 4  ;;  %v4172_v35 = vmul.f32 %v9947_v8, %v9947_v8 }
 0x7a1   :  { %v9955_v16 = vpop.f32.mrf.mxu0  ;;  %v9957_v36 = vpop.f32.mrf.mxu1 }
 0x7a2   :  { %v4147_v3 = vadd.f32 %v4146_v12, %v9945_v32  ;;  %v4174_v37 = vrot.slane %v4170_v33, 4  ;;  %v4159_v38 = vadd.f32 %v4158_v34, %v9947_v8  ;;  %v4186_v40 = vrot.slane %v4172_v35, 4 }
 0x7a3   :  { %v4152_v15 = vrot.slane %v9955_v16, 4  ;;  %v4171_v17 = vmul.f32 %v9955_v16, %v9955_v16  ;;  %v4164_v45 = vrot.slane %v9957_v36, 4  ;;  %v4173_v48 = vmul.f32 %v9957_v36, %v9957_v36  ;;  %v4102_v51 = vpop.f32.mrf.mxu0  ;;  %v4143_v29 = vpop.f32.mrf.mxu1 }
 0x7a4   :  { %v4148_v19 = vrot.slane %v4147_v3, 2  ;;  %v4175_v21 = vadd.f32 %v4174_v37, %v4170_v33  ;;  %v4160_v30 = vrot.slane %v4159_v38, 2  ;;  %v4187_v22 = vadd.f32 %v4186_v40, %v4172_v35 }
 0x7a5   :  { %v4153_v25 = vadd.f32 %v4152_v15, %v9955_v16  ;;  %v4180_v31 = vrot.slane %v4171_v17, 4  ;;  %v4165_v56 = vadd.f32 %v4164_v45, %v9957_v36  ;;  %v4192_v7 = vrot.slane %v4173_v48, 4  ;;  %v4103_v57 = vpop.f32.mrf.mxu0  ;;  %v4144_v6 = vpop.f32.mrf.mxu1 }
 0x7a6   :  { %v4149_v58 = vadd.f32 %v4148_v19, %v4147_v3  ;;  %v4176_v43 = vrot.slane %v4175_v21, 2  ;;  %v4161_v49 = vadd.f32 %v4160_v30, %v4159_v38  ;;  %v4188_v46 = vrot.slane %v4187_v22, 2 }
 0x7a7   :  { %v4154_v59 = vrot.slane %v4153_v25, 2  ;;  %v4181_v60 = vadd.f32 %v4180_v31, %v4171_v17  ;;  %v4166_v61 = vrot.slane %v4165_v56, 2  ;;  %v4193_v14 = vadd.f32 %v4192_v7, %v4173_v48 }
 0x7a8   :  { %v4150_v62 = vrot.slane %v4149_v58, 1  ;;  %v4177_v63 = vadd.f32 %v4176_v43, %v4175_v21  ;;  %v4162_v0 = vrot.slane %v4161_v49, 1  ;;  %v4189_v2 = vadd.f32 %v4188_v46, %v4187_v22 }
 0x7a9   :  { %v4155_v1 = vadd.f32 %v4154_v59, %v4153_v25  ;;  %v4182_v10 = vrot.slane %v4181_v60, 2  ;;  %v4167_v5 = vadd.f32 %v4166_v61, %v4165_v56  ;;  %v4194_v42 = vrot.slane %v4193_v14, 2 }
 0x7aa   :  { %v4151_v44 = vadd.f32 %v4150_v62, %v4149_v58  ;;  %v4178_v47 = vrot.slane %v4177_v63, 1  ;;  %v4163_v53 = vadd.f32 %v4162_v0, %v4161_v49  ;;  %v4190_v13 = vrot.slane %v4189_v2, 1 }
 0x7ab   :  { %v4156_v9 = vrot.slane %v4155_v1, 1  ;;  %v4183_v11 = vadd.f32 %v4182_v10, %v4181_v60  ;;  %v4168_v18 = vrot.slane %v4167_v5, 1  ;;  %v4195_v20 = vadd.f32 %v4194_v42, %v4193_v14 }
 0x7ac   :  { %v4179_v23 = vadd.f32 %v4178_v47, %v4177_v63  ;;  %v4198_v24 = vmul.f32 0.125, %v4151_v44  ;;  %v4191_v26 = vadd.f32 %v4190_v13, %v4189_v2  ;;  %v4200_v27 = vmul.f32 0.125, %v4163_v53 }
 0x7ad   :  { %v4157_v28 = vadd.f32 %v4156_v9, %v4155_v1  ;;  %v4184_v12 = vrot.slane %v4183_v11, 1  ;;  %v4169_v33 = vadd.f32 %v4168_v18, %v4167_v5  ;;  %v4196_v34 = vrot.slane %v4195_v20, 1  ;;  %v4218_v1 = vld [vmem:[#allocation15] sm:$0xf] }
 0x7ae   :  { %v4202_v35 = vmul.f32 0.125, %v4179_v23  ;;  %v4206_v3 = vmul.f32 %v4198_v24, %v4198_v24  ;;  %v4204_v37 = vmul.f32 0.125, %v4191_v26  ;;  %v4208_v38 = vmul.f32 %v4200_v27, %v4200_v27 }
 0x7af   :  { %v4185_v40 = vadd.f32 %v4184_v12, %v4183_v11  ;;  %v4199_v15 = vmul.f32 0.125, %v4157_v28  ;;  %v4197_v17 = vadd.f32 %v4196_v34, %v4195_v20  ;;  %v4201_v45 = vmul.f32 0.125, %v4169_v33  ;;  %v4257_v33 = vld [vmem:[#allocation24] sm:$0xf] }
 0x7b0   :  { %v4210_v48 = vsub.f32 %v4202_v35, %v4206_v3  ;;  %v4212_v51 = vsub.f32 %v4204_v37, %v4208_v38 }
 0x7b1   :  { %v4203_v29 = vmul.f32 0.125, %v4185_v40  ;;  %v4207_v19 = vmul.f32 %v4199_v15, %v4199_v15  ;;  %v4205_v21 = vmul.f32 0.125, %v4197_v17  ;;  %v4209_v30 = vmul.f32 %v4201_v45, %v4201_v45 }
 0x7b2   :  { %v4214_v22 = vmax.f32 %v4210_v48, 0.0  ;;  %v4216_v25 = vmax.f32 %v4212_v51, 0.0 }
 0x7b3   :  { %v4211_v31 = vsub.f32 %v4203_v29, %v4207_v19  ;;  %v4213_v56 = vsub.f32 %v4205_v21, %v4209_v30 }
 0x7b4   :  { %v4219_v7 = vadd.f32 1e-05, %v4214_v22  ;;  %v4221_v57 = vadd.f32 1e-05, %v4216_v25 }
 0x7b5   :  { %v4215_v6 = vmax.f32 %v4211_v31, 0.0  ;;  %v4217_v58 = vmax.f32 %v4213_v56, 0.0 }
 0x7b6   :  { %8627 = vrsqrt.f32 %v4219_v7 }
 0x7b7   :  { %v4220_v43 = vadd.f32 1e-05, %v4215_v6  ;;  %v4222_v49 = vadd.f32 1e-05, %v4217_v58  ;;  %8629 = vrsqrt.f32 %v4221_v57 }
 0x7b9   :  { %8631 = vrsqrt.f32 %v4220_v43 }
 0x7ba   :  { %8633 = vrsqrt.f32 %v4222_v49 }
 0x7c3   :  { %v8628_v46 = vpop.eup %8627 }
 0x7c4   :  { %v8630_v59 = vpop.eup %8629 }
 0x7c6   :  { %v8632_v60 = vpop.eup %8631 }
 0x7c7   :  { %v8634_v61 = vpop.eup %8633  ;;  %v4231_v14 = vcombine.low %v8628_v46, %v8632_v60 }
 0x7c8   :  { %v4232_v62 = vcombine.low %v8630_v59, %v8634_v61 }
 0x7c9   :  { %v4239_v63 = vrot.slane %v4231_v14, %v9823_v41 }
 0x7ca   :  { %v4246_v0 = vrot.slane %v4232_v62, %v9823_v41 }
 0x7cc   :  { %v4247_v2 = vcombine.low %v4239_v63, %v4246_v0 }
 0x7ce   :  { %v4254_v10 = vrot.slane %v4247_v2, %v9823_v41 }
 0x7d0   :  { %v4256_v5 = vmul.f32 %v4254_v10, %v4218_v1 }
 0x7d2   :  { %v4262_v42 = vrot.slane %v4256_v5, %v9831_v50  ;;  %v4266_v44 = vrot.slane %v4256_v5, %v9835_v52  ;;  %v4270_v47 = vrot.slane %v4256_v5, %v9838_v54  ;;  %v4274_v53 = vrot.slane %v4256_v5, %v9841_v55 }
 0x7d4   :  { %v4279_v13 = vmul.f32 %v4262_v42, %v4198_v24  ;;  %v4280_v9 = vmul.f32 %v4266_v44, %v4199_v15  ;;  %v4281_v11 = vmul.f32 %v4270_v47, %v4200_v27  ;;  %v4282_v18 = vmul.f32 %v4274_v53, %v4201_v45 }
 0x7d5   :  { %v4313_v3 = vmul.f32 %v4262_v42, %v9945_v32  ;;  %v4314_v37 = vmul.f32 %v4266_v44, %v9955_v16  ;;  %v4315_v24 = vmul.f32 %v4270_v47, %v9947_v8  ;;  %v4316_v27 = vmul.f32 %v4274_v53, %v9957_v36 }
 0x7d6   :  { %v4287_v20 = vcombine.low %v4279_v13, %v4280_v9  ;;  %v4288_v23 = vcombine.low %v4281_v11, %v4282_v18 }
 0x7d8   :  { %v4295_v26 = vrot.slane %v4287_v20, %v9823_v41  ;;  %v4302_v28 = vrot.slane %v4288_v23, %v9823_v41 }
 0x7da   :  { %v4303_v12 = vcombine.low %v4295_v26, %v4302_v28 }
 0x7dc   :  { %v4310_v34 = vrot.slane %v4303_v12, %v9823_v41 }
 0x7de   :  { %v4312_v35 = vsub.f32 %v4257_v33, %v4310_v34 }
 0x7e0   :  { %v4321_v38 = vrot.slane %v4312_v35, %v9831_v50  ;;  %v4325_v40 = vrot.slane %v4312_v35, %v9835_v52  ;;  %v4329_v15 = vrot.slane %v4312_v35, %v9838_v54  ;;  %v4333_v17 = vrot.slane %v4312_v35, %v9841_v55 }
 0x7e2   :  { %v4338_v45 = vadd.f32 %v4321_v38, %v4313_v3  ;;  %v4339_v48 = vadd.f32 %v4325_v40, %v4314_v37  ;;  %v4340_v51 = vadd.f32 %v4329_v15, %v4315_v24  ;;  %v4341_v29 = vadd.f32 %v4333_v17, %v4316_v27 }
 0x7e4   :  { %vm4342_vm2 = vcmp.gt.f32.partialorder %v4338_v45, 0.0  ;;  %vm4343_vm3 = vcmp.gt.f32.partialorder %v4339_v48, 0.0  ;;  %vm4344_vm4 = vcmp.gt.f32.partialorder %v4340_v51, 0.0  ;;  %vm4345_vm5 = vcmp.gt.f32.partialorder %v4341_v29, 0.0 }
 0x7e5   :  { %v4346_v32 = vmul.f32 %v4338_v45, %v9937_v4  ;;  %v4347_v8 = vmul.f32 %v4339_v48, %v9937_v4  ;;  %v4348_v16 = vmul.f32 %v4340_v51, %v9937_v4  ;;  %v4349_v36 = vmul.f32 %v4341_v29, %v9937_v4 }
 0x7e7   :  { %v4350_v19 = vsel %vm4342_vm2, %v4338_v45, %v4346_v32  ;;  %v4351_v21 = vsel %vm4343_vm3, %v4339_v48, %v4347_v8  ;;  %v4352_v30 = vsel %vm4344_vm4, %v4340_v51, %v4348_v16  ;;  %v4353_v22 = vsel %vm4345_vm5, %v4341_v29, %v4349_v36 }
 0x7e8   :  { %v9991_v25 = vpack.c.bf16 %v4350_v19, %v4350_v19  ;;  %v9993_v31 = vpack.c.bf16 %v4351_v21, %v4351_v21  ;;  %v9995_v56 = vpack.c.bf16 %v4352_v30, %v4352_v30  ;;  %v9997_v7 = vpack.c.bf16 %v4353_v22, %v4353_v22 }
 0x7e9   :  { %9513 = dma.done.wait [#allocation4 + $0x1], 36864 }
 0x7ea   :  { %9514 = vsyncadd [#allocation4 + $0x1], 4294930432  ;;  %6185 = vmatprep.mubr.bf16.mxu0 %v9993_v31  ;;  %6226 = vmatprep.mubr.bf16.mxu1 %v9997_v7  ;;  %v8635_v57 = vld [vmem:[#allocation3 + $0x1fc] ss:$36 sps:$4 sm:$0xff]   ;;  %v8641_v49 = vld [vmem:[#allocation3 + $0x1b4] ss:$36 sps:$4 sm:$0xff]  }
 0x7eb   :  { %v8637_v6 = vld [vmem:[#allocation3 + $0x67c] ss:$36 sps:$4 sm:$0xff]   ;;  %6153 = vmatprep.subr.bf16.mxu0 %v8635_v57  ;;  %v8643_v46 = vld [vmem:[#allocation3 + $0x634] ss:$36 sps:$4 sm:$0xff]   ;;  %v8647_v61 = vld [vmem:[#allocation3 + $0x16c] ss:$36 sps:$4 sm:$0xff]  }
 0x7ec   :  { %v8639_v58 = vld [vmem:[#allocation3 + $0x1f8] ss:$36 sps:$4 sm:$0xff]   ;;  %6194 = vmatprep.subr.bf16.mxu1 %v8637_v6  ;;  %v8645_v59 = vld [vmem:[#allocation3 + $0x1b0] ss:$36 sps:$4 sm:$0xff]   ;;  %v8651_v62 = vld [vmem:[#allocation3 + $0x168] ss:$36 sps:$4 sm:$0xff]  }
 0x7ed   :  { %v8640_v43 = vld [vmem:[#allocation3 + $0x678] ss:$36 sps:$4 sm:$0xff]   ;;  %6154 = vmatpush1.bf16.msra.mxu0 %v8639_v58  ;;  %v8646_v60 = vld [vmem:[#allocation3 + $0x630] ss:$36 sps:$4 sm:$0xff]   ;;  %v8652_v63 = vld [vmem:[#allocation3 + $0x5e8] ss:$36 sps:$4 sm:$0xff]  }
 0x7ee   :  { %6195 = vmatpush1.bf16.msra.mxu1 %v8640_v43  ;;  %6155 = vmatprep.subr.bf16.mxu0 %v8641_v49  ;;  %v8649_v14 = vld [vmem:[#allocation3 + $0x5ec] ss:$36 sps:$4 sm:$0xff]   ;;  %v8653_v0 = vld [vmem:[#allocation3 + $0x124] ss:$36 sps:$4 sm:$0xff]   ;;  %v8659_v5 = vld [vmem:[#allocation3 + $0xdc] ss:$36 sps:$4 sm:$0xff]  }
 0x7ef   :  { %6196 = vmatprep.subr.bf16.mxu1 %v8643_v46  ;;  %v8655_v2 = vld [vmem:[#allocation3 + $0x5a4] ss:$36 sps:$4 sm:$0xff]   ;;  %v8661_v42 = vld [vmem:[#allocation3 + $0x55c] ss:$36 sps:$4 sm:$0xff]   ;;  %v8665_v53 = vld [vmem:[#allocation3 + $0x94] ss:$36 sps:$4 sm:$0xff]  }
 0x7f0   :  { %v8657_v1 = vld [vmem:[#allocation3 + $0x120] ss:$36 sps:$4 sm:$0xff]   ;;  %v8663_v44 = vld [vmem:[#allocation3 + $0xd8] ss:$36 sps:$4 sm:$0xff]   ;;  %v8669_v9 = vld [vmem:[#allocation3 + $0x90] ss:$36 sps:$4 sm:$0xff]  }
 0x7f1   :  { %6156 = vmatpush1.bf16.msra.mxu0 %v8645_v59  ;;  %v8658_v10 = vld [vmem:[#allocation3 + $0x5a0] ss:$36 sps:$4 sm:$0xff]   ;;  %v8664_v47 = vld [vmem:[#allocation3 + $0x558] ss:$36 sps:$4 sm:$0xff]   ;;  %v8670_v11 = vld [vmem:[#allocation3 + $0x510] ss:$36 sps:$4 sm:$0xff]  }
 0x7f2   :  { %6197 = vmatpush1.bf16.msra.mxu1 %v8646_v60  ;;  %6157 = vmatprep.subr.bf16.mxu0 %v8647_v61  ;;  %v8667_v13 = vld [vmem:[#allocation3 + $0x514] ss:$36 sps:$4 sm:$0xff]   ;;  %v8671_v18 = vld [vmem:[#allocation3 + $0x4c] ss:$36 sps:$4 sm:$0xff]   ;;  %v8677_v28 = vld [vmem:[#allocation3 + $0x4] ss:$36 sps:$4 sm:$0xff]  }
 0x7f3   :  { %6198 = vmatprep.subr.bf16.mxu1 %v8649_v14  ;;  %v8673_v20 = vld [vmem:[#allocation3 + $0x4cc] ss:$36 sps:$4 sm:$0xff]   ;;  %v8679_v12 = vld [vmem:[#allocation3 + $0x484] ss:$36 sps:$4 sm:$0xff]   ;;  %v8683_v35 = vld [vmem:[#allocation3 + $0x43c] ss:$36 sps:$4 sm:$0xff]  }
 0x7f4   :  { %v8675_v23 = vld [vmem:[#allocation3 + $0x48] ss:$36 sps:$4 sm:$0xff]   ;;  %v8681_v33 = vld [vmem:[#allocation3] ss:$36 sps:$4 sm:$0xff]   ;;  %v8687_v37 = vld [vmem:[#allocation3 + $0x438] ss:$36 sps:$4 sm:$0xff]  }
 0x7f5   :  { %6158 = vmatpush1.bf16.msra.mxu0 %v8651_v62  ;;  %v8676_v26 = vld [vmem:[#allocation3 + $0x4c8] ss:$36 sps:$4 sm:$0xff]   ;;  %v8682_v34 = vld [vmem:[#allocation3 + $0x480] ss:$36 sps:$4 sm:$0xff]   ;;  %v8688_v24 = vld [vmem:[#allocation3 + $0x8b8] ss:$36 sps:$4 sm:$0xff]  }
 0x7f6   :  { %6199 = vmatpush1.bf16.msra.mxu1 %v8652_v63  ;;  %6159 = vmatprep.subr.bf16.mxu0 %v8653_v0  ;;  %v8685_v3 = vld [vmem:[#allocation3 + $0x8bc] ss:$36 sps:$4 sm:$0xff]   ;;  %v8689_v27 = vld [vmem:[#allocation3 + $0x3f4] ss:$36 sps:$4 sm:$0xff]   ;;  %v8695_v17 = vld [vmem:[#allocation3 + $0x3ac] ss:$36 sps:$4 sm:$0xff]  }
 0x7f7   :  { %6200 = vmatprep.subr.bf16.mxu1 %v8655_v2  ;;  %v8691_v38 = vld [vmem:[#allocation3 + $0x874] ss:$36 sps:$4 sm:$0xff]   ;;  %v8697_v45 = vld [vmem:[#allocation3 + $0x82c] ss:$36 sps:$4 sm:$0xff]   ;;  %v8701_v29 = vld [vmem:[#allocation3 + $0x364] ss:$36 sps:$4 sm:$0xff]  }
 0x7f8   :  { %v8693_v40 = vld [vmem:[#allocation3 + $0x3f0] ss:$36 sps:$4 sm:$0xff]   ;;  %v8699_v48 = vld [vmem:[#allocation3 + $0x3a8] ss:$36 sps:$4 sm:$0xff]   ;;  %v8705_v8 = vld [vmem:[#allocation3 + $0x360] ss:$36 sps:$4 sm:$0xff]  }
 0x7f9   :  { %6160 = vmatpush1.bf16.msra.mxu0 %v8657_v1  ;;  %v8694_v15 = vld [vmem:[#allocation3 + $0x870] ss:$36 sps:$4 sm:$0xff]   ;;  %v8700_v51 = vld [vmem:[#allocation3 + $0x828] ss:$36 sps:$4 sm:$0xff]   ;;  %v8706_v16 = vld [vmem:[#allocation3 + $0x7e0] ss:$36 sps:$4 sm:$0xff]  }
 0x7fa   :  { %6201 = vmatpush1.bf16.msra.mxu1 %v8658_v10  ;;  %6161 = vmatprep.subr.bf16.mxu0 %v8659_v5  ;;  %v8703_v32 = vld [vmem:[#allocation3 + $0x7e4] ss:$36 sps:$4 sm:$0xff]   ;;  %v8707_v36 = vld [vmem:[#allocation3 + $0x31c] ss:$36 sps:$4 sm:$0xff]   ;;  %v8713_v22 = vld [vmem:[#allocation3 + $0x2d4] ss:$36 sps:$4 sm:$0xff]  }
 0x7fb   :  { %6202 = vmatprep.subr.bf16.mxu1 %v8661_v42  ;;  %v8709_v19 = vld [vmem:[#allocation3 + $0x79c] ss:$36 sps:$4 sm:$0xff]   ;;  %v8715_v57 = vld [vmem:[#allocation3 + $0x754] ss:$36 sps:$4 sm:$0xff]   ;;  %v8719_v43 = vld [vmem:[#allocation3 + $0x28c] ss:$36 sps:$4 sm:$0xff]  }
 0x7fc   :  { %v8711_v21 = vld [vmem:[#allocation3 + $0x318] ss:$36 sps:$4 sm:$0xff]   ;;  %v8717_v6 = vld [vmem:[#allocation3 + $0x2d0] ss:$36 sps:$4 sm:$0xff]   ;;  %v8723_v46 = vld [vmem:[#allocation3 + $0x288] ss:$36 sps:$4 sm:$0xff]  }
 0x7fd   :  { %6162 = vmatpush1.bf16.msra.mxu0 %v8663_v44  ;;  %v8712_v30 = vld [vmem:[#allocation3 + $0x798] ss:$36 sps:$4 sm:$0xff]   ;;  %v8718_v58 = vld [vmem:[#allocation3 + $0x750] ss:$36 sps:$4 sm:$0xff]   ;;  %v8724_v59 = vld [vmem:[#allocation3 + $0x708] ss:$36 sps:$4 sm:$0xff]  }
 0x7fe   :  { %6203 = vmatpush1.bf16.msra.mxu1 %v8664_v47  ;;  %6163 = vmatprep.subr.bf16.mxu0 %v8665_v53  ;;  %v8721_v49 = vld [vmem:[#allocation3 + $0x70c] ss:$36 sps:$4 sm:$0xff]   ;;  %v8725_v60 = vld [vmem:[#allocation3 + $0x244] ss:$36 sps:$4 sm:$0xff]   ;;  %v8739_v10 = vld [vmem:[#allocation3 + $0x1bc] ss:$36 sps:$4 sm:$0xff]  }
 0x7ff   :  { %6204 = vmatprep.subr.bf16.mxu1 %v8667_v13  ;;  %v8727_v61 = vld [vmem:[#allocation3 + $0x6c4] ss:$36 sps:$4 sm:$0xff]   ;;  %v8742_v5 = vld [vmem:[#allocation3 + $0x63c] ss:$36 sps:$4 sm:$0xff]   ;;  %v8745_v47 = vld [vmem:[#allocation3 + $0x174] ss:$36 sps:$4 sm:$0xff]  }
 0x800   :  { %v8729_v14 = vld [vmem:[#allocation3 + $0x240] ss:$36 sps:$4 sm:$0xff]   ;;  %v8737_v42 = vld [vmem:[#allocation3 + $0x1b8] ss:$36 sps:$4 sm:$0xff]   ;;  %v8743_v13 = vld [vmem:[#allocation3 + $0x170] ss:$36 sps:$4 sm:$0xff]  }
 0x801   :  { %6164 = vmatpush1.bf16.msra.mxu0 %v8669_v9  ;;  %v8730_v62 = vld [vmem:[#allocation3 + $0x6c0] ss:$36 sps:$4 sm:$0xff]   ;;  %v8740_v44 = vld [vmem:[#allocation3 + $0x638] ss:$36 sps:$4 sm:$0xff]   ;;  %v8746_v9 = vld [vmem:[#allocation3 + $0x5f0] ss:$36 sps:$4 sm:$0xff]  }
 0x802   :  { %6205 = vmatpush1.bf16.msra.mxu1 %v8670_v11  ;;  %6165 = vmatprep.subr.bf16.mxu0 %v8671_v18  ;;  %v8733_v63 = vld [vmem:[#allocation3 + $0x204] ss:$36 sps:$4 sm:$0xff]   ;;  %v8748_v53 = vld [vmem:[#allocation3 + $0x5f4] ss:$36 sps:$4 sm:$0xff]   ;;  %v8751_v11 = vld [vmem:[#allocation3 + $0x12c] ss:$36 sps:$4 sm:$0xff]  }
 0x803   :  { %6206 = vmatprep.subr.bf16.mxu1 %v8673_v20  ;;  %v8736_v0 = vld [vmem:[#allocation3 + $0x684] ss:$36 sps:$4 sm:$0xff]   ;;  %v8754_v18 = vld [vmem:[#allocation3 + $0x5ac] ss:$36 sps:$4 sm:$0xff]   ;;  %s9542_s5 = smov [#allocation27]  }
 0x804   :  { %v8731_v2 = vld [vmem:[#allocation3 + $0x200] ss:$36 sps:$4 sm:$0xff]   ;;  %v8749_v20 = vld [vmem:[#allocation3 + $0x128] ss:$36 sps:$4 sm:$0xff]   ;;  %s7060_s22 = sshll.u32 %s9542_s5, 4  ;;  %s7061_s22 = int_to_ptr.vmem [resolvable:$true] %s7060_s22 }
 0x805   :  { %6166 = vmatpush1.bf16.msra.mxu0 %v8675_v23  ;;  %v8734_v1 = vld [vmem:[#allocation3 + $0x680] ss:$36 sps:$4 sm:$0xff]   ;;  %v8752_v23 = vld [vmem:[#allocation3 + $0x5a8] ss:$36 sps:$4 sm:$0xff]   ;;  %s9449_s9 = scalar_lea.vmem %s7061_s22, 128  ;;  %p9454_p8 = scmp.lt.s32.totalorder %s7061_s22, %s7061_s22 }
 0x806   :  { %6207 = vmatpush1.bf16.msra.mxu1 %v8676_v26  ;;  %6167 = vmatprep.subr.bf16.mxu0 %v8677_v28  ;;  %v8757_v26 = vld [vmem:[#allocation3 + $0xe4] ss:$36 sps:$4 sm:$0xff]   ;;  %p9450_p1 = scmp.ne.s32.totalorder %s7061_s22, %s9449_s9  ;;  %p9455_p9 = scmp.lt.s32.totalorder %s9449_s9, %s9449_s9 }
 0x807   :  { %6208 = vmatprep.subr.bf16.mxu1 %v8679_v12  ;;  %v8760_v28 = vld [vmem:[#allocation3 + $0x564] ss:$36 sps:$4 sm:$0xff]  }
 0x808   :  { %v8755_v12 = vld [vmem:[#allocation3 + $0xe0] ss:$36 sps:$4 sm:$0xff]   ;;  %p9456_p11 = por %p9455_p9, %p9454_p8 }
 0x809   :  { %6168 = vmatpush1.bf16.msra.mxu0 %v8681_v33  ;;  %v8758_v33 = vld [vmem:[#allocation3 + $0x560] ss:$36 sps:$4 sm:$0xff]  }
 0x80a   :  { %6209 = vmatpush1.bf16.msra.mxu1 %v8682_v34  ;;  %6169 = vmatprep.subr.bf16.mxu0 %v8683_v35  ;;  %v8763_v34 = vld [vmem:[#allocation3 + $0x9c] ss:$36 sps:$4 sm:$0xff]   ;;  %p9457_p12 = pnand %p9456_p11, %p9450_p1 }
 0x80b   :  { %6210 = vmatprep.subr.bf16.mxu1 %v8685_v3  ;;  %v8766_v35 = vld [vmem:[#allocation3 + $0x51c] ss:$36 sps:$4 sm:$0xff]  }
 0x80c   :  { %v8761_v3 = vld [vmem:[#allocation3 + $0x98] ss:$36 sps:$4 sm:$0xff]  }
 0x80d   :  { %6170 = vmatpush2.bf16.msra.mxu0 %v8687_v37  ;;  %v8764_v37 = vld [vmem:[#allocation3 + $0x518] ss:$36 sps:$4 sm:$0xff]  }
 0x80e   :  { %6211 = vmatpush2.bf16.msra.mxu1 %v8688_v24  ;;  %6171 = vmatprep.subr.bf16.mxu0 %v8689_v27  ;;  %v8769_v24 = vld [vmem:[#allocation3 + $0x54] ss:$36 sps:$4 sm:$0xff]  }
 0x80f   :  { %6212 = vmatprep.subr.bf16.mxu1 %v8691_v38  ;;  %v8772_v27 = vld [vmem:[#allocation3 + $0x4d4] ss:$36 sps:$4 sm:$0xff]  }
 0x810   :  { %v8767_v38 = vld [vmem:[#allocation3 + $0x50] ss:$36 sps:$4 sm:$0xff]  }
 0x811   :  { %6172 = vmatpush2.bf16.msra.mxu0 %v8693_v40  ;;  %v8770_v40 = vld [vmem:[#allocation3 + $0x4d0] ss:$36 sps:$4 sm:$0xff]  }
 0x812   :  { %6213 = vmatpush2.bf16.msra.mxu1 %v8694_v15  ;;  %6173 = vmatprep.subr.bf16.mxu0 %v8695_v17  ;;  %v8775_v15 = vld [vmem:[#allocation3 + $0xc] ss:$36 sps:$4 sm:$0xff]  }
 0x813   :  { %6214 = vmatprep.subr.bf16.mxu1 %v8697_v45  ;;  %v8778_v17 = vld [vmem:[#allocation3 + $0x48c] ss:$36 sps:$4 sm:$0xff]  }
 0x814   :  { %v8773_v45 = vld [vmem:[#allocation3 + $0x8] ss:$36 sps:$4 sm:$0xff]  }
 0x815   :  { %6174 = vmatpush2.bf16.msra.mxu0 %v8699_v48  ;;  %v8776_v48 = vld [vmem:[#allocation3 + $0x488] ss:$36 sps:$4 sm:$0xff]  }
 0x816   :  { %6215 = vmatpush2.bf16.msra.mxu1 %v8700_v51  ;;  %6175 = vmatprep.subr.bf16.mxu0 %v8701_v29  ;;  %v8781_v51 = vld [vmem:[#allocation3 + $0x444] ss:$36 sps:$4 sm:$0xff]  }
 0x817   :  { %6216 = vmatprep.subr.bf16.mxu1 %v8703_v32  ;;  %v8784_v29 = vld [vmem:[#allocation3 + $0x8c4] ss:$36 sps:$4 sm:$0xff]  }
 0x818   :  { %v8779_v32 = vld [vmem:[#allocation3 + $0x440] ss:$36 sps:$4 sm:$0xff]  }
 0x819   :  { %6176 = vmatpush2.bf16.msra.mxu0 %v8705_v8  ;;  %v8782_v8 = vld [vmem:[#allocation3 + $0x8c0] ss:$36 sps:$4 sm:$0xff]  }
 0x81a   :  { %6217 = vmatpush2.bf16.msra.mxu1 %v8706_v16  ;;  %6177 = vmatprep.subr.bf16.mxu0 %v8707_v36  ;;  %v8787_v16 = vld [vmem:[#allocation3 + $0x3fc] ss:$36 sps:$4 sm:$0xff]  }
 0x81b   :  { %6218 = vmatprep.subr.bf16.mxu1 %v8709_v19  ;;  %v8790_v36 = vld [vmem:[#allocation3 + $0x87c] ss:$36 sps:$4 sm:$0xff]  }
 0x81c   :  { %v8785_v19 = vld [vmem:[#allocation3 + $0x3f8] ss:$36 sps:$4 sm:$0xff]  }
 0x81d   :  { %6178 = vmatpush2.bf16.msra.mxu0 %v8711_v21  ;;  %v8788_v21 = vld [vmem:[#allocation3 + $0x878] ss:$36 sps:$4 sm:$0xff]  }
 0x81e   :  { %6219 = vmatpush2.bf16.msra.mxu1 %v8712_v30  ;;  %6179 = vmatprep.subr.bf16.mxu0 %v8713_v22  ;;  %v8793_v30 = vld [vmem:[#allocation3 + $0x3b4] ss:$36 sps:$4 sm:$0xff]  }
 0x81f   :  { %6220 = vmatprep.subr.bf16.mxu1 %v8715_v57  ;;  %v8796_v22 = vld [vmem:[#allocation3 + $0x834] ss:$36 sps:$4 sm:$0xff]  }
 0x820   :  { %v8791_v57 = vld [vmem:[#allocation3 + $0x3b0] ss:$36 sps:$4 sm:$0xff]  }
 0x821   :  { %6180 = vmatpush2.bf16.msra.mxu0 %v8717_v6  ;;  %v8794_v6 = vld [vmem:[#allocation3 + $0x830] ss:$36 sps:$4 sm:$0xff]  }
 0x822   :  { %6221 = vmatpush2.bf16.msra.mxu1 %v8718_v58  ;;  %6181 = vmatprep.subr.bf16.mxu0 %v8719_v43  ;;  %v8799_v58 = vld [vmem:[#allocation3 + $0x36c] ss:$36 sps:$4 sm:$0xff]  }
 0x823   :  { %6222 = vmatprep.subr.bf16.mxu1 %v8721_v49  ;;  %v8802_v43 = vld [vmem:[#allocation3 + $0x7ec] ss:$36 sps:$4 sm:$0xff]  }
 0x824   :  { %v8797_v49 = vld [vmem:[#allocation3 + $0x368] ss:$36 sps:$4 sm:$0xff]  }
 0x825   :  { %6182 = vmatpush2.bf16.msra.mxu0 %v8723_v46  ;;  %v8800_v46 = vld [vmem:[#allocation3 + $0x7e8] ss:$36 sps:$4 sm:$0xff]  }
 0x826   :  { %6223 = vmatpush2.bf16.msra.mxu1 %v8724_v59  ;;  %6183 = vmatprep.subr.bf16.mxu0 %v8725_v60  ;;  %v8805_v59 = vld [vmem:[#allocation3 + $0x324] ss:$36 sps:$4 sm:$0xff]  }
 0x827   :  { %6224 = vmatprep.subr.bf16.mxu1 %v8727_v61  ;;  %v8808_v60 = vld [vmem:[#allocation3 + $0x7a4] ss:$36 sps:$4 sm:$0xff]  }
 0x828   :  { %v8803_v61 = vld [vmem:[#allocation3 + $0x320] ss:$36 sps:$4 sm:$0xff]  }
 0x829   :  { %6184 = vmatpush2.bf16.msra.mxu0 %v8729_v14  ;;  %v8806_v14 = vld [vmem:[#allocation3 + $0x7a0] ss:$36 sps:$4 sm:$0xff]  }
 0x82a   :  { %6225 = vmatpush2.bf16.msra.mxu1 %v8730_v62  ;;  %6235 = vmatprep.subr.bf16.mxu0 %v8733_v63  ;;  %v8811_v62 = vld [vmem:[#allocation3 + $0x2dc] ss:$36 sps:$4 sm:$0xff]  }
 0x82b   :  { %6276 = vmatprep.subr.bf16.mxu1 %v8736_v0  ;;  %v8814_v63 = vld [vmem:[#allocation3 + $0x75c] ss:$36 sps:$4 sm:$0xff]  }
 0x82c   :  { %6186 = vmatmul.mubr.bf16.vlgmr.msra.gmra.mxu0 %v9991_v25  ;;  %v8809_v0 = vld [vmem:[#allocation3 + $0x2d8] ss:$36 sps:$4 sm:$0xff]  }
 0x82d   :  { %6227 = vmatmul.mubr.bf16.vlgmr.msra.gmra.mxu1 %v9995_v56  ;;  %6236 = vmatpush1.bf16.msra.mxu0 %v8731_v2  ;;  %v8812_v2 = vld [vmem:[#allocation3 + $0x758] ss:$36 sps:$4 sm:$0xff]  }
 0x82e   :  { %6277 = vmatpush1.bf16.msra.mxu1 %v8734_v1  ;;  %6237 = vmatprep.subr.bf16.mxu0 %v8739_v10  ;;  %v8817_v1 = vld [vmem:[#allocation3 + $0x294] ss:$36 sps:$4 sm:$0xff]  }
 0x82f   :  { %6278 = vmatprep.subr.bf16.mxu1 %v8742_v5  ;;  %6267 = vmatprep.mubr.bf16.mxu0 %v9993_v31  ;;  %v8820_v10 = vld [vmem:[#allocation3 + $0x714] ss:$36 sps:$4 sm:$0xff]  }
 0x830   :  { %6308 = vmatprep.mubr.bf16.mxu1 %v9997_v7  ;;  %v8815_v5 = vld [vmem:[#allocation3 + $0x290] ss:$36 sps:$4 sm:$0xff]  }
 0x831   :  { %6238 = vmatpush1.bf16.msra.mxu0 %v8737_v42  ;;  %v8818_v42 = vld [vmem:[#allocation3 + $0x710] ss:$36 sps:$4 sm:$0xff]  }
 0x832   :  { %6279 = vmatpush1.bf16.msra.mxu1 %v8740_v44  ;;  %6239 = vmatprep.subr.bf16.mxu0 %v8745_v47  ;;  %v8823_v44 = vld [vmem:[#allocation3 + $0x24c] ss:$36 sps:$4 sm:$0xff]  }
 0x833   :  { %6280 = vmatprep.subr.bf16.mxu1 %v8748_v53  ;;  %v8826_v47 = vld [vmem:[#allocation3 + $0x6cc] ss:$36 sps:$4 sm:$0xff]  }
 0x834   :  { %v8821_v53 = vld [vmem:[#allocation3 + $0x248] ss:$36 sps:$4 sm:$0xff]  }
 0x835   :  { %6240 = vmatpush1.bf16.msra.mxu0 %v8743_v13  ;;  %v8824_v13 = vld [vmem:[#allocation3 + $0x6c8] ss:$36 sps:$4 sm:$0xff]  }
 0x836   :  { %6281 = vmatpush1.bf16.msra.mxu1 %v8746_v9  ;;  %6241 = vmatprep.subr.bf16.mxu0 %v8751_v11  ;;  %v8829_v9 = vld [vmem:[#allocation3 + $0x20c] ss:$36 sps:$4 sm:$0xff]  }
 0x837   :  { %6282 = vmatprep.subr.bf16.mxu1 %v8754_v18  ;;  %v8832_v11 = vld [vmem:[#allocation3 + $0x68c] ss:$36 sps:$4 sm:$0xff]  }
 0x838   :  { %v8827_v18 = vld [vmem:[#allocation3 + $0x208] ss:$36 sps:$4 sm:$0xff]  }
 0x839   :  { %6242 = vmatpush1.bf16.msra.mxu0 %v8749_v20  ;;  %v8830_v20 = vld [vmem:[#allocation3 + $0x688] ss:$36 sps:$4 sm:$0xff]  }
 0x83a   :  { %6283 = vmatpush1.bf16.msra.mxu1 %v8752_v23  ;;  %6243 = vmatprep.subr.bf16.mxu0 %v8757_v26  ;;  %v8835_v23 = vld [vmem:[#allocation3 + $0x1c4] ss:$36 sps:$4 sm:$0xff]  }
 0x83b   :  { %6284 = vmatprep.subr.bf16.mxu1 %v8760_v28  ;;  %v8838_v26 = vld [vmem:[#allocation3 + $0x644] ss:$36 sps:$4 sm:$0xff]  }
 0x83c   :  { %v8833_v28 = vld [vmem:[#allocation3 + $0x1c0] ss:$36 sps:$4 sm:$0xff]  }
 0x83d   :  { %6244 = vmatpush1.bf16.msra.mxu0 %v8755_v12  ;;  %v8836_v12 = vld [vmem:[#allocation3 + $0x640] ss:$36 sps:$4 sm:$0xff]  }
 0x83e   :  { %6285 = vmatpush1.bf16.msra.mxu1 %v8758_v33  ;;  %6245 = vmatprep.subr.bf16.mxu0 %v8763_v34  ;;  %v8841_v33 = vld [vmem:[#allocation3 + $0x17c] ss:$36 sps:$4 sm:$0xff]  }
 0x83f   :  { %6286 = vmatprep.subr.bf16.mxu1 %v8766_v35  ;;  %v8844_v34 = vld [vmem:[#allocation3 + $0x5fc] ss:$36 sps:$4 sm:$0xff]  }
 0x840   :  { %v8839_v35 = vld [vmem:[#allocation3 + $0x178] ss:$36 sps:$4 sm:$0xff]  }
 0x841   :  { %6246 = vmatpush1.bf16.msra.mxu0 %v8761_v3  ;;  %v8842_v3 = vld [vmem:[#allocation3 + $0x5f8] ss:$36 sps:$4 sm:$0xff]  }
 0x842   :  { %6287 = vmatpush1.bf16.msra.mxu1 %v8764_v37  ;;  %6247 = vmatprep.subr.bf16.mxu0 %v8769_v24  ;;  %v8847_v37 = vld [vmem:[#allocation3 + $0x134] ss:$36 sps:$4 sm:$0xff]  }
 0x843   :  { %6288 = vmatprep.subr.bf16.mxu1 %v8772_v27  ;;  %v8850_v24 = vld [vmem:[#allocation3 + $0x5b4] ss:$36 sps:$4 sm:$0xff]  }
 0x844   :  { %v8845_v27 = vld [vmem:[#allocation3 + $0x130] ss:$36 sps:$4 sm:$0xff]  }
 0x845   :  { %6248 = vmatpush1.bf16.msra.mxu0 %v8767_v38  ;;  %v8848_v38 = vld [vmem:[#allocation3 + $0x5b0] ss:$36 sps:$4 sm:$0xff]  }
 0x846   :  { %6289 = vmatpush1.bf16.msra.mxu1 %v8770_v40  ;;  %6249 = vmatprep.subr.bf16.mxu0 %v8775_v15  ;;  %v8853_v40 = vld [vmem:[#allocation3 + $0xec] ss:$36 sps:$4 sm:$0xff]  }
 0x847   :  { %6290 = vmatprep.subr.bf16.mxu1 %v8778_v17  ;;  %v8856_v15 = vld [vmem:[#allocation3 + $0x56c] ss:$36 sps:$4 sm:$0xff]  }
 0x848   :  { %v8851_v17 = vld [vmem:[#allocation3 + $0xe8] ss:$36 sps:$4 sm:$0xff]  }
 0x849   :  { %6250 = vmatpush1.bf16.msra.mxu0 %v8773_v45  ;;  %v8854_v45 = vld [vmem:[#allocation3 + $0x568] ss:$36 sps:$4 sm:$0xff]  }
 0x84a   :  { %6291 = vmatpush1.bf16.msra.mxu1 %v8776_v48  ;;  %6251 = vmatprep.subr.bf16.mxu0 %v8781_v51  ;;  %v8859_v48 = vld [vmem:[#allocation3 + $0xa4] ss:$36 sps:$4 sm:$0xff]  }
 0x84b   :  { %6292 = vmatprep.subr.bf16.mxu1 %v8784_v29  ;;  %v8862_v51 = vld [vmem:[#allocation3 + $0x524] ss:$36 sps:$4 sm:$0xff]  }
 0x84c   :  { %v8857_v29 = vld [vmem:[#allocation3 + $0xa0] ss:$36 sps:$4 sm:$0xff]  }
 0x84d   :  { %6252 = vmatpush2.bf16.msra.mxu0 %v8779_v32  ;;  %v8860_v32 = vld [vmem:[#allocation3 + $0x520] ss:$36 sps:$4 sm:$0xff]  }
 0x84e   :  { %6293 = vmatpush2.bf16.msra.mxu1 %v8782_v8  ;;  %6253 = vmatprep.subr.bf16.mxu0 %v8787_v16  ;;  %v8865_v8 = vld [vmem:[#allocation3 + $0x5c] ss:$36 sps:$4 sm:$0xff]  }
 0x84f   :  { %6294 = vmatprep.subr.bf16.mxu1 %v8790_v36  ;;  %v8868_v16 = vld [vmem:[#allocation3 + $0x4dc] ss:$36 sps:$4 sm:$0xff]  }
 0x850   :  { %v8863_v36 = vld [vmem:[#allocation3 + $0x58] ss:$36 sps:$4 sm:$0xff]  }
 0x851   :  { %6254 = vmatpush2.bf16.msra.mxu0 %v8785_v19  ;;  %v8866_v19 = vld [vmem:[#allocation3 + $0x4d8] ss:$36 sps:$4 sm:$0xff]  }
 0x852   :  { %6295 = vmatpush2.bf16.msra.mxu1 %v8788_v21  ;;  %6255 = vmatprep.subr.bf16.mxu0 %v8793_v30  ;;  %v8871_v21 = vld [vmem:[#allocation3 + $0x14] ss:$36 sps:$4 sm:$0xff]  }
 0x853   :  { %6296 = vmatprep.subr.bf16.mxu1 %v8796_v22  ;;  %v8874_v30 = vld [vmem:[#allocation3 + $0x494] ss:$36 sps:$4 sm:$0xff]  }
 0x854   :  { %v8869_v22 = vld [vmem:[#allocation3 + $0x10] ss:$36 sps:$4 sm:$0xff]  }
 0x855   :  { %6256 = vmatpush2.bf16.msra.mxu0 %v8791_v57  ;;  %v8872_v57 = vld [vmem:[#allocation3 + $0x490] ss:$36 sps:$4 sm:$0xff]  }
 0x856   :  { %6297 = vmatpush2.bf16.msra.mxu1 %v8794_v6  ;;  %6257 = vmatprep.subr.bf16.mxu0 %v8799_v58  ;;  %v8877_v6 = vld [vmem:[#allocation3 + $0x44c] ss:$36 sps:$4 sm:$0xff]  }
 0x857   :  { %6298 = vmatprep.subr.bf16.mxu1 %v8802_v43  ;;  %v8880_v58 = vld [vmem:[#allocation3 + $0x8cc] ss:$36 sps:$4 sm:$0xff]  }
 0x858   :  { %v8875_v43 = vld [vmem:[#allocation3 + $0x448] ss:$36 sps:$4 sm:$0xff]  }
 0x859   :  { %6258 = vmatpush2.bf16.msra.mxu0 %v8797_v49  ;;  %v8878_v49 = vld [vmem:[#allocation3 + $0x8c8] ss:$36 sps:$4 sm:$0xff]  }
 0x85a   :  { %6299 = vmatpush2.bf16.msra.mxu1 %v8800_v46  ;;  %6259 = vmatprep.subr.bf16.mxu0 %v8805_v59  ;;  %v8883_v46 = vld [vmem:[#allocation3 + $0x404] ss:$36 sps:$4 sm:$0xff]  }
 0x85b   :  { %6300 = vmatprep.subr.bf16.mxu1 %v8808_v60  ;;  %v8886_v59 = vld [vmem:[#allocation3 + $0x884] ss:$36 sps:$4 sm:$0xff]  }
 0x85c   :  { %v8881_v60 = vld [vmem:[#allocation3 + $0x400] ss:$36 sps:$4 sm:$0xff]  }
 0x85d   :  { %6260 = vmatpush2.bf16.msra.mxu0 %v8803_v61  ;;  %v8884_v61 = vld [vmem:[#allocation3 + $0x880] ss:$36 sps:$4 sm:$0xff]  }
 0x85e   :  { %6301 = vmatpush2.bf16.msra.mxu1 %v8806_v14  ;;  %6261 = vmatprep.subr.bf16.mxu0 %v8811_v62  ;;  %v8889_v14 = vld [vmem:[#allocation3 + $0x3bc] ss:$36 sps:$4 sm:$0xff]  }
 0x85f   :  { %6302 = vmatprep.subr.bf16.mxu1 %v8814_v63  ;;  %v8892_v62 = vld [vmem:[#allocation3 + $0x83c] ss:$36 sps:$4 sm:$0xff]  }
 0x860   :  { %v8887_v63 = vld [vmem:[#allocation3 + $0x3b8] ss:$36 sps:$4 sm:$0xff]  }
 0x861   :  { %6262 = vmatpush2.bf16.msra.mxu0 %v8809_v0  ;;  %v8890_v0 = vld [vmem:[#allocation3 + $0x838] ss:$36 sps:$4 sm:$0xff]  }
 0x862   :  { %6303 = vmatpush2.bf16.msra.mxu1 %v8812_v2  ;;  %6263 = vmatprep.subr.bf16.mxu0 %v8817_v1  ;;  %v8895_v2 = vld [vmem:[#allocation3 + $0x374] ss:$36 sps:$4 sm:$0xff]  }
 0x863   :  { %6304 = vmatprep.subr.bf16.mxu1 %v8820_v10  ;;  %v8898_v1 = vld [vmem:[#allocation3 + $0x7f4] ss:$36 sps:$4 sm:$0xff]  }
 0x864   :  { %v8893_v10 = vld [vmem:[#allocation3 + $0x370] ss:$36 sps:$4 sm:$0xff]  }
 0x865   :  { %6264 = vmatpush2.bf16.msra.mxu0 %v8815_v5  ;;  %v8896_v5 = vld [vmem:[#allocation3 + $0x7f0] ss:$36 sps:$4 sm:$0xff]  }
 0x866   :  { %6305 = vmatpush2.bf16.msra.mxu1 %v8818_v42  ;;  %6265 = vmatprep.subr.bf16.mxu0 %v8823_v44  ;;  %v8901_v42 = vld [vmem:[#allocation3 + $0x32c] ss:$36 sps:$4 sm:$0xff]  }
 0x867   :  { %6306 = vmatprep.subr.bf16.mxu1 %v8826_v47  ;;  %v8904_v44 = vld [vmem:[#allocation3 + $0x7ac] ss:$36 sps:$4 sm:$0xff]  }
 0x868   :  { %v8899_v47 = vld [vmem:[#allocation3 + $0x328] ss:$36 sps:$4 sm:$0xff]  }
 0x869   :  { %6266 = vmatpush2.bf16.msra.mxu0 %v8821_v53  ;;  %v8902_v53 = vld [vmem:[#allocation3 + $0x7a8] ss:$36 sps:$4 sm:$0xff]  }
 0x86a   :  { %6307 = vmatpush2.bf16.msra.mxu1 %v8824_v13  ;;  %6317 = vmatprep.subr.bf16.mxu0 %v8829_v9  ;;  %v8907_v13 = vld [vmem:[#allocation3 + $0x2e4] ss:$36 sps:$4 sm:$0xff]  }
 0x86b   :  { %6358 = vmatprep.subr.bf16.mxu1 %v8832_v11  ;;  %v8910_v9 = vld [vmem:[#allocation3 + $0x764] ss:$36 sps:$4 sm:$0xff]  }
 0x86c   :  { %6268 = vmatmul.mubr.bf16.vlgmr.msra.gmra.mxu0 %v9991_v25  ;;  %v8905_v11 = vld [vmem:[#allocation3 + $0x2e0] ss:$36 sps:$4 sm:$0xff]  }
 0x86d   :  { %6309 = vmatmul.mubr.bf16.vlgmr.msra.gmra.mxu1 %v9995_v56  ;;  %6318 = vmatpush1.bf16.msra.mxu0 %v8827_v18  ;;  %v8908_v18 = vld [vmem:[#allocation3 + $0x760] ss:$36 sps:$4 sm:$0xff]  }
 0x86e   :  { %6359 = vmatpush1.bf16.msra.mxu1 %v8830_v20  ;;  %6319 = vmatprep.subr.bf16.mxu0 %v8835_v23  ;;  %v8913_v20 = vld [vmem:[#allocation3 + $0x29c] ss:$36 sps:$4 sm:$0xff]  }
 0x86f   :  { %6360 = vmatprep.subr.bf16.mxu1 %v8838_v26  ;;  %6349 = vmatprep.mubr.bf16.mxu0 %v9993_v31  ;;  %v8916_v23 = vld [vmem:[#allocation3 + $0x71c] ss:$36 sps:$4 sm:$0xff]  }
 0x870   :  { %6390 = vmatprep.mubr.bf16.mxu1 %v9997_v7  ;;  %v8911_v26 = vld [vmem:[#allocation3 + $0x298] ss:$36 sps:$4 sm:$0xff]  }
 0x871   :  { %6320 = vmatpush1.bf16.msra.mxu0 %v8833_v28  ;;  %v8914_v28 = vld [vmem:[#allocation3 + $0x718] ss:$36 sps:$4 sm:$0xff]  }
 0x872   :  { %6361 = vmatpush1.bf16.msra.mxu1 %v8836_v12  ;;  %6321 = vmatprep.subr.bf16.mxu0 %v8841_v33  ;;  %v8919_v12 = vld [vmem:[#allocation3 + $0x254] ss:$36 sps:$4 sm:$0xff]  }
 0x873   :  { %6362 = vmatprep.subr.bf16.mxu1 %v8844_v34  ;;  %v8922_v33 = vld [vmem:[#allocation3 + $0x6d4] ss:$36 sps:$4 sm:$0xff]  }
 0x874   :  { %v8917_v34 = vld [vmem:[#allocation3 + $0x250] ss:$36 sps:$4 sm:$0xff]  }
 0x875   :  { %6322 = vmatpush1.bf16.msra.mxu0 %v8839_v35  ;;  %v8920_v35 = vld [vmem:[#allocation3 + $0x6d0] ss:$36 sps:$4 sm:$0xff]  }
 0x876   :  { %6363 = vmatpush1.bf16.msra.mxu1 %v8842_v3  ;;  %6323 = vmatprep.subr.bf16.mxu0 %v8847_v37  ;;  %v8925_v3 = vld [vmem:[#allocation3 + $0x214] ss:$36 sps:$4 sm:$0xff]  }
 0x877   :  { %6364 = vmatprep.subr.bf16.mxu1 %v8850_v24  ;;  %v8928_v37 = vld [vmem:[#allocation3 + $0x694] ss:$36 sps:$4 sm:$0xff]  }
 0x878   :  { %v8923_v24 = vld [vmem:[#allocation3 + $0x210] ss:$36 sps:$4 sm:$0xff]  }
 0x879   :  { %6324 = vmatpush1.bf16.msra.mxu0 %v8845_v27  ;;  %v8926_v27 = vld [vmem:[#allocation3 + $0x690] ss:$36 sps:$4 sm:$0xff]  }
 0x87a   :  { %6365 = vmatpush1.bf16.msra.mxu1 %v8848_v38  ;;  %6325 = vmatprep.subr.bf16.mxu0 %v8853_v40  ;;  %v8931_v38 = vld [vmem:[#allocation3 + $0x1cc] ss:$36 sps:$4 sm:$0xff]  }
 0x87b   :  { %6366 = vmatprep.subr.bf16.mxu1 %v8856_v15  ;;  %v8934_v40 = vld [vmem:[#allocation3 + $0x64c] ss:$36 sps:$4 sm:$0xff]  }
 0x87c   :  { %v8929_v15 = vld [vmem:[#allocation3 + $0x1c8] ss:$36 sps:$4 sm:$0xff]  }
 0x87d   :  { %6326 = vmatpush1.bf16.msra.mxu0 %v8851_v17  ;;  %v8932_v17 = vld [vmem:[#allocation3 + $0x648] ss:$36 sps:$4 sm:$0xff]  }
 0x87e   :  { %6367 = vmatpush1.bf16.msra.mxu1 %v8854_v45  ;;  %6327 = vmatprep.subr.bf16.mxu0 %v8859_v48  ;;  %v8937_v45 = vld [vmem:[#allocation3 + $0x184] ss:$36 sps:$4 sm:$0xff]  }
 0x87f   :  { %6368 = vmatprep.subr.bf16.mxu1 %v8862_v51  ;;  %v8940_v48 = vld [vmem:[#allocation3 + $0x604] ss:$36 sps:$4 sm:$0xff]  }
 0x880   :  { %v8935_v51 = vld [vmem:[#allocation3 + $0x180] ss:$36 sps:$4 sm:$0xff]  }
 0x881   :  { %6328 = vmatpush1.bf16.msra.mxu0 %v8857_v29  ;;  %v8938_v29 = vld [vmem:[#allocation3 + $0x600] ss:$36 sps:$4 sm:$0xff]  }
 0x882   :  { %6369 = vmatpush1.bf16.msra.mxu1 %v8860_v32  ;;  %6329 = vmatprep.subr.bf16.mxu0 %v8865_v8  ;;  %v8943_v32 = vld [vmem:[#allocation3 + $0x13c] ss:$36 sps:$4 sm:$0xff]  }
 0x883   :  { %6370 = vmatprep.subr.bf16.mxu1 %v8868_v16  ;;  %v8946_v8 = vld [vmem:[#allocation3 + $0x5bc] ss:$36 sps:$4 sm:$0xff]  }
 0x884   :  { %v8941_v16 = vld [vmem:[#allocation3 + $0x138] ss:$36 sps:$4 sm:$0xff]  }
 0x885   :  { %6330 = vmatpush1.bf16.msra.mxu0 %v8863_v36  ;;  %v8944_v36 = vld [vmem:[#allocation3 + $0x5b8] ss:$36 sps:$4 sm:$0xff]  }
 0x886   :  { %6371 = vmatpush1.bf16.msra.mxu1 %v8866_v19  ;;  %6331 = vmatprep.subr.bf16.mxu0 %v8871_v21  ;;  %v8949_v19 = vld [vmem:[#allocation3 + $0xf4] ss:$36 sps:$4 sm:$0xff]  }
 0x887   :  { %6372 = vmatprep.subr.bf16.mxu1 %v8874_v30  ;;  %v8952_v21 = vld [vmem:[#allocation3 + $0x574] ss:$36 sps:$4 sm:$0xff]  }
 0x888   :  { %v8947_v30 = vld [vmem:[#allocation3 + $0xf0] ss:$36 sps:$4 sm:$0xff]  }
 0x889   :  { %6332 = vmatpush1.bf16.msra.mxu0 %v8869_v22  ;;  %v8950_v22 = vld [vmem:[#allocation3 + $0x570] ss:$36 sps:$4 sm:$0xff]  }
 0x88a   :  { %6373 = vmatpush1.bf16.msra.mxu1 %v8872_v57  ;;  %6333 = vmatprep.subr.bf16.mxu0 %v8877_v6  ;;  %v8955_v57 = vld [vmem:[#allocation3 + $0xac] ss:$36 sps:$4 sm:$0xff]  }
 0x88b   :  { %6374 = vmatprep.subr.bf16.mxu1 %v8880_v58  ;;  %v8958_v6 = vld [vmem:[#allocation3 + $0x52c] ss:$36 sps:$4 sm:$0xff]  }
 0x88c   :  { %v8953_v58 = vld [vmem:[#allocation3 + $0xa8] ss:$36 sps:$4 sm:$0xff]  }
 0x88d   :  { %6334 = vmatpush2.bf16.msra.mxu0 %v8875_v43  ;;  %v8956_v43 = vld [vmem:[#allocation3 + $0x528] ss:$36 sps:$4 sm:$0xff]  }
 0x88e   :  { %6375 = vmatpush2.bf16.msra.mxu1 %v8878_v49  ;;  %6335 = vmatprep.subr.bf16.mxu0 %v8883_v46  ;;  %v8961_v49 = vld [vmem:[#allocation3 + $0x64] ss:$36 sps:$4 sm:$0xff]  }
 0x88f   :  { %6376 = vmatprep.subr.bf16.mxu1 %v8886_v59  ;;  %v8964_v46 = vld [vmem:[#allocation3 + $0x4e4] ss:$36 sps:$4 sm:$0xff]  }
 0x890   :  { %v8959_v59 = vld [vmem:[#allocation3 + $0x60] ss:$36 sps:$4 sm:$0xff]  }
 0x891   :  { %6336 = vmatpush2.bf16.msra.mxu0 %v8881_v60  ;;  %v8962_v60 = vld [vmem:[#allocation3 + $0x4e0] ss:$36 sps:$4 sm:$0xff]  }
 0x892   :  { %6377 = vmatpush2.bf16.msra.mxu1 %v8884_v61  ;;  %6337 = vmatprep.subr.bf16.mxu0 %v8889_v14  ;;  %v8967_v61 = vld [vmem:[#allocation3 + $0x1c] ss:$36 sps:$4 sm:$0xff]  }
 0x893   :  { %6378 = vmatprep.subr.bf16.mxu1 %v8892_v62  ;;  %v8970_v14 = vld [vmem:[#allocation3 + $0x49c] ss:$36 sps:$4 sm:$0xff]  }
 0x894   :  { %v8965_v62 = vld [vmem:[#allocation3 + $0x18] ss:$36 sps:$4 sm:$0xff]  }
 0x895   :  { %6338 = vmatpush2.bf16.msra.mxu0 %v8887_v63  ;;  %v8968_v63 = vld [vmem:[#allocation3 + $0x498] ss:$36 sps:$4 sm:$0xff]  }
 0x896   :  { %6379 = vmatpush2.bf16.msra.mxu1 %v8890_v0  ;;  %6339 = vmatprep.subr.bf16.mxu0 %v8895_v2  ;;  %v8973_v0 = vld [vmem:[#allocation3 + $0x454] ss:$36 sps:$4 sm:$0xff]  }
 0x897   :  { %6380 = vmatprep.subr.bf16.mxu1 %v8898_v1  ;;  %v8976_v2 = vld [vmem:[#allocation3 + $0x8d4] ss:$36 sps:$4 sm:$0xff]  }
 0x898   :  { %v8971_v1 = vld [vmem:[#allocation3 + $0x450] ss:$36 sps:$4 sm:$0xff]  }
 0x899   :  { %6340 = vmatpush2.bf16.msra.mxu0 %v8893_v10  ;;  %v8974_v10 = vld [vmem:[#allocation3 + $0x8d0] ss:$36 sps:$4 sm:$0xff]  }
 0x89a   :  { %6381 = vmatpush2.bf16.msra.mxu1 %v8896_v5  ;;  %6341 = vmatprep.subr.bf16.mxu0 %v8901_v42  ;;  %v8979_v5 = vld [vmem:[#allocation3 + $0x40c] ss:$36 sps:$4 sm:$0xff]  }
 0x89b   :  { %6382 = vmatprep.subr.bf16.mxu1 %v8904_v44  ;;  %v8982_v42 = vld [vmem:[#allocation3 + $0x88c] ss:$36 sps:$4 sm:$0xff]  }
 0x89c   :  { %v8977_v44 = vld [vmem:[#allocation3 + $0x408] ss:$36 sps:$4 sm:$0xff]  }
 0x89d   :  { %6342 = vmatpush2.bf16.msra.mxu0 %v8899_v47  ;;  %v8980_v47 = vld [vmem:[#allocation3 + $0x888] ss:$36 sps:$4 sm:$0xff]  }
 0x89e   :  { %6383 = vmatpush2.bf16.msra.mxu1 %v8902_v53  ;;  %6343 = vmatprep.subr.bf16.mxu0 %v8907_v13  ;;  %v8985_v53 = vld [vmem:[#allocation3 + $0x3c4] ss:$36 sps:$4 sm:$0xff]  }
 0x89f   :  { %6384 = vmatprep.subr.bf16.mxu1 %v8910_v9  ;;  %v8988_v13 = vld [vmem:[#allocation3 + $0x844] ss:$36 sps:$4 sm:$0xff]  }
 0x8a0   :  { %v8983_v9 = vld [vmem:[#allocation3 + $0x3c0] ss:$36 sps:$4 sm:$0xff]  }
 0x8a1   :  { %6344 = vmatpush2.bf16.msra.mxu0 %v8905_v11  ;;  %v8986_v11 = vld [vmem:[#allocation3 + $0x840] ss:$36 sps:$4 sm:$0xff]  }
 0x8a2   :  { %6385 = vmatpush2.bf16.msra.mxu1 %v8908_v18  ;;  %6345 = vmatprep.subr.bf16.mxu0 %v8913_v20  ;;  %v8991_v18 = vld [vmem:[#allocation3 + $0x37c] ss:$36 sps:$4 sm:$0xff]  }
 0x8a3   :  { %6386 = vmatprep.subr.bf16.mxu1 %v8916_v23  ;;  %v8994_v20 = vld [vmem:[#allocation3 + $0x7fc] ss:$36 sps:$4 sm:$0xff]  }
 0x8a4   :  { %v8989_v23 = vld [vmem:[#allocation3 + $0x378] ss:$36 sps:$4 sm:$0xff]  }
 0x8a5   :  { %6346 = vmatpush2.bf16.msra.mxu0 %v8911_v26  ;;  %v8992_v26 = vld [vmem:[#allocation3 + $0x7f8] ss:$36 sps:$4 sm:$0xff]  }
 0x8a6   :  { %6387 = vmatpush2.bf16.msra.mxu1 %v8914_v28  ;;  %6347 = vmatprep.subr.bf16.mxu0 %v8919_v12  ;;  %v8997_v28 = vld [vmem:[#allocation3 + $0x334] ss:$36 sps:$4 sm:$0xff]  }
 0x8a7   :  { %6388 = vmatprep.subr.bf16.mxu1 %v8922_v33  ;;  %v9000_v12 = vld [vmem:[#allocation3 + $0x7b4] ss:$36 sps:$4 sm:$0xff]  }
 0x8a8   :  { %v8995_v33 = vld [vmem:[#allocation3 + $0x330] ss:$36 sps:$4 sm:$0xff]  }
 0x8a9   :  { %6348 = vmatpush2.bf16.msra.mxu0 %v8917_v34  ;;  %v8998_v34 = vld [vmem:[#allocation3 + $0x7b0] ss:$36 sps:$4 sm:$0xff]  }
 0x8aa   :  { %6389 = vmatpush2.bf16.msra.mxu1 %v8920_v35  ;;  %6399 = vmatprep.subr.bf16.mxu0 %v8925_v3  ;;  %v9003_v35 = vld [vmem:[#allocation3 + $0x2ec] ss:$36 sps:$4 sm:$0xff]  }
 0x8ab   :  { %6440 = vmatprep.subr.bf16.mxu1 %v8928_v37  ;;  %v9006_v3 = vld [vmem:[#allocation3 + $0x76c] ss:$36 sps:$4 sm:$0xff]  }
 0x8ac   :  { %6350 = vmatmul.mubr.bf16.vlgmr.msra.gmra.mxu0 %v9991_v25  ;;  %v9001_v37 = vld [vmem:[#allocation3 + $0x2e8] ss:$36 sps:$4 sm:$0xff]  }
 0x8ad   :  { %6391 = vmatmul.mubr.bf16.vlgmr.msra.gmra.mxu1 %v9995_v56  ;;  %6400 = vmatpush1.bf16.msra.mxu0 %v8923_v24  ;;  %v9004_v24 = vld [vmem:[#allocation3 + $0x768] ss:$36 sps:$4 sm:$0xff]  }
 0x8ae   :  { %6441 = vmatpush1.bf16.msra.mxu1 %v8926_v27  ;;  %6401 = vmatprep.subr.bf16.mxu0 %v8931_v38  ;;  %v9009_v27 = vld [vmem:[#allocation3 + $0x2a4] ss:$36 sps:$4 sm:$0xff]  }
 0x8af   :  { %6442 = vmatprep.subr.bf16.mxu1 %v8934_v40  ;;  %6431 = vmatprep.mubr.bf16.mxu0 %v9993_v31  ;;  %v9012_v38 = vld [vmem:[#allocation3 + $0x724] ss:$36 sps:$4 sm:$0xff]  }
 0x8b0   :  { %6472 = vmatprep.mubr.bf16.mxu1 %v9997_v7  ;;  %v9007_v40 = vld [vmem:[#allocation3 + $0x2a0] ss:$36 sps:$4 sm:$0xff]  }
 0x8b1   :  { %6402 = vmatpush1.bf16.msra.mxu0 %v8929_v15  ;;  %v9010_v15 = vld [vmem:[#allocation3 + $0x720] ss:$36 sps:$4 sm:$0xff]  }
 0x8b2   :  { %6443 = vmatpush1.bf16.msra.mxu1 %v8932_v17  ;;  %6403 = vmatprep.subr.bf16.mxu0 %v8937_v45  ;;  %v9015_v17 = vld [vmem:[#allocation3 + $0x25c] ss:$36 sps:$4 sm:$0xff]  }
 0x8b3   :  { %6444 = vmatprep.subr.bf16.mxu1 %v8940_v48  ;;  %v9018_v45 = vld [vmem:[#allocation3 + $0x6dc] ss:$36 sps:$4 sm:$0xff]  }
 0x8b4   :  { %v9013_v48 = vld [vmem:[#allocation3 + $0x258] ss:$36 sps:$4 sm:$0xff]  }
 0x8b5   :  { %6404 = vmatpush1.bf16.msra.mxu0 %v8935_v51  ;;  %v9016_v51 = vld [vmem:[#allocation3 + $0x6d8] ss:$36 sps:$4 sm:$0xff]  }
 0x8b6   :  { %6445 = vmatpush1.bf16.msra.mxu1 %v8938_v29  ;;  %6405 = vmatprep.subr.bf16.mxu0 %v8943_v32  ;;  %v9019_v29 = vld [vmem:[#allocation3 + $0x458] ss:$36 sps:$4 sm:$0xff]  }
 0x8b7   :  { %6446 = vmatprep.subr.bf16.mxu1 %v8946_v8  ;;  %v9020_v32 = vld [vmem:[#allocation3 + $0x8d8] ss:$36 sps:$4 sm:$0xff]  }
 0x8b8   :  { %v9021_v8 = vld [vmem:[#allocation3 + $0x218] ss:$36 sps:$4 sm:$0xff]  }
 0x8b9   :  { %6406 = vmatpush1.bf16.msra.mxu0 %v8941_v16  ;;  %v9022_v16 = vld [vmem:[#allocation3 + $0x698] ss:$36 sps:$4 sm:$0xff]  }
 0x8ba   :  { %6447 = vmatpush1.bf16.msra.mxu1 %v8944_v36  ;;  %6407 = vmatprep.subr.bf16.mxu0 %v8949_v19  ;;  %v9023_v36 = vld [vmem:[#allocation3 + $0x410] ss:$36 sps:$4 sm:$0xff]  }
 0x8bb   :  { %6448 = vmatprep.subr.bf16.mxu1 %v8952_v21  ;;  %v9024_v19 = vld [vmem:[#allocation3 + $0x890] ss:$36 sps:$4 sm:$0xff]  }
 0x8bd   :  { %6408 = vmatpush1.bf16.msra.mxu0 %v8947_v30 }
 0x8be   :  { %6449 = vmatpush1.bf16.msra.mxu1 %v8950_v22  ;;  %6409 = vmatprep.subr.bf16.mxu0 %v8955_v57  ;;  %v9025_v57 = vld [vmem:[#allocation3 + $0x1d0] ss:$36 sps:$4 sm:$0xff]  }
 0x8bf   :  { %6450 = vmatprep.subr.bf16.mxu1 %v8958_v6  ;;  %v9026_v6 = vld [vmem:[#allocation3 + $0x650] ss:$36 sps:$4 sm:$0xff]  }
 0x8c1   :  { %6410 = vmatpush1.bf16.msra.mxu0 %v8953_v58 }
 0x8c2   :  { %6451 = vmatpush1.bf16.msra.mxu1 %v8956_v43  ;;  %6411 = vmatprep.subr.bf16.mxu0 %v8961_v49  ;;  %v9027_v49 = vld [vmem:[#allocation3 + $0x3c8] ss:$36 sps:$4 sm:$0xff]  }
 0x8c3   :  { %6452 = vmatprep.subr.bf16.mxu1 %v8964_v46  ;;  %v9028_v46 = vld [vmem:[#allocation3 + $0x848] ss:$36 sps:$4 sm:$0xff]  }
 0x8c5   :  { %6412 = vmatpush1.bf16.msra.mxu0 %v8959_v59 }
 0x8c6   :  { %6453 = vmatpush1.bf16.msra.mxu1 %v8962_v60  ;;  %6413 = vmatprep.subr.bf16.mxu0 %v8967_v61 }
 0x8c7   :  { %6454 = vmatprep.subr.bf16.mxu1 %v8970_v14  ;;  %v9029_v14 = vld [vmem:[#allocation3 + $0x188] ss:$36 sps:$4 sm:$0xff]  }
 0x8c9   :  { %6414 = vmatpush1.bf16.msra.mxu0 %v8965_v62  ;;  %v9030_v62 = vld [vmem:[#allocation3 + $0x608] ss:$36 sps:$4 sm:$0xff]  }
 0x8ca   :  { %6455 = vmatpush1.bf16.msra.mxu1 %v8968_v63  ;;  %6415 = vmatprep.subr.bf16.mxu0 %v8973_v0 }
 0x8cb   :  { %6456 = vmatprep.subr.bf16.mxu1 %v8976_v2  ;;  %v9031_v2 = vld [vmem:[#allocation3 + $0x380] ss:$36 sps:$4 sm:$0xff]  }
 0x8cd   :  { %6416 = vmatpush2.bf16.msra.mxu0 %v8971_v1  ;;  %v9032_v1 = vld [vmem:[#allocation3 + $0x800] ss:$36 sps:$4 sm:$0xff]  }
 0x8ce   :  { %6457 = vmatpush2.bf16.msra.mxu1 %v8974_v10  ;;  %6417 = vmatprep.subr.bf16.mxu0 %v8979_v5  ;;  %v9033_v10 = vld [vmem:[#allocation3 + $0x140] ss:$36 sps:$4 sm:$0xff]  }
 0x8cf   :  { %6458 = vmatprep.subr.bf16.mxu1 %v8982_v42  ;;  %v9034_v5 = vld [vmem:[#allocation3 + $0x5c0] ss:$36 sps:$4 sm:$0xff]   ;;  %v9037_v42 = vld [vmem:[#allocation3 + $0xf8] ss:$36 sps:$4 sm:$0xff]  }
 0x8d1   :  { %6418 = vmatpush2.bf16.msra.mxu0 %v8977_v44  ;;  %v9038_v44 = vld [vmem:[#allocation3 + $0x578] ss:$36 sps:$4 sm:$0xff]  }
 0x8d2   :  { %6459 = vmatpush2.bf16.msra.mxu1 %v8980_v47  ;;  %6419 = vmatprep.subr.bf16.mxu0 %v8985_v53  ;;  %v9039_v47 = vld [vmem:[#allocation3 + $0x2f0] ss:$36 sps:$4 sm:$0xff]  }
 0x8d3   :  { %6460 = vmatprep.subr.bf16.mxu1 %v8988_v13  ;;  %v9040_v53 = vld [vmem:[#allocation3 + $0x770] ss:$36 sps:$4 sm:$0xff]  }
 0x8d4   :  { %v9041_v13 = vld [vmem:[#allocation3 + $0xb0] ss:$36 sps:$4 sm:$0xff]  }
 0x8d5   :  { %6420 = vmatpush2.bf16.msra.mxu0 %v8983_v9  ;;  %v9042_v9 = vld [vmem:[#allocation3 + $0x530] ss:$36 sps:$4 sm:$0xff]  }
 0x8d6   :  { %6461 = vmatpush2.bf16.msra.mxu1 %v8986_v11  ;;  %6421 = vmatprep.subr.bf16.mxu0 %v8991_v18  ;;  %v9043_v11 = vld [vmem:[#allocation3 + $0x2a8] ss:$36 sps:$4 sm:$0xff]  }
 0x8d7   :  { %6462 = vmatprep.subr.bf16.mxu1 %v8994_v20  ;;  %v9044_v18 = vld [vmem:[#allocation3 + $0x728] ss:$36 sps:$4 sm:$0xff]  }
 0x8d8   :  { %v9045_v20 = vld [vmem:[#allocation3 + $0x68] ss:$36 sps:$4 sm:$0xff]  }
 0x8d9   :  { %6422 = vmatpush2.bf16.msra.mxu0 %v8989_v23  ;;  %v9046_v23 = vld [vmem:[#allocation3 + $0x4e8] ss:$36 sps:$4 sm:$0xff]  }
 0x8da   :  { %6463 = vmatpush2.bf16.msra.mxu1 %v8992_v26  ;;  %6423 = vmatprep.subr.bf16.mxu0 %v8997_v28  ;;  %v9047_v26 = vld [vmem:[#allocation3 + $0x260] ss:$36 sps:$4 sm:$0xff]  }
 0x8db   :  { %6464 = vmatprep.subr.bf16.mxu1 %v9000_v12  ;;  %v9048_v28 = vld [vmem:[#allocation3 + $0x6e0] ss:$36 sps:$4 sm:$0xff]  }
 0x8dc   :  { %v9049_v12 = vld [vmem:[#allocation3 + $0x20] ss:$36 sps:$4 sm:$0xff]  }
 0x8dd   :  { %6424 = vmatpush2.bf16.msra.mxu0 %v8995_v33  ;;  %v9050_v33 = vld [vmem:[#allocation3 + $0x4a0] ss:$36 sps:$4 sm:$0xff]  }
 0x8de   :  { %6465 = vmatpush2.bf16.msra.mxu1 %v8998_v34  ;;  %6425 = vmatprep.subr.bf16.mxu0 %v9003_v35 }
 0x8df   :  { %6466 = vmatprep.subr.bf16.mxu1 %v9006_v3 }
 0x8e1   :  { %6426 = vmatpush2.bf16.msra.mxu0 %v9001_v37 }
 0x8e2   :  { %6467 = vmatpush2.bf16.msra.mxu1 %v9004_v24  ;;  %6427 = vmatprep.subr.bf16.mxu0 %v9009_v27 }
 0x8e3   :  { %6468 = vmatprep.subr.bf16.mxu1 %v9012_v38 }
 0x8e5   :  { %6428 = vmatpush2.bf16.msra.mxu0 %v9007_v40 }
 0x8e6   :  { %6469 = vmatpush2.bf16.msra.mxu1 %v9010_v15  ;;  %6429 = vmatprep.subr.bf16.mxu0 %v9015_v17 }
 0x8e7   :  { %6470 = vmatprep.subr.bf16.mxu1 %v9018_v45 }
 0x8e9   :  { %6430 = vmatpush2.bf16.msra.mxu0 %v9013_v48 }
 0x8ea   :  { %6471 = vmatpush2.bf16.msra.mxu1 %v9016_v51  ;;  %7862 = vmatprep.subr.bf16.mxu0 %v9019_v29 }
 0x8eb   :  { %7884 = vmatprep.subr.bf16.mxu1 %v9020_v32 }
 0x8ec   :  { %v6187_v21 = vpop.f32.mrf.mxu0  ;;  %6432 = vmatmul.mubr.bf16.vlgmr.msra.gmra.mxu0 %v9991_v25 }
 0x8ed   :  { %v6228_v30 = vpop.f32.mrf.mxu1  ;;  %6473 = vmatmul.mubr.bf16.vlgmr.msra.gmra.mxu1 %v9995_v56  ;;  %7863 = vmatpush3.bf16.msra.mxu0 %v9021_v8 }
 0x8ee   :  { %v10015_v22 = vadd.f32 %v6228_v30, %v6187_v21  ;;  %7885 = vmatpush3.bf16.msra.mxu1 %v9022_v16  ;;  %v6189_v58 = vpop.f32.mrf.mxu0  ;;  %7864 = vmatprep.subr.bf16.mxu0 %v9023_v36 }
 0x8ef   :  { %v6230_v43 = vpop.f32.mrf.mxu1  ;;  %7886 = vmatprep.subr.bf16.mxu1 %v9024_v19  ;;  %6513 = vmatprep.mubr.bf16.mxu0 %v9993_v31  ;;  %v9035_v31 = vld [vmem:[#allocation3 + $0x338] ss:$36 sps:$4 sm:$0xff]  }
 0x8f0   :  { %v10017_v59 = vadd.f32 %v6230_v43, %v6189_v58  ;;  %6553 = vmatprep.mubr.bf16.mxu1 %v9997_v7  ;;  %v6191_v60 = vpop.f32.mrf.mxu0  ;;  %v9036_v7 = vld [vmem:[#allocation3 + $0x7b8] ss:$36 sps:$4 sm:$0xff]  }
 0x8f1   :  { %v6232_v61 = vpop.f32.mrf.mxu1  ;;  %7865 = vmatpush3.bf16.msra.mxu0 %v9025_v57 }
 0x8f2   :  { %7887 = vmatpush3.bf16.msra.mxu1 %v9026_v6  ;;  %v6192_v63 = vpop.f32.mrf.mxu0  ;;  %7866 = vmatprep.subr.bf16.mxu0 %v9027_v49 }
 0x8f3   :  { %v6233_v0 = vpop.f32.mrf.mxu1  ;;  %7888 = vmatprep.subr.bf16.mxu1 %v9028_v46 }
 0x8f5   :  { %7867 = vmatpush3.bf16.msra.mxu0 %v9029_v14 }
 0x8f6   :  { %7889 = vmatpush3.bf16.msra.mxu1 %v9030_v62  ;;  %7868 = vmatprep.subr.bf16.mxu0 %v9031_v2 }
 0x8f7   :  { %7890 = vmatprep.subr.bf16.mxu1 %v9032_v1 }
 0x8f9   :  { %7869 = vmatpush3.bf16.msra.mxu0 %v9033_v10 }
 0x8fa   :  { %7891 = vmatpush3.bf16.msra.mxu1 %v9034_v5  ;;  %7870 = vmatprep.subr.bf16.mxu0 %v9035_v31 }
 0x8fb   :  { %7892 = vmatprep.subr.bf16.mxu1 %v9036_v7 }
 0x8fd   :  { %7871 = vmatpush3.bf16.msra.mxu0 %v9037_v42 }
 0x8fe   :  { %7893 = vmatpush3.bf16.msra.mxu1 %v9038_v44  ;;  %7872 = vmatprep.subr.bf16.mxu0 %v9039_v47 }
 0x8ff   :  { %7894 = vmatprep.subr.bf16.mxu1 %v9040_v53 }
 0x901   :  { %7873 = vmatpush3.bf16.msra.mxu0 %v9041_v13 }
 0x902   :  { %7895 = vmatpush3.bf16.msra.mxu1 %v9042_v9  ;;  %7874 = vmatprep.subr.bf16.mxu0 %v9043_v11 }
 0x903   :  { %7896 = vmatprep.subr.bf16.mxu1 %v9044_v18 }
 0x905   :  { %7875 = vmatpush3.bf16.msra.mxu0 %v9045_v20 }
 0x906   :  { %7897 = vmatpush3.bf16.msra.mxu1 %v9046_v23  ;;  %7876 = vmatprep.subr.bf16.mxu0 %v9047_v26 }
 0x907   :  { %7898 = vmatprep.subr.bf16.mxu1 %v9048_v28 }
 0x909   :  { %7877 = vmatpush3.bf16.msra.mxu0 %v9049_v12 }
 0x90a   :  { %7899 = vmatpush3.bf16.msra.mxu1 %v9050_v33 }
 0x90c   :  { %6514 = vmatmul.mubr.bf16.vlgmr.msra.gmra.mxu0 %v9991_v25 }
 0x90d   :  { %6554 = vmatmul.mubr.bf16.vlgmr.msra.gmra.mxu1 %v9995_v56 }
 0x92c   :  { %v6269_v34 = vpop.f32.mrf.mxu0 }
 0x92d   :  { %v6310_v35 = vpop.f32.mrf.mxu1 }
 0x92e   :  { %v10023_v3 = vadd.f32 %v6310_v35, %v6269_v34  ;;  %v6271_v37 = vpop.f32.mrf.mxu0 }
 0x92f   :  { %v6312_v24 = vpop.f32.mrf.mxu1 }
 0x930   :  { %v10025_v27 = vadd.f32 %v6312_v24, %v6271_v37  ;;  %v6273_v38 = vpop.f32.mrf.mxu0  ;;  %v6567_v24 = vrot.slane %v10017_v59, 4 }
 0x931   :  { %v6314_v40 = vpop.f32.mrf.mxu1  ;;  %v6616_v38 = vmul.f32 %v10017_v59, %v10017_v59 }
 0x932   :  { %v6274_v15 = vpop.f32.mrf.mxu0  ;;  %v6579_v40 = vrot.slane %v10025_v27, 4 }
 0x933   :  { %v6315_v17 = vpop.f32.mrf.mxu1  ;;  %v6618_v15 = vmul.f32 %v10025_v27, %v10025_v27 }
 0x96c   :  { %v6351_v45 = vpop.f32.mrf.mxu0 }
 0x96d   :  { %v6392_v48 = vpop.f32.mrf.mxu1 }
 0x96e   :  { %v10027_v51 = vadd.f32 %v6392_v48, %v6351_v45  ;;  %v6353_v29 = vpop.f32.mrf.mxu0  ;;  %v6573_v48 = vrot.slane %v10023_v3, 4 }
 0x96f   :  { %v6394_v25 = vpop.f32.mrf.mxu1 }
 0x970   :  { %v6585_v56 = vrot.slane %v10027_v51, 4  ;;  %v6619_v32 = vmul.f32 %v10027_v51, %v10027_v51  ;;  %v10032_v8 = vadd.f32 %v6394_v25, %v6353_v29  ;;  %v6355_v16 = vpop.f32.mrf.mxu0  ;;  %v6617_v29 = vmul.f32 %v10023_v3, %v10023_v3 }
 0x971   :  { %v6396_v36 = vpop.f32.mrf.mxu1  ;;  %v6561_v25 = vrot.slane %v10015_v22, 4  ;;  %v6568_v16 = vadd.f32 %v6567_v24, %v10017_v59 }
 0x972   :  { %v6586_v19 = vadd.f32 %v6585_v56, %v10027_v51  ;;  %v6648_v21 = vrot.slane %v6619_v32, 4  ;;  %v6591_v30 = vrot.slane %v10032_v8, 4  ;;  %v6620_v57 = vmul.f32 %v10032_v8, %v10032_v8  ;;  %v6356_v6 = vpop.f32.mrf.mxu0 }
 0x973   :  { %v6397_v58 = vpop.f32.mrf.mxu1  ;;  %v6615_v56 = vmul.f32 %v10015_v22, %v10015_v22  ;;  %v6630_v36 = vrot.slane %v6616_v38, 4 }
 0x974   :  { %v6587_v43 = vrot.slane %v6586_v19, 2  ;;  %v6649_v49 = vadd.f32 %v6648_v21, %v6619_v32  ;;  %v6592_v46 = vadd.f32 %v6591_v30, %v10032_v8  ;;  %v6654_v60 = vrot.slane %v6620_v57, 4 }
 0x975   :  { %v6642_v21 = vrot.slane %v6618_v15, 4 }
 0x976   :  { %v6588_v61 = vadd.f32 %v6587_v43, %v6586_v19  ;;  %v6650_v14 = vrot.slane %v6649_v49, 2  ;;  %v6593_v62 = vrot.slane %v6592_v46, 2  ;;  %v6655_v63 = vadd.f32 %v6654_v60, %v6620_v57 }
 0x977   :  { %v6580_v19 = vadd.f32 %v6579_v40, %v10025_v27 }
 0x978   :  { %v6589_v0 = vrot.slane %v6588_v61, 1  ;;  %v6651_v2 = vadd.f32 %v6650_v14, %v6649_v49  ;;  %v6594_v1 = vadd.f32 %v6593_v62, %v6592_v46  ;;  %v6656_v10 = vrot.slane %v6655_v63, 2 }
 0x97a   :  { %v6590_v5 = vadd.f32 %v6589_v0, %v6588_v61  ;;  %v6652_v31 = vrot.slane %v6651_v2, 1  ;;  %v6595_v7 = vrot.slane %v6594_v1, 1  ;;  %v6657_v42 = vadd.f32 %v6656_v10, %v6655_v63 }
 0x97c   :  { %v6653_v44 = vadd.f32 %v6652_v31, %v6651_v2  ;;  %v10039_v47 = vmul.f32 0.125, %v6590_v5  ;;  %v6596_v53 = vadd.f32 %v6595_v7, %v6594_v1  ;;  %v6658_v13 = vrot.slane %v6657_v42, 1 }
 0x97e   :  { %v6691_v9 = vmul.f32 0.125, %v6653_v44  ;;  %v6700_v11 = vmul.f32 %v10039_v47, %v10039_v47  ;;  %v6659_v18 = vadd.f32 %v6658_v13, %v6657_v42  ;;  %v10043_v20 = vmul.f32 0.125, %v6596_v53 }
 0x980   :  { %v6709_v23 = vsub.f32 %v6691_v9, %v6700_v11  ;;  %v6692_v26 = vmul.f32 0.125, %v6659_v18  ;;  %v6701_v28 = vmul.f32 %v10043_v20, %v10043_v20 }
 0x982   :  { %v6718_v12 = vmax.f32 %v6709_v23, 0.0  ;;  %v6710_v33 = vsub.f32 %v6692_v26, %v6701_v28 }
 0x984   :  { %v6729_v34 = vadd.f32 1e-05, %v6718_v12  ;;  %v6719_v35 = vmax.f32 %v6710_v33, 0.0 }
 0x986   :  { %v6730_v37 = vadd.f32 1e-05, %v6719_v35  ;;  %9051 = vrsqrt.f32 %v6729_v34 }
 0x988   :  { %9053 = vrsqrt.f32 %v6730_v37 }
 0x993   :  { %v10053_v17 = vpop.eup %9051 }
 0x995   :  { %v10055_v45 = vpop.eup %9053 }
 0x996   :  { %v6754_v32 = vcombine.low %v10053_v17, %v10055_v45 }
 0x997   :  { %9460 = shalt.err (!%p9457_p12)
}
 0x998   :  { %7063 = dma.vmem_to_hbm [thread:$0]  %s7061_s22, 128, %s10205_s20, [#allocation8]   ;;  %v6574_v30 = vadd.f32 %v6573_v48, %v10023_v3  ;;  %v6636_v57 = vrot.slane %v6617_v29, 4  ;;  %v6562_v6 = vadd.f32 %v6561_v25, %v10015_v22  ;;  %v6624_v58 = vrot.slane %v6615_v56, 4 }
 0x999   :  { %v6569_v43 = vrot.slane %v6568_v16, 2  ;;  %v6631_v49 = vadd.f32 %v6630_v36, %v6616_v38  ;;  %v6581_v46 = vrot.slane %v6580_v19, 2  ;;  %v6643_v60 = vadd.f32 %v6642_v21, %v6618_v15  ;;  %s9543_s20 = smov [#allocation28]  }
 0x99a   :  { %v6575_v61 = vrot.slane %v6574_v30, 2  ;;  %v6637_v14 = vadd.f32 %v6636_v57, %v6617_v29  ;;  %v6563_v62 = vrot.slane %v6562_v6, 2  ;;  %v6625_v63 = vadd.f32 %v6624_v58, %v6615_v56  ;;  %s7070_s1 = sshll.u32 %s9543_s20, 4  ;;  %s7071_s1 = int_to_ptr.vmem [resolvable:$true] %s7070_s1 }
 0x99b   :  { %v6570_v0 = vadd.f32 %v6569_v43, %v6568_v16  ;;  %v6632_v2 = vrot.slane %v6631_v49, 2  ;;  %v6582_v1 = vadd.f32 %v6581_v46, %v6580_v19  ;;  %v6644_v10 = vrot.slane %v6643_v60, 2  ;;  %s9469_s24 = scalar_lea.vmem %s7071_s1, 1152  ;;  %p9474_p0 = scmp.lt.s32.totalorder %s7071_s1, %s7071_s1 }
 0x99c   :  { %v6576_v5 = vadd.f32 %v6575_v61, %v6574_v30  ;;  %v6638_v31 = vrot.slane %v6637_v14, 2  ;;  %v6564_v7 = vadd.f32 %v6563_v62, %v6562_v6  ;;  %v6626_v42 = vrot.slane %v6625_v63, 2  ;;  %p9470_p13 = scmp.ne.s32.totalorder %s7071_s1, %s9469_s24  ;;  %p9475_p2 = scmp.lt.s32.totalorder %s9469_s24, %s9469_s24 }
 0x99d   :  { %v6571_v44 = vrot.slane %v6570_v0, 1  ;;  %v6633_v53 = vadd.f32 %v6632_v2, %v6631_v49  ;;  %v6583_v13 = vrot.slane %v6582_v1, 1  ;;  %v6645_v9 = vadd.f32 %v6644_v10, %v6643_v60 }
 0x99e   :  { %v6577_v11 = vrot.slane %v6576_v5, 1  ;;  %v6639_v18 = vadd.f32 %v6638_v31, %v6637_v14  ;;  %v6565_v23 = vrot.slane %v6564_v7, 1  ;;  %v6627_v26 = vadd.f32 %v6626_v42, %v6625_v63  ;;  %p9476_p3 = por %p9475_p2, %p9474_p0 }
 0x99f   :  { %v6572_v28 = vadd.f32 %v6571_v44, %v6570_v0  ;;  %v6634_v12 = vrot.slane %v6633_v53, 1  ;;  %v6584_v33 = vadd.f32 %v6583_v13, %v6582_v1  ;;  %v6646_v34 = vrot.slane %v6645_v9, 1 }
 0x9a0   :  { %v6578_v35 = vadd.f32 %v6577_v11, %v6576_v5  ;;  %v6640_v37 = vrot.slane %v6639_v18, 1  ;;  %v6566_v24 = vadd.f32 %v6565_v23, %v6564_v7  ;;  %v6628_v38 = vrot.slane %v6627_v26, 1  ;;  %p9477_p4 = pnand %p9476_p3, %p9470_p13 }
 0x9a1   :  { %v6635_v40 = vadd.f32 %v6634_v12, %v6633_v53  ;;  %v10072_v15 = vmul.f32 0.125, %v6572_v28  ;;  %v6647_v48 = vadd.f32 %v6646_v34, %v6645_v9  ;;  %v10074_v29 = vmul.f32 0.125, %v6584_v33 }
 0x9a2   :  { %v6641_v25 = vadd.f32 %v6640_v37, %v6639_v18  ;;  %v10076_v56 = vmul.f32 0.125, %v6578_v35  ;;  %v6629_v19 = vadd.f32 %v6628_v38, %v6627_v26  ;;  %v10078_v21 = vmul.f32 0.125, %v6566_v24 }
 0x9a3   :  { %v6688_v57 = vmul.f32 0.125, %v6635_v40  ;;  %v6697_v6 = vmul.f32 %v10072_v15, %v10072_v15  ;;  %v6690_v58 = vmul.f32 0.125, %v6647_v48  ;;  %v6699_v43 = vmul.f32 %v10074_v29, %v10074_v29 }
 0x9a4   :  { %v6689_v62 = vmul.f32 0.125, %v6641_v25  ;;  %v6698_v63 = vmul.f32 %v10076_v56, %v10076_v56  ;;  %v6687_v7 = vmul.f32 0.125, %v6629_v19  ;;  %v6696_v42 = vmul.f32 %v10078_v21, %v10078_v21 }
 0x9a5   :  { %v6706_v44 = vsub.f32 %v6688_v57, %v6697_v6  ;;  %v6708_v53 = vsub.f32 %v6690_v58, %v6699_v43  ;;  %v6845_v17 = vsub.s32 5, %v9820_v39  ;;  %v6849_v45 = vsub.s32 6, %v9820_v39 }
 0x9a6   :  { %v6707_v28 = vsub.f32 %v6689_v62, %v6698_v63  ;;  %v6705_v37 = vsub.f32 %v6687_v7, %v6696_v42 }
 0x9a7   :  { %v6715_v24 = vmax.f32 %v6706_v44, 0.0  ;;  %v6717_v38 = vmax.f32 %v6708_v53, 0.0 }
 0x9a8   :  { %v6714_v43 = vmax.f32 %v6705_v37, 0.0 }
 0x9ac   :  { %v6433_v16 = vpop.f32.mrf.mxu0 }
 0x9ad   :  { %v6474_v36 = vpop.f32.mrf.mxu1 }
 0x9ae   :  { %v10080_v30 = vadd.f32 %v6474_v36, %v6433_v16  ;;  %v6435_v49 = vpop.f32.mrf.mxu0  ;;  %v6716_v36 = vmax.f32 %v6707_v28, 0.0 }
 0x9af   :  { %v6476_v46 = vpop.f32.mrf.mxu1 }
 0x9b0   :  { %v6597_v60 = vrot.slane %v10080_v30, 4  ;;  %v6621_v61 = vmul.f32 %v10080_v30, %v10080_v30  ;;  %v10089_v14 = vadd.f32 %v6476_v46, %v6435_v49  ;;  %v6437_v0 = vpop.f32.mrf.mxu0  ;;  %v6726_v49 = vadd.f32 1e-05, %v6715_v24 }
 0x9b1   :  { %v6478_v2 = vpop.f32.mrf.mxu1  ;;  %v6728_v46 = vadd.f32 1e-05, %v6717_v38  ;;  %v6727_v0 = vadd.f32 1e-05, %v6716_v36 }
 0x9b2   :  { %v6598_v1 = vadd.f32 %v6597_v60, %v10080_v30  ;;  %v6660_v10 = vrot.slane %v6621_v61, 4  ;;  %v6603_v5 = vrot.slane %v10089_v14, 4  ;;  %v6622_v31 = vmul.f32 %v10089_v14, %v10089_v14  ;;  %v6438_v13 = vpop.f32.mrf.mxu0 }
 0x9b3   :  { %v6479_v9 = vpop.f32.mrf.mxu1  ;;  %9055 = vrsqrt.f32 %v6728_v46 }
 0x9b4   :  { %v6599_v11 = vrot.slane %v6598_v1, 2  ;;  %v6661_v18 = vadd.f32 %v6660_v10, %v6621_v61  ;;  %v6604_v23 = vadd.f32 %v6603_v5, %v10089_v14  ;;  %v6666_v26 = vrot.slane %v6622_v31, 4 }
 0x9b5   :  { %9057 = vrsqrt.f32 %v6726_v49 }
 0x9b6   :  { %v6600_v12 = vadd.f32 %v6599_v11, %v6598_v1  ;;  %v6662_v33 = vrot.slane %v6661_v18, 2  ;;  %v6605_v34 = vrot.slane %v6604_v23, 2  ;;  %v6667_v35 = vadd.f32 %v6666_v26, %v6622_v31 }
 0x9b7   :  { %v6725_v31 = vadd.f32 1e-05, %v6714_v43  ;;  %9059 = vrsqrt.f32 %v6727_v0 }
 0x9b8   :  { %v6601_v40 = vrot.slane %v6600_v12, 1  ;;  %v6663_v48 = vadd.f32 %v6662_v33, %v6661_v18  ;;  %v6606_v25 = vadd.f32 %v6605_v34, %v6604_v23  ;;  %v6668_v16 = vrot.slane %v6667_v35, 2 }
 0x9b9   :  { %9061 = vrsqrt.f32 %v6725_v31 }
 0x9ba   :  { %v6602_v19 = vadd.f32 %v6601_v40, %v6600_v12  ;;  %v6664_v57 = vrot.slane %v6663_v48, 1  ;;  %v6607_v6 = vrot.slane %v6606_v25, 1  ;;  %v6669_v58 = vadd.f32 %v6668_v16, %v6667_v35 }
 0x9bc   :  { %v6665_v60 = vadd.f32 %v6664_v57, %v6663_v48  ;;  %v10100_v61 = vmul.f32 0.125, %v6602_v19  ;;  %v6608_v62 = vadd.f32 %v6607_v6, %v6606_v25  ;;  %v6670_v63 = vrot.slane %v6669_v58, 1 }
 0x9be   :  { %v6693_v2 = vmul.f32 0.125, %v6665_v60  ;;  %v6702_v1 = vmul.f32 %v10100_v61, %v10100_v61  ;;  %v6671_v10 = vadd.f32 %v6670_v63, %v6669_v58  ;;  %v10104_v5 = vmul.f32 0.125, %v6608_v62 }
 0x9c0   :  { %v6711_v7 = vsub.f32 %v6693_v2, %v6702_v1  ;;  %v6694_v42 = vmul.f32 0.125, %v6671_v10  ;;  %v6703_v44 = vmul.f32 %v10104_v5, %v10104_v5  ;;  %v9056_v23 = vpop.eup %9055  ;;  %v6776_v1 = vrot.slane %v6754_v32, %v9823_v41 }
 0x9c1   :  { %v6853_v32 = vsub.s32 7, %v9820_v39 }
 0x9c2   :  { %v6720_v53 = vmax.f32 %v6711_v7, 0.0  ;;  %v6712_v13 = vsub.f32 %v6694_v42, %v6703_v44  ;;  %v9058_v26 = vpop.eup %9057 }
 0x9c4   :  { %v6731_v9 = vadd.f32 1e-05, %v6720_v53  ;;  %v6721_v11 = vmax.f32 %v6712_v13, 0.0  ;;  %v9060_v33 = vpop.eup %9059 }
 0x9c5   :  { %v6753_v34 = vcombine.low %v9060_v33, %v9056_v23 }
 0x9c6   :  { %v6732_v18 = vadd.f32 1e-05, %v6721_v11  ;;  %9063 = vrsqrt.f32 %v6731_v9  ;;  %v9062_v24 = vpop.eup %9061  ;;  %v6723_v11 = vld [vmem:[#allocation17] sm:$0xff] }
 0x9c7   :  { %v6752_v48 = vcombine.low %v9062_v24, %v9058_v26  ;;  %v6769_v19 = vrot.slane %v6753_v34, %v9823_v41 }
 0x9c8   :  { %9065 = vrsqrt.f32 %v6732_v18 }
 0x9c9   :  { %v6762_v60 = vrot.slane %v6752_v48, %v9823_v41 }
 0x9cb   :  { %v6784_v2 = vcombine.low %v6762_v60, %v6769_v19 }
 0x9cc   :  { %v7878_v28 = vpop.f32.mrf.mxu0 }
 0x9cd   :  { %v7900_v12 = vpop.f32.mrf.mxu1  ;;  %v6792_v13 = vrot.slane %v6784_v2, %v9823_v41 }
 0x9ce   :  { %v7879_v35 = vpop.f32.mrf.mxu0 }
 0x9cf   :  { %v7901_v37 = vpop.f32.mrf.mxu1  ;;  %v7880_v38 = vadd.f32 %v7879_v35, %v7878_v28  ;;  %v6841_v28 = vsub.s32 4, %v9820_v39 }
 0x9d0   :  { %v7902_v40 = vadd.f32 %v7901_v37, %v7900_v12  ;;  %v7881_v25 = vpop.f32.mrf.mxu0 }
 0x9d1   :  { %v7903_v16 = vpop.f32.mrf.mxu1 }
 0x9d2   :  { %v10108_v36 = vadd.f32 %v7902_v40, %v7880_v38  ;;  %v7882_v57 = vpop.f32.mrf.mxu0 }
 0x9d3   :  { %v7904_v6 = vpop.f32.mrf.mxu1  ;;  %v9064_v58 = vpop.eup %9063 }
 0x9d4   :  { %v6609_v43 = vrot.slane %v10108_v36, 4  ;;  %v6623_v49 = vmul.f32 %v10108_v36, %v10108_v36 }
 0x9d5   :  { %v9066_v46 = vpop.eup %9065 }
 0x9d6   :  { %v6755_v62 = vcombine.low %v9064_v58, %v9066_v46  ;;  %v6610_v63 = vadd.f32 %v6609_v43, %v10108_v36  ;;  %v6672_v0 = vrot.slane %v6623_v49, 4 }
 0x9d8   :  { %v6783_v10 = vrot.slane %v6755_v62, %v9823_v41  ;;  %v6611_v31 = vrot.slane %v6610_v63, 2  ;;  %v6673_v7 = vadd.f32 %v6672_v0, %v6623_v49 }
 0x9da   :  { %v6785_v42 = vcombine.low %v6776_v1, %v6783_v10  ;;  %v6612_v44 = vadd.f32 %v6611_v31, %v6610_v63  ;;  %v6674_v53 = vrot.slane %v6673_v7, 2 }
 0x9dc   :  { %v6799_v9 = vrot.slane %v6785_v42, %v9823_v41  ;;  %v6613_v18 = vrot.slane %v6612_v44, 1  ;;  %v6675_v23 = vadd.f32 %v6674_v53, %v6673_v7 }
 0x9de   :  { %v6800_v26 = vcombine.low %v6792_v13, %v6799_v9  ;;  %v6614_v33 = vadd.f32 %v6613_v18, %v6612_v44  ;;  %v6676_v34 = vrot.slane %v6675_v23, 1 }
 0x9e0   :  { %v6817_v12 = vmul.f32 %v6800_v26, %v6723_v11  ;;  %v6677_v63 = vadd.f32 %v6676_v34, %v6675_v23  ;;  %v10139_v0 = vmul.f32 0.125, %v6614_v33 }
 0x9e2   :  { %v6826_v35 = vrot.slane %v6817_v12, %v9831_v50  ;;  %v6830_v37 = vrot.slane %v6817_v12, %v9835_v52  ;;  %v6834_v24 = vrot.slane %v6817_v12, %v9838_v54  ;;  %v6838_v38 = vrot.slane %v6817_v12, %v9841_v55 }
 0x9e3   :  { %v6842_v40 = vrot.slane %v6817_v12, %v6841_v28  ;;  %v6846_v48 = vrot.slane %v6817_v12, %v6845_v17  ;;  %v6850_v25 = vrot.slane %v6817_v12, %v6849_v45  ;;  %v6854_v16 = vrot.slane %v6817_v12, %v6853_v32 }
 0x9e4   :  { %v6868_v19 = vmul.f32 %v6826_v35, %v10078_v21  ;;  %v6869_v57 = vmul.f32 %v6830_v37, %v10072_v15  ;;  %v6870_v39 = vmul.f32 %v6834_v24, %v10076_v56  ;;  %v6871_v6 = vmul.f32 %v6838_v38, %v10074_v29 }
 0x9e5   :  { %v6872_v58 = vmul.f32 %v6842_v40, %v10039_v47  ;;  %v6873_v43 = vmul.f32 %v6846_v48, %v10043_v20  ;;  %v6874_v49 = vmul.f32 %v6850_v25, %v10100_v61  ;;  %v6875_v46 = vmul.f32 %v6854_v16, %v10104_v5 }
 0x9e6   :  { %v6886_v60 = vcombine.low %v6868_v19, %v6869_v57  ;;  %v6887_v62 = vcombine.low %v6870_v39, %v6871_v6  ;;  %v6957_v29 = vmul.f32 %v6842_v40, %v10027_v51  ;;  %v6958_v47 = vmul.f32 %v6846_v48, %v10032_v8  ;;  %v6819_v8 = vld [vmem:[#allocation26] sm:$0xff] }
 0x9e7   :  { %v6888_v21 = vcombine.low %v6872_v58, %v6873_v43  ;;  %v6889_v2 = vcombine.low %v6874_v49, %v6875_v46  ;;  %v6959_v5 = vmul.f32 %v6850_v25, %v10080_v30  ;;  %v6960_v1 = vmul.f32 %v6854_v16, %v10089_v14 }
 0x9e8   :  { %v6896_v15 = vrot.slane %v6886_v60, %v9823_v41  ;;  %v6903_v56 = vrot.slane %v6887_v62, %v9823_v41  ;;  %v6695_v31 = vmul.f32 0.125, %v6677_v63  ;;  %v6704_v7 = vmul.f32 %v10139_v0, %v10139_v0 }
 0x9e9   :  { %v6910_v20 = vrot.slane %v6888_v21, %v9823_v41  ;;  %v6917_v61 = vrot.slane %v6889_v2, %v9823_v41  ;;  %v6953_v30 = vmul.f32 %v6826_v35, %v10015_v22  ;;  %v6954_v14 = vmul.f32 %v6830_v37, %v10017_v59  ;;  %v6724_v2 = vld [vmem:[#allocation17 + $0x8] sm:$0x1] }
 0x9ea   :  { %v6918_v10 = vcombine.low %v6896_v15, %v6903_v56  ;;  %v6713_v53 = vsub.f32 %v6695_v31, %v6704_v7  ;;  %v6955_v23 = vmul.f32 %v6834_v24, %v10023_v3  ;;  %v6956_v26 = vmul.f32 %v6838_v38, %v10025_v27 }
 0x9eb   :  { %v6919_v42 = vcombine.low %v6910_v20, %v6917_v61  ;;  %v6820_v61 = vld [vmem:[#allocation26 + $0x8] sm:$0x1] }
 0x9ec   :  { %v6926_v44 = vrot.slane %v6918_v10, %v9823_v41  ;;  %v6722_v13 = vmax.f32 %v6713_v53, 0.0 }
 0x9ed   :  { %v6933_v51 = vrot.slane %v6919_v42, %v9823_v41 }
 0x9ee   :  { %v6733_v11 = vadd.f32 1e-05, %v6722_v13 }
 0x9ef   :  { %v6934_v9 = vcombine.low %v6926_v44, %v6933_v51 }
 0x9f0   :  { %9067 = vrsqrt.f32 %v6733_v11 }
 0x9f1   :  { %v6951_v18 = vsub.f32 %v6819_v8, %v6934_v9 }
 0x9f3   :  { %v6967_v12 = vrot.slane %v6951_v18, %v9831_v50  ;;  %v6971_v33 = vrot.slane %v6951_v18, %v9835_v52  ;;  %v6975_v34 = vrot.slane %v6951_v18, %v9838_v54  ;;  %v6979_v40 = vrot.slane %v6951_v18, %v9841_v55 }
 0x9f4   :  { %v6983_v48 = vrot.slane %v6951_v18, %v6841_v28  ;;  %v6987_v25 = vrot.slane %v6951_v18, %v6845_v17  ;;  %v6991_v16 = vrot.slane %v6951_v18, %v6849_v45  ;;  %v6995_v19 = vrot.slane %v6951_v18, %v6853_v32 }
 0x9f5   :  { %v7009_v22 = vadd.f32 %v6967_v12, %v6953_v30  ;;  %v7010_v35 = vadd.f32 %v6971_v33, %v6954_v14  ;;  %v7011_v59 = vadd.f32 %v6975_v34, %v6955_v23  ;;  %v7012_v37 = vadd.f32 %v6979_v40, %v6956_v26 }
 0x9f6   :  { %v7013_v3 = vadd.f32 %v6983_v48, %v6957_v29  ;;  %v7014_v24 = vadd.f32 %v6987_v25, %v6958_v47  ;;  %v7015_v27 = vadd.f32 %v6991_v16, %v6959_v5  ;;  %v7016_v38 = vadd.f32 %v6995_v19, %v6960_v1 }
 0x9f7   :  { %vm7018_vm6 = vcmp.gt.f32.partialorder %v7009_v22, 0.0  ;;  %vm7019_vm7 = vcmp.gt.f32.partialorder %v7010_v35, 0.0  ;;  %vm7020_vm8 = vcmp.gt.f32.partialorder %v7011_v59, 0.0  ;;  %vm7021_vm9 = vcmp.gt.f32.partialorder %v7012_v37, 0.0 }
 0x9f8   :  { %vm7022_vm10 = vcmp.gt.f32.partialorder %v7013_v3, 0.0  ;;  %vm7023_vm11 = vcmp.gt.f32.partialorder %v7014_v24, 0.0  ;;  %vm7024_vm12 = vcmp.gt.f32.partialorder %v7015_v27, 0.0  ;;  %vm7025_vm13 = vcmp.gt.f32.partialorder %v7016_v38, 0.0 }
 0x9f9   :  { %v7031_v52 = vmul.f32 %v7013_v3, %v9937_v4  ;;  %v7032_v54 = vmul.f32 %v7014_v24, %v9937_v4  ;;  %v7033_v55 = vmul.f32 %v7015_v27, %v9937_v4  ;;  %v7034_v28 = vmul.f32 %v7016_v38, %v9937_v4 }
 0x9fa   :  { %v7027_v17 = vmul.f32 %v7009_v22, %v9937_v4  ;;  %v7028_v45 = vmul.f32 %v7010_v35, %v9937_v4  ;;  %v7029_v32 = vmul.f32 %v7011_v59, %v9937_v4  ;;  %v7030_v57 = vmul.f32 %v7012_v37, %v9937_v4 }
 0x9fb   :  { %v7042_v39 = vsel %vm7024_vm12, %v7015_v27, %v7033_v55  ;;  %v7043_v6 = vsel %vm7025_vm13, %v7016_v38, %v7034_v28  ;;  %v7040_v58 = vsel %vm7022_vm10, %v7013_v3, %v7031_v52  ;;  %v7041_v43 = vsel %vm7023_vm11, %v7014_v24, %v7032_v54 }
 0x9fc   :  { %7051 = vst [vmem:[#allocation28 + $0x30] sm:$0xff] %v7042_v39  ;;  %7052 = vst [vmem:[#allocation28 + $0x38] sm:$0xff] %v7043_v6  ;;  %v7036_v49 = vsel %vm7018_vm6, %v7009_v22, %v7027_v17  ;;  %v7037_v46 = vsel %vm7019_vm7, %v7010_v35, %v7028_v45  ;;  %v7038_v60 = vsel %vm7020_vm8, %v7011_v59, %v7029_v32 }
 0x9fd   :  { %v7039_v62 = vsel %vm7021_vm9, %v7012_v37, %v7030_v57  ;;  %7049 = vst [vmem:[#allocation28 + $0x20] sm:$0xff] %v7040_v58  ;;  %7050 = vst [vmem:[#allocation28 + $0x28] sm:$0xff] %v7041_v43  ;;  %v9068_v63 = vpop.eup %9067 }
 0x9fe   :  { %7045 = vst [vmem:[#allocation28] sm:$0xff] %v7036_v49  ;;  %7046 = vst [vmem:[#allocation28 + $0x8] sm:$0xff] %v7037_v46  ;;  %v6807_v21 = vrot.slane %v9068_v63, %v9823_v41 }
 0x9ff   :  { %7047 = vst [vmem:[#allocation28 + $0x10] sm:$0xff] %v7038_v60  ;;  %7048 = vst [vmem:[#allocation28 + $0x18] sm:$0xff] %v7039_v62 }
 0xa00   :  { %v6814_v15 = vrot.slane %v6807_v21, %v9823_v41 }
 0xa02   :  { %v6818_v56 = vmul.f32 %v6814_v15, %v6724_v2 }
 0xa04   :  { %v6858_v29 = vrot.slane %v6818_v56, %v9831_v50 }
 0xa06   :  { %v6876_v47 = vmul.f32 %v6858_v29, %v10139_v0  ;;  %v6961_v10 = vmul.f32 %v6858_v29, %v10108_v36 }
 0xa08   :  { %v6941_v20 = vrot.slane %v6876_v47, %v9823_v41 }
 0xa0a   :  { %v6948_v5 = vrot.slane %v6941_v20, %v9823_v41 }
 0xa0c   :  { %v6952_v1 = vsub.f32 %v6820_v61, %v6948_v5 }
 0xa0e   :  { %v6999_v31 = vrot.slane %v6952_v1, %v9831_v50 }
 0xa10   :  { %v7017_v7 = vadd.f32 %v6999_v31, %v6961_v10 }
 0xa12   :  { %vm7026_vm14 = vcmp.gt.f32.partialorder %v7017_v7, 0.0  ;;  %v7035_v42 = vmul.f32 %v7017_v7, %v9937_v4 }
 0xa14   :  { %v7044_v44 = vsel %vm7026_vm14, %v7017_v7, %v7035_v42 }
 0xa15   :  { %7053 = vst [vmem:[#allocation28 + $0x40] sm:$0xff] %v7044_v44 }
 0xa16   :  { %9480 = shalt.err (!%p9477_p4)
}
 0xa17   :  { %7073 = dma.vmem_to_hbm [thread:$0]  %s7071_s1, 1152, %s10206_s21, [#allocation29]  }
 0xa18   :  { %9515 = dma.done.wait [#allocation8], 128  }
 0xa19   :  { %9516 = vsyncadd [#allocation8], 4294967168 }
 0xa1a   :  { %9517 = dma.done.wait [#allocation29], 1152  }
 0xa1b   :  { %9518 = vsyncadd [#allocation29], 4294966144 }
 0xa1c   :  { %7080 = vsyncpa [#allocation7], 1 }
 0xa1d   :  { %7081 = vsyncpa [#allocation10], 1 }
 0xa1e   :  { %7082 = vsyncpa [#allocation13], 1 }
 0xa1f   :  { %7083 = vsyncpa [#allocation16], 1 }
 0xa20   :  { %7084 = vsyncpa [#allocation19], 1 }
 0xa21   :  { %7085 = vsyncpa [#allocation22], 1 }
 0xa22   :  { %7086 = vsyncpa [#allocation25], 1 }
 0xa23   :  { %7087 = vsyncpa [#allocation8], 1 }
 0xa24   :  { %7088 = vsyncpa [#allocation29], 1 }
 0xa25   :  { %7089 = vsyncmov [#allocation4] }
 0xa28   :  { %s7090_s25 = vpop.sfrf %7089 }
 0xa29   :  { %p7838_p10 = scmp.ne.s32.totalorder %s7090_s25, 0 }
 0xa2b   :  { %7094 = shalt.err (%p7838_p10)  }
 0xa2c   :  { %7096 = vsyncmov [#allocation4 + $0x1] }
 0xa2f   :  { %s7097_s11 = vpop.sfrf %7096 }
 0xa30   :  { %p7839_p5 = scmp.ne.s32.totalorder %s7097_s11, 0 }
 0xa32   :  { %7101 = shalt.err (%p7839_p5)  }

</bundles_post_ra>
